<compile_context>
chip_gen: v6e
topology: v6e:2x2x1
jax: 0.10.0
libtpu: 0.0.40
codegen_flags: <defaults>
</compile_context>

<pallas_src>
import functools

import jax
import jax.numpy as jnp
from jax.experimental import pallas as pl
from jax.experimental.pallas import tpu as pltpu


def _leaky_relu(x, slope=0.1):
    return jnp.where(x > 0, x, slope * x)


# ----------------------------------------------------------------------------
# fully fused forward kernel (one grid step == one batch element)
# ----------------------------------------------------------------------------
def make_fofe_cnn_kernel(lengths, n_cnn_layers, Ld, E):
    lengths = tuple(int(k) for k in lengths)
    H = len(lengths)
    C = 2 * E
    k_max = max(lengths)
    PAD1 = (3 * k_max - 1) // 2        # halo of the widest folded 1-D filter
    N2TAPS = 15                        # folded 2-D filter is 5x3

    def kernel(q_ref, aq_ref, docp_ref, wl_ref, wc_ref, w2_ref, wse_ref,
               out_ref, xpad):
        f32 = jnp.float32

        # ---- zero ONLY the halo of the fofe-code / activation scratch ----
        xpad[0:2, :, :] = jnp.zeros((2, Ld + 2, C), f32)
        xpad[2 + H:4 + H, :, :] = jnp.zeros((2, Ld + 2, C), f32)
        xpad[2:2 + H, 0:1, :] = jnp.zeros((H, 1, C), f32)
        xpad[2:2 + H, 1 + Ld:2 + Ld, :] = jnp.zeros((H, 1, C), f32)

        # ---- fofe_linear: query FOFE code, broadcast + stored once ----
        q = q_ref[0].astype(f32)                                   # (Lq, E)
        pooled = jnp.sum(q * aq_ref[...], axis=0, keepdims=True)   # (1, E)
        q_code = jnp.maximum(
            jnp.dot(pooled, wl_ref[...], preferred_element_type=f32), 0.0)
        xpad[2:2 + H, 1:1 + Ld, E:C] = jnp.broadcast_to(
            q_code[None], (H, Ld, E))

        # ---- doc fofe_conv1d per length: folded 3k-tap conv on the MXU ----
        off = 0
        for h, k in enumerate(lengths):
            taps = 3 * k
            base = PAD1 - (taps - 1) // 2
            acc = jnp.dot(docp_ref[0, base:base + Ld, :].astype(f32),
                          wc_ref[off], preferred_element_type=f32)
            for d in range(1, taps):
                acc = acc + jnp.dot(
                    docp_ref[0, base + d:base + d + Ld, :].astype(f32),
                    wc_ref[off + d], preferred_element_type=f32)
            off += taps
            xpad[2 + h, 1:1 + Ld, 0:E] = _leaky_relu(acc)          # doc half only

        # ---- cnn: n_cnn_layers x folded fofe_conv2d (5x3 per-tap matmuls) ----
        act = None
        # TODO(synk): switch to lax.fori_loop over layers once sizes grow.
        for layer in range(n_cnn_layers):
            acc2 = None
            for e in range(5):
                for dw in range(3):
                    tap = xpad[e:e + H, dw:dw + Ld, :].reshape(H * Ld, C)
                    t = jnp.dot(tap, w2_ref[layer * N2TAPS + e * 3 + dw],
                                preferred_element_type=f32)
                    acc2 = t if acc2 is None else acc2 + t
            act = _leaky_relu(acc2).reshape(H, Ld, C)
            if layer + 1 < n_cnn_layers:
                xpad[2:2 + H, 1:1 + Ld, :] = act    # feed next layer (halo stays 0)

        # ---- s/e scores directly as (2, Ld): per-row accumulate + log_softmax ----
        sc = None
        for h in range(H):
            t = jax.lax.dot_general(wse_ref[h], act[h],
                                    (((1,), (1,)), ((), ())),
                                    preferred_element_type=f32)    # (2, Ld)
            sc = t if sc is None else sc + t
        m = jnp.max(sc, axis=1, keepdims=True)
        z = sc - m
        lse = jnp.log(jnp.sum(jnp.exp(z), axis=1, keepdims=True))
        out_ref[0] = (z - lse).astype(out_ref.dtype)

    return kernel, PAD1


# ----------------------------------------------------------------------------
# wrapper: host-side FOFE-filter folding + single pallas_call
# ----------------------------------------------------------------------------
def fofe_cnn_forward(query, doc, params, alpha, lengths):
    B, Lq, E = query.shape
    _, Ld, _ = doc.shape
    H = len(lengths)
    C = 2 * E
    n_cnn = len(params["w2"])
    alpha = float(alpha)

    kernel, PAD1 = make_fofe_cnn_kernel(lengths, n_cnn, Ld, E)

    # ---- host-side constants / weight folding (tiny, outside the kernel) ----
    # per-position alpha powers for query FOFE pooling, broadcast over E
    aq = jnp.broadcast_to(
        (alpha ** jnp.arange(Lq - 1, -1, -1, dtype=jnp.float32))[:, None],
        (Lq, E))
    # document padded with the folded-conv halo (zero padding done by XLA)
    doc_pad = jnp.pad(doc.astype(jnp.float32),
                      ((0, 0), (PAD1, PAD1), (0, 0)))

    # fold FOFE(k) depthwise filter into the dilated 3-tap conv -> 3k taps
    wc_blocks = []
    for h, k in enumerate(lengths):
        w = params["wc"][h]                                   # (3, E, E) [tap, in, out]
        folded = jnp.stack(
            [(alpha ** (k - 1 - (d % k))) * w[d // k] for d in range(3 * k)],
            axis=0)                                           # (3k, E, E)
        wc_blocks.append(folded)
    wc_fold = jnp.concatenate(wc_blocks, axis=0)              # (sum 3k, E, E)

    # fold FOFE(3x1 along H) into each 3x3 conv -> 5x3 taps
    f2d = [alpha ** 2, alpha, 1.0]
    w2_blocks = []
    for w in params["w2"]:                                    # (3, 3, C, C) [dh, dw, in, out]
        g = []
        for e in range(5):
            acc = jnp.zeros((3, C, C), jnp.float32)
            for df in range(3):
                dh = e - df
                if 0 <= dh <= 2:
                    acc = acc + f2d[df] * w[dh]
            g.append(acc)                                     # (3, C, C) over dw
        w2_blocks.append(jnp.stack(g, axis=0).reshape(15, C, C))
    w2_fold = jnp.concatenate(w2_blocks, axis=0)              # (n_cnn*15, C, C)

    # s/e score weights as (H, 2, C) so the kernel emits scores as (2, Ld)
    wse_t = jnp.stack([params["ws"], params["we"]], axis=1)   # (H, 2, C)

    T1 = wc_fold.shape[0]
    T2 = w2_fold.shape[0]
    Ldp = Ld + 2 * PAD1

    out = pl.pallas_call(
        kernel,
        out_shape=jax.ShapeDtypeStruct((B, 2, Ld), jnp.float32),
        grid=(B,),
        in_specs=[
            pl.BlockSpec((1, Lq, E), lambda b: (b, 0, 0)),      # query
            pl.BlockSpec((Lq, E), lambda b: (0, 0)),            # alpha powers (resident)
            pl.BlockSpec((1, Ldp, E), lambda b: (b, 0, 0)),     # zero-padded document
            pl.BlockSpec((E, E), lambda b: (0, 0)),             # fofe_linear weight
            pl.BlockSpec((T1, E, E), lambda b: (0, 0, 0)),      # folded conv1d weights
            pl.BlockSpec((T2, C, C), lambda b: (0, 0, 0)),      # folded conv2d weights
            pl.BlockSpec((H, 2, C), lambda b: (0, 0, 0)),       # s/e score weights
        ],
        out_specs=pl.BlockSpec((1, 2, Ld), lambda b: (b, 0, 0)),
        scratch_shapes=[
            pltpu.VMEM((H + 4, Ld + 2, C), jnp.float32),        # zero-halo fofe code / act
        ],
        compiler_params=pltpu.CompilerParams(
            dimension_semantics=("parallel",)),
    )(query, aq, doc_pad, params["wl"], wc_fold, w2_fold, wse_t)

    return out[:, 0, :], out[:, 1, :]


# ----------------------------------------------------------------------------
# main
# ----------------------------------------------------------------------------
if __name__ == "__main__":
    emb_dims = 8          # E
    fofe_alpha = 0.9
    fofe_max_length = 7
    lengths = tuple(range(3, fofe_max_length + 1, 2))   # (3, 5, 7) -> H = 3
    B, Lq, Ld = 2, 8, 16
    E, C, H = emb_dims, 2 * emb_dims, len(lengths)

    key = jax.random.PRNGKey(0)
    keys = list(jax.random.split(key, 12))
    kit = iter(keys)

    def nrm(shape, fan_in):
        # kaiming-normal-like deterministic init
        return jax.random.normal(next(kit), shape, jnp.float32) * (2.0 / fan_in) ** 0.5

    params = {
        "wl": nrm((E, E), E),                               # fofe_linear weight [in, out]
        "wc": [nrm((3, E, E), 3 * E) for _ in lengths],     # dilated Conv1d weights [tap, in, out]
        "w2": [nrm((3, 3, C, C), 9 * C) for _ in range(3)], # fofe_conv2d weights [dh, dw, in, out]
        "ws": nrm((H, C), H * C),                           # s_conv weight [h, c]
        "we": nrm((H, C), H * C),                           # e_conv weight [h, c]
    }

    query = jax.random.normal(next(kit), (B, Lq, E), jnp.float32)
    doc = jax.random.normal(next(kit), (B, Ld, E), jnp.float32)

    fwd = jax.jit(functools.partial(fofe_cnn_forward, params=params,
                                    alpha=fofe_alpha, lengths=lengths))
    s_score, e_score = fwd(query, doc)
    jax.block_until_ready((s_score, e_score))

    assert s_score.shape == (B, Ld) and e_score.shape == (B, Ld)
    assert bool(jnp.all(jnp.isfinite(s_score))) and bool(jnp.all(jnp.isfinite(e_score)))
    # log_softmax rows must sum to ~1 in prob space
    assert bool(jnp.allclose(jnp.sum(jnp.exp(s_score), axis=1), 1.0, atol=1e-4))
    assert bool(jnp.allclose(jnp.sum(jnp.exp(e_score), axis=1), 1.0, atol=1e-4))
    print("KERNEL_OK")
</pallas_src>

<mosaic_0001>
module attributes {stable_mosaic.version = 11 : i64} {
  func.func @kernel(%arg0: i32, %arg1: memref<1x8x8xf32, #tpu.memory_space<vmem>>, %arg2: memref<8x8xf32, #tpu.memory_space<vmem>>, %arg3: memref<1x36x8xf32, #tpu.memory_space<vmem>>, %arg4: memref<8x8xf32, #tpu.memory_space<vmem>>, %arg5: memref<45x8x8xf32, #tpu.memory_space<vmem>>, %arg6: memref<45x16x16xf32, #tpu.memory_space<vmem>>, %arg7: memref<3x2x16xf32, #tpu.memory_space<vmem>>, %arg8: memref<1x2x16xf32, #tpu.memory_space<vmem>>, %arg9: memref<7x18x16xf32, #tpu.memory_space<vmem>>) attributes {dimension_semantics = [#tpu.dimension_semantics<parallel>], iteration_bounds = array<i64: 2>, scalar_prefetch = 0 : i64, scratch_operands = 1 : i64, tpu.core_type = #tpu.core_type<tc>, window_params = [{transform_indices = @transform_0, window_bounds = array<i64: 1, 8, 8>}, {pipeline_mode = #tpu.pipeline_mode<synchronous>, transform_indices = @transform_1, window_bounds = array<i64: 8, 8>}, {transform_indices = @transform_2, window_bounds = array<i64: 1, 36, 8>}, {pipeline_mode = #tpu.pipeline_mode<synchronous>, transform_indices = @transform_3, window_bounds = array<i64: 8, 8>}, {pipeline_mode = #tpu.pipeline_mode<synchronous>, transform_indices = @transform_4, window_bounds = array<i64: 45, 8, 8>}, {pipeline_mode = #tpu.pipeline_mode<synchronous>, transform_indices = @transform_5, window_bounds = array<i64: 45, 16, 16>}, {pipeline_mode = #tpu.pipeline_mode<synchronous>, transform_indices = @transform_6, window_bounds = array<i64: 3, 2, 16>}, {transform_indices = @transform_7, window_bounds = array<i64: 1, 2, 16>}]} {
    %cst = arith.constant 0.000000e+00 : f32
    %0 = vector.broadcast %cst : f32 to vector<2x18x16xf32>
    %c0 = arith.constant 0 : index
    %c0_0 = arith.constant 0 : index
    %c0_1 = arith.constant 0 : index
    %1 = vector.load %arg9[%c0, %c0_0, %c0_1] : memref<7x18x16xf32, #tpu.memory_space<vmem>>, vector<2x18x16xf32>
    tpu.vector_store %arg9[%c0, %c0_0, %c0_1], %0 {strides = array<i32>} : memref<7x18x16xf32, #tpu.memory_space<vmem>>, vector<2x18x16xf32>,
    %cst_2 = arith.constant 0.000000e+00 : f32
    %2 = vector.broadcast %cst_2 : f32 to vector<2x18x16xf32>
    %c5 = arith.constant 5 : index
    %c0_3 = arith.constant 0 : index
    %c0_4 = arith.constant 0 : index
    %3 = vector.load %arg9[%c5, %c0_3, %c0_4] : memref<7x18x16xf32, #tpu.memory_space<vmem>>, vector<2x18x16xf32>
    tpu.vector_store %arg9[%c5, %c0_3, %c0_4], %2 {strides = array<i32>} : memref<7x18x16xf32, #tpu.memory_space<vmem>>, vector<2x18x16xf32>,
    %cst_5 = arith.constant 0.000000e+00 : f32
    %4 = vector.broadcast %cst_5 : f32 to vector<3x1x16xf32>
    %c2 = arith.constant 2 : index
    %c0_6 = arith.constant 0 : index
    %c0_7 = arith.constant 0 : index
    %5 = vector.load %arg9[%c2, %c0_6, %c0_7] : memref<7x18x16xf32, #tpu.memory_space<vmem>>, vector<3x1x16xf32>
    tpu.vector_store %arg9[%c2, %c0_6, %c0_7], %4 {strides = array<i32>} : memref<7x18x16xf32, #tpu.memory_space<vmem>>, vector<3x1x16xf32>,
    %cst_8 = arith.constant 0.000000e+00 : f32
    %6 = vector.broadcast %cst_8 : f32 to vector<3x1x16xf32>
    %c2_9 = arith.constant 2 : index
    %c17 = arith.constant 17 : index
    %c0_10 = arith.constant 0 : index
    %7 = vector.load %arg9[%c2_9, %c17, %c0_10] : memref<7x18x16xf32, #tpu.memory_space<vmem>>, vector<3x1x16xf32>
    tpu.vector_store %arg9[%c2_9, %c17, %c0_10], %6 {strides = array<i32>} : memref<7x18x16xf32, #tpu.memory_space<vmem>>, vector<3x1x16xf32>,
    %c0_11 = arith.constant 0 : index
    %c0_12 = arith.constant 0 : index
    %c0_13 = arith.constant 0 : index
    %8 = vector.load %arg1[%c0_11, %c0_12, %c0_13] : memref<1x8x8xf32, #tpu.memory_space<vmem>>, vector<1x8x8xf32>
    %9 = vector.shape_cast %8 : vector<1x8x8xf32> to vector<8x8xf32>
    %c0_14 = arith.constant 0 : index
    %c0_15 = arith.constant 0 : index
    %10 = vector.load %arg2[%c0_14, %c0_15] : memref<8x8xf32, #tpu.memory_space<vmem>>, vector<8x8xf32>
    %11 = arith.mulf %9, %10 : vector<8x8xf32>
    %cst_16 = arith.constant dense<0.000000e+00> : vector<8xf32>
    %12 = vector.multi_reduction <add>, %11, %cst_16 [0] : vector<8x8xf32> to vector<8xf32>
    %13 = vector.shape_cast %12 : vector<8xf32> to vector<1x8xf32>
    %c0_17 = arith.constant 0 : index
    %c0_18 = arith.constant 0 : index
    %14 = vector.load %arg4[%c0_17, %c0_18] : memref<8x8xf32, #tpu.memory_space<vmem>>, vector<8x8xf32>
    %cst_19 = arith.constant dense<0.000000e+00> : vector<1x8xf32>
    %15 = tpu.matmul %13, %14, %cst_19 {dimension_numbers = #tpu.dot_dimension_numbers<[1], [0], [0], [1], [0, 0, 1, 1], [], []>} : vector<1x8xf32>, vector<8x8xf32>, vector<1x8xf32> -> vector<1x8xf32>
    %cst_20 = arith.constant 0.000000e+00 : f32
    %16 = vector.broadcast %cst_20 : f32 to vector<1x8xf32>
    %17 = arith.maximumf %15, %16 : vector<1x8xf32>
    %18 = vector.shape_cast %17 : vector<1x8xf32> to vector<1x1x8xf32>
    %19 = vector.shape_cast %18 : vector<1x1x8xf32> to vector<1x1x8xf32>
    %20 = vector.broadcast %19 : vector<1x1x8xf32> to vector<3x16x8xf32>
    %c2_21 = arith.constant 2 : index
    %c1 = arith.constant 1 : index
    %c8 = arith.constant 8 : index
    %21 = vector.load %arg9[%c2_21, %c1, %c8] : memref<7x18x16xf32, #tpu.memory_space<vmem>>, vector<3x16x8xf32>
    tpu.vector_store %arg9[%c2_21, %c1, %c8], %20 {strides = array<i32>} : memref<7x18x16xf32, #tpu.memory_space<vmem>>, vector<3x16x8xf32>,
    %c0_22 = arith.constant 0 : index
    %c6 = arith.constant 6 : index
    %c0_23 = arith.constant 0 : index
    %22 = vector.load %arg3[%c0_22, %c6, %c0_23] : memref<1x36x8xf32, #tpu.memory_space<vmem>>, vector<1x16x8xf32>
    %23 = vector.shape_cast %22 : vector<1x16x8xf32> to vector<16x8xf32>
    %c0_24 = arith.constant 0 : index
    %c0_25 = arith.constant 0 : index
    %c0_26 = arith.constant 0 : index
    %24 = vector.load %arg5[%c0_24, %c0_25, %c0_26] : memref<45x8x8xf32, #tpu.memory_space<vmem>>, vector<1x8x8xf32>
    %25 = vector.shape_cast %24 : vector<1x8x8xf32> to vector<8x8xf32>
    %cst_27 = arith.constant dense<0.000000e+00> : vector<16x8xf32>
    %26 = tpu.matmul %23, %25, %cst_27 {dimension_numbers = #tpu.dot_dimension_numbers<[1], [0], [0], [1], [0, 0, 1, 1], [], []>} : vector<16x8xf32>, vector<8x8xf32>, vector<16x8xf32> -> vector<16x8xf32>
    %c0_28 = arith.constant 0 : index
    %c7 = arith.constant 7 : index
    %c0_29 = arith.constant 0 : index
    %27 = vector.load %arg3[%c0_28, %c7, %c0_29] : memref<1x36x8xf32, #tpu.memory_space<vmem>>, vector<1x16x8xf32>
    %28 = vector.shape_cast %27 : vector<1x16x8xf32> to vector<16x8xf32>
    %c1_30 = arith.constant 1 : index
    %c0_31 = arith.constant 0 : index
    %c0_32 = arith.constant 0 : index
    %29 = vector.load %arg5[%c1_30, %c0_31, %c0_32] : memref<45x8x8xf32, #tpu.memory_space<vmem>>, vector<1x8x8xf32>
    %30 = vector.shape_cast %29 : vector<1x8x8xf32> to vector<8x8xf32>
    %cst_33 = arith.constant dense<0.000000e+00> : vector<16x8xf32>
    %31 = tpu.matmul %28, %30, %cst_33 {dimension_numbers = #tpu.dot_dimension_numbers<[1], [0], [0], [1], [0, 0, 1, 1], [], []>} : vector<16x8xf32>, vector<8x8xf32>, vector<16x8xf32> -> vector<16x8xf32>
    %32 = arith.addf %26, %31 : vector<16x8xf32>
    %c0_34 = arith.constant 0 : index
    %c8_35 = arith.constant 8 : index
    %c0_36 = arith.constant 0 : index
    %33 = vector.load %arg3[%c0_34, %c8_35, %c0_36] : memref<1x36x8xf32, #tpu.memory_space<vmem>>, vector<1x16x8xf32>
    %34 = vector.shape_cast %33 : vector<1x16x8xf32> to vector<16x8xf32>
    %c2_37 = arith.constant 2 : index
    %c0_38 = arith.constant 0 : index
    %c0_39 = arith.constant 0 : index
    %35 = vector.load %arg5[%c2_37, %c0_38, %c0_39] : memref<45x8x8xf32, #tpu.memory_space<vmem>>, vector<1x8x8xf32>
    %36 = vector.shape_cast %35 : vector<1x8x8xf32> to vector<8x8xf32>
    %cst_40 = arith.constant dense<0.000000e+00> : vector<16x8xf32>
    %37 = tpu.matmul %34, %36, %cst_40 {dimension_numbers = #tpu.dot_dimension_numbers<[1], [0], [0], [1], [0, 0, 1, 1], [], []>} : vector<16x8xf32>, vector<8x8xf32>, vector<16x8xf32> -> vector<16x8xf32>
    %38 = arith.addf %32, %37 : vector<16x8xf32>
    %c0_41 = arith.constant 0 : index
    %c9 = arith.constant 9 : index
    %c0_42 = arith.constant 0 : index
    %39 = vector.load %arg3[%c0_41, %c9, %c0_42] : memref<1x36x8xf32, #tpu.memory_space<vmem>>, vector<1x16x8xf32>
    %40 = vector.shape_cast %39 : vector<1x16x8xf32> to vector<16x8xf32>
    %c3 = arith.constant 3 : index
    %c0_43 = arith.constant 0 : index
    %c0_44 = arith.constant 0 : index
    %41 = vector.load %arg5[%c3, %c0_43, %c0_44] : memref<45x8x8xf32, #tpu.memory_space<vmem>>, vector<1x8x8xf32>
    %42 = vector.shape_cast %41 : vector<1x8x8xf32> to vector<8x8xf32>
    %cst_45 = arith.constant dense<0.000000e+00> : vector<16x8xf32>
    %43 = tpu.matmul %40, %42, %cst_45 {dimension_numbers = #tpu.dot_dimension_numbers<[1], [0], [0], [1], [0, 0, 1, 1], [], []>} : vector<16x8xf32>, vector<8x8xf32>, vector<16x8xf32> -> vector<16x8xf32>
    %44 = arith.addf %38, %43 : vector<16x8xf32>
    %c0_46 = arith.constant 0 : index
    %c10 = arith.constant 10 : index
    %c0_47 = arith.constant 0 : index
    %45 = vector.load %arg3[%c0_46, %c10, %c0_47] : memref<1x36x8xf32, #tpu.memory_space<vmem>>, vector<1x16x8xf32>
    %46 = vector.shape_cast %45 : vector<1x16x8xf32> to vector<16x8xf32>
    %c4 = arith.constant 4 : index
    %c0_48 = arith.constant 0 : index
    %c0_49 = arith.constant 0 : index
    %47 = vector.load %arg5[%c4, %c0_48, %c0_49] : memref<45x8x8xf32, #tpu.memory_space<vmem>>, vector<1x8x8xf32>
    %48 = vector.shape_cast %47 : vector<1x8x8xf32> to vector<8x8xf32>
    %cst_50 = arith.constant dense<0.000000e+00> : vector<16x8xf32>
    %49 = tpu.matmul %46, %48, %cst_50 {dimension_numbers = #tpu.dot_dimension_numbers<[1], [0], [0], [1], [0, 0, 1, 1], [], []>} : vector<16x8xf32>, vector<8x8xf32>, vector<16x8xf32> -> vector<16x8xf32>
    %50 = arith.addf %44, %49 : vector<16x8xf32>
    %c0_51 = arith.constant 0 : index
    %c11 = arith.constant 11 : index
    %c0_52 = arith.constant 0 : index
    %51 = vector.load %arg3[%c0_51, %c11, %c0_52] : memref<1x36x8xf32, #tpu.memory_space<vmem>>, vector<1x16x8xf32>
    %52 = vector.shape_cast %51 : vector<1x16x8xf32> to vector<16x8xf32>
    %c5_53 = arith.constant 5 : index
    %c0_54 = arith.constant 0 : index
    %c0_55 = arith.constant 0 : index
    %53 = vector.load %arg5[%c5_53, %c0_54, %c0_55] : memref<45x8x8xf32, #tpu.memory_space<vmem>>, vector<1x8x8xf32>
    %54 = vector.shape_cast %53 : vector<1x8x8xf32> to vector<8x8xf32>
    %cst_56 = arith.constant dense<0.000000e+00> : vector<16x8xf32>
    %55 = tpu.matmul %52, %54, %cst_56 {dimension_numbers = #tpu.dot_dimension_numbers<[1], [0], [0], [1], [0, 0, 1, 1], [], []>} : vector<16x8xf32>, vector<8x8xf32>, vector<16x8xf32> -> vector<16x8xf32>
    %56 = arith.addf %50, %55 : vector<16x8xf32>
    %c0_57 = arith.constant 0 : index
    %c12 = arith.constant 12 : index
    %c0_58 = arith.constant 0 : index
    %57 = vector.load %arg3[%c0_57, %c12, %c0_58] : memref<1x36x8xf32, #tpu.memory_space<vmem>>, vector<1x16x8xf32>
    %58 = vector.shape_cast %57 : vector<1x16x8xf32> to vector<16x8xf32>
    %c6_59 = arith.constant 6 : index
    %c0_60 = arith.constant 0 : index
    %c0_61 = arith.constant 0 : index
    %59 = vector.load %arg5[%c6_59, %c0_60, %c0_61] : memref<45x8x8xf32, #tpu.memory_space<vmem>>, vector<1x8x8xf32>
    %60 = vector.shape_cast %59 : vector<1x8x8xf32> to vector<8x8xf32>
    %cst_62 = arith.constant dense<0.000000e+00> : vector<16x8xf32>
    %61 = tpu.matmul %58, %60, %cst_62 {dimension_numbers = #tpu.dot_dimension_numbers<[1], [0], [0], [1], [0, 0, 1, 1], [], []>} : vector<16x8xf32>, vector<8x8xf32>, vector<16x8xf32> -> vector<16x8xf32>
    %62 = arith.addf %56, %61 : vector<16x8xf32>
    %c0_63 = arith.constant 0 : index
    %c13 = arith.constant 13 : index
    %c0_64 = arith.constant 0 : index
    %63 = vector.load %arg3[%c0_63, %c13, %c0_64] : memref<1x36x8xf32, #tpu.memory_space<vmem>>, vector<1x16x8xf32>
    %64 = vector.shape_cast %63 : vector<1x16x8xf32> to vector<16x8xf32>
    %c7_65 = arith.constant 7 : index
    %c0_66 = arith.constant 0 : index
    %c0_67 = arith.constant 0 : index
    %65 = vector.load %arg5[%c7_65, %c0_66, %c0_67] : memref<45x8x8xf32, #tpu.memory_space<vmem>>, vector<1x8x8xf32>
    %66 = vector.shape_cast %65 : vector<1x8x8xf32> to vector<8x8xf32>
    %cst_68 = arith.constant dense<0.000000e+00> : vector<16x8xf32>
    %67 = tpu.matmul %64, %66, %cst_68 {dimension_numbers = #tpu.dot_dimension_numbers<[1], [0], [0], [1], [0, 0, 1, 1], [], []>} : vector<16x8xf32>, vector<8x8xf32>, vector<16x8xf32> -> vector<16x8xf32>
    %68 = arith.addf %62, %67 : vector<16x8xf32>
    %c0_69 = arith.constant 0 : index
    %c14 = arith.constant 14 : index
    %c0_70 = arith.constant 0 : index
    %69 = vector.load %arg3[%c0_69, %c14, %c0_70] : memref<1x36x8xf32, #tpu.memory_space<vmem>>, vector<1x16x8xf32>
    %70 = vector.shape_cast %69 : vector<1x16x8xf32> to vector<16x8xf32>
    %c8_71 = arith.constant 8 : index
    %c0_72 = arith.constant 0 : index
    %c0_73 = arith.constant 0 : index
    %71 = vector.load %arg5[%c8_71, %c0_72, %c0_73] : memref<45x8x8xf32, #tpu.memory_space<vmem>>, vector<1x8x8xf32>
    %72 = vector.shape_cast %71 : vector<1x8x8xf32> to vector<8x8xf32>
    %cst_74 = arith.constant dense<0.000000e+00> : vector<16x8xf32>
    %73 = tpu.matmul %70, %72, %cst_74 {dimension_numbers = #tpu.dot_dimension_numbers<[1], [0], [0], [1], [0, 0, 1, 1], [], []>} : vector<16x8xf32>, vector<8x8xf32>, vector<16x8xf32> -> vector<16x8xf32>
    %74 = arith.addf %68, %73 : vector<16x8xf32>
    %cst_75 = arith.constant 0.000000e+00 : f32
    %75 = vector.broadcast %cst_75 : f32 to vector<16x8xf32>
    %76 = arith.cmpf ogt, %74, %75 : vector<16x8xf32>
    %cst_76 = arith.constant 1.000000e-01 : f32
    %77 = vector.broadcast %cst_76 : f32 to vector<16x8xf32>
    %78 = arith.mulf %77, %74 : vector<16x8xf32>
    %79 = arith.select %76, %74, %78 : vector<16x8xi1>, vector<16x8xf32>
    %c2_77 = arith.constant 2 : index
    %c1_78 = arith.constant 1 : index
    %c0_79 = arith.constant 0 : index
    %80 = vector.load %arg9[%c2_77, %c1_78, %c0_79] : memref<7x18x16xf32, #tpu.memory_space<vmem>>, vector<1x16x8xf32>
    %81 = vector.shape_cast %80 : vector<1x16x8xf32> to vector<16x8xf32>
    %82 = vector.shape_cast %79 : vector<16x8xf32> to vector<1x16x8xf32>
    tpu.vector_store %arg9[%c2_77, %c1_78, %c0_79], %82 {strides = array<i32>} : memref<7x18x16xf32, #tpu.memory_space<vmem>>, vector<1x16x8xf32>,
    %c0_80 = arith.constant 0 : index
    %c3_81 = arith.constant 3 : index
    %c0_82 = arith.constant 0 : index
    %83 = vector.load %arg3[%c0_80, %c3_81, %c0_82] : memref<1x36x8xf32, #tpu.memory_space<vmem>>, vector<1x16x8xf32>
    %84 = vector.shape_cast %83 : vector<1x16x8xf32> to vector<16x8xf32>
    %c9_83 = arith.constant 9 : index
    %c0_84 = arith.constant 0 : index
    %c0_85 = arith.constant 0 : index
    %85 = vector.load %arg5[%c9_83, %c0_84, %c0_85] : memref<45x8x8xf32, #tpu.memory_space<vmem>>, vector<1x8x8xf32>
    %86 = vector.shape_cast %85 : vector<1x8x8xf32> to vector<8x8xf32>
    %cst_86 = arith.constant dense<0.000000e+00> : vector<16x8xf32>
    %87 = tpu.matmul %84, %86, %cst_86 {dimension_numbers = #tpu.dot_dimension_numbers<[1], [0], [0], [1], [0, 0, 1, 1], [], []>} : vector<16x8xf32>, vector<8x8xf32>, vector<16x8xf32> -> vector<16x8xf32>
    %c0_87 = arith.constant 0 : index
    %c4_88 = arith.constant 4 : index
    %c0_89 = arith.constant 0 : index
    %88 = vector.load %arg3[%c0_87, %c4_88, %c0_89] : memref<1x36x8xf32, #tpu.memory_space<vmem>>, vector<1x16x8xf32>
    %89 = vector.shape_cast %88 : vector<1x16x8xf32> to vector<16x8xf32>
    %c10_90 = arith.constant 10 : index
    %c0_91 = arith.constant 0 : index
    %c0_92 = arith.constant 0 : index
    %90 = vector.load %arg5[%c10_90, %c0_91, %c0_92] : memref<45x8x8xf32, #tpu.memory_space<vmem>>, vector<1x8x8xf32>
    %91 = vector.shape_cast %90 : vector<1x8x8xf32> to vector<8x8xf32>
    %cst_93 = arith.constant dense<0.000000e+00> : vector<16x8xf32>
    %92 = tpu.matmul %89, %91, %cst_93 {dimension_numbers = #tpu.dot_dimension_numbers<[1], [0], [0], [1], [0, 0, 1, 1], [], []>} : vector<16x8xf32>, vector<8x8xf32>, vector<16x8xf32> -> vector<16x8xf32>
    %93 = arith.addf %87, %92 : vector<16x8xf32>
    %c0_94 = arith.constant 0 : index
    %c5_95 = arith.constant 5 : index
    %c0_96 = arith.constant 0 : index
    %94 = vector.load %arg3[%c0_94, %c5_95, %c0_96] : memref<1x36x8xf32, #tpu.memory_space<vmem>>, vector<1x16x8xf32>
    %95 = vector.shape_cast %94 : vector<1x16x8xf32> to vector<16x8xf32>
    %c11_97 = arith.constant 11 : index
    %c0_98 = arith.constant 0 : index
    %c0_99 = arith.constant 0 : index
    %96 = vector.load %arg5[%c11_97, %c0_98, %c0_99] : memref<45x8x8xf32, #tpu.memory_space<vmem>>, vector<1x8x8xf32>
    %97 = vector.shape_cast %96 : vector<1x8x8xf32> to vector<8x8xf32>
    %cst_100 = arith.constant dense<0.000000e+00> : vector<16x8xf32>
    %98 = tpu.matmul %95, %97, %cst_100 {dimension_numbers = #tpu.dot_dimension_numbers<[1], [0], [0], [1], [0, 0, 1, 1], [], []>} : vector<16x8xf32>, vector<8x8xf32>, vector<16x8xf32> -> vector<16x8xf32>
    %99 = arith.addf %93, %98 : vector<16x8xf32>
    %c0_101 = arith.constant 0 : index
    %c6_102 = arith.constant 6 : index
    %c0_103 = arith.constant 0 : index
    %100 = vector.load %arg3[%c0_101, %c6_102, %c0_103] : memref<1x36x8xf32, #tpu.memory_space<vmem>>, vector<1x16x8xf32>
    %101 = vector.shape_cast %100 : vector<1x16x8xf32> to vector<16x8xf32>
    %c12_104 = arith.constant 12 : index
    %c0_105 = arith.constant 0 : index
    %c0_106 = arith.constant 0 : index
    %102 = vector.load %arg5[%c12_104, %c0_105, %c0_106] : memref<45x8x8xf32, #tpu.memory_space<vmem>>, vector<1x8x8xf32>
    %103 = vector.shape_cast %102 : vector<1x8x8xf32> to vector<8x8xf32>
    %cst_107 = arith.constant dense<0.000000e+00> : vector<16x8xf32>
    %104 = tpu.matmul %101, %103, %cst_107 {dimension_numbers = #tpu.dot_dimension_numbers<[1], [0], [0], [1], [0, 0, 1, 1], [], []>} : vector<16x8xf32>, vector<8x8xf32>, vector<16x8xf32> -> vector<16x8xf32>
    %105 = arith.addf %99, %104 : vector<16x8xf32>
    %c0_108 = arith.constant 0 : index
    %c7_109 = arith.constant 7 : index
    %c0_110 = arith.constant 0 : index
    %106 = vector.load %arg3[%c0_108, %c7_109, %c0_110] : memref<1x36x8xf32, #tpu.memory_space<vmem>>, vector<1x16x8xf32>
    %107 = vector.shape_cast %106 : vector<1x16x8xf32> to vector<16x8xf32>
    %c13_111 = arith.constant 13 : index
    %c0_112 = arith.constant 0 : index
    %c0_113 = arith.constant 0 : index
    %108 = vector.load %arg5[%c13_111, %c0_112, %c0_113] : memref<45x8x8xf32, #tpu.memory_space<vmem>>, vector<1x8x8xf32>
    %109 = vector.shape_cast %108 : vector<1x8x8xf32> to vector<8x8xf32>
    %cst_114 = arith.constant dense<0.000000e+00> : vector<16x8xf32>
    %110 = tpu.matmul %107, %109, %cst_114 {dimension_numbers = #tpu.dot_dimension_numbers<[1], [0], [0], [1], [0, 0, 1, 1], [], []>} : vector<16x8xf32>, vector<8x8xf32>, vector<16x8xf32> -> vector<16x8xf32>
    %111 = arith.addf %105, %110 : vector<16x8xf32>
    %c0_115 = arith.constant 0 : index
    %c8_116 = arith.constant 8 : index
    %c0_117 = arith.constant 0 : index
    %112 = vector.load %arg3[%c0_115, %c8_116, %c0_117] : memref<1x36x8xf32, #tpu.memory_space<vmem>>, vector<1x16x8xf32>
    %113 = vector.shape_cast %112 : vector<1x16x8xf32> to vector<16x8xf32>
    %c14_118 = arith.constant 14 : index
    %c0_119 = arith.constant 0 : index
    %c0_120 = arith.constant 0 : index
    %114 = vector.load %arg5[%c14_118, %c0_119, %c0_120] : memref<45x8x8xf32, #tpu.memory_space<vmem>>, vector<1x8x8xf32>
    %115 = vector.shape_cast %114 : vector<1x8x8xf32> to vector<8x8xf32>
    %cst_121 = arith.constant dense<0.000000e+00> : vector<16x8xf32>
    %116 = tpu.matmul %113, %115, %cst_121 {dimension_numbers = #tpu.dot_dimension_numbers<[1], [0], [0], [1], [0, 0, 1, 1], [], []>} : vector<16x8xf32>, vector<8x8xf32>, vector<16x8xf32> -> vector<16x8xf32>
    %117 = arith.addf %111, %116 : vector<16x8xf32>
    %c0_122 = arith.constant 0 : index
    %c9_123 = arith.constant 9 : index
    %c0_124 = arith.constant 0 : index
    %118 = vector.load %arg3[%c0_122, %c9_123, %c0_124] : memref<1x36x8xf32, #tpu.memory_space<vmem>>, vector<1x16x8xf32>
    %119 = vector.shape_cast %118 : vector<1x16x8xf32> to vector<16x8xf32>
    %c15 = arith.constant 15 : index
    %c0_125 = arith.constant 0 : index
    %c0_126 = arith.constant 0 : index
    %120 = vector.load %arg5[%c15, %c0_125, %c0_126] : memref<45x8x8xf32, #tpu.memory_space<vmem>>, vector<1x8x8xf32>
    %121 = vector.shape_cast %120 : vector<1x8x8xf32> to vector<8x8xf32>
    %cst_127 = arith.constant dense<0.000000e+00> : vector<16x8xf32>
    %122 = tpu.matmul %119, %121, %cst_127 {dimension_numbers = #tpu.dot_dimension_numbers<[1], [0], [0], [1], [0, 0, 1, 1], [], []>} : vector<16x8xf32>, vector<8x8xf32>, vector<16x8xf32> -> vector<16x8xf32>
    %123 = arith.addf %117, %122 : vector<16x8xf32>
    %c0_128 = arith.constant 0 : index
    %c10_129 = arith.constant 10 : index
    %c0_130 = arith.constant 0 : index
    %124 = vector.load %arg3[%c0_128, %c10_129, %c0_130] : memref<1x36x8xf32, #tpu.memory_space<vmem>>, vector<1x16x8xf32>
    %125 = vector.shape_cast %124 : vector<1x16x8xf32> to vector<16x8xf32>
    %c16 = arith.constant 16 : index
    %c0_131 = arith.constant 0 : index
    %c0_132 = arith.constant 0 : index
    %126 = vector.load %arg5[%c16, %c0_131, %c0_132] : memref<45x8x8xf32, #tpu.memory_space<vmem>>, vector<1x8x8xf32>
    %127 = vector.shape_cast %126 : vector<1x8x8xf32> to vector<8x8xf32>
    %cst_133 = arith.constant dense<0.000000e+00> : vector<16x8xf32>
    %128 = tpu.matmul %125, %127, %cst_133 {dimension_numbers = #tpu.dot_dimension_numbers<[1], [0], [0], [1], [0, 0, 1, 1], [], []>} : vector<16x8xf32>, vector<8x8xf32>, vector<16x8xf32> -> vector<16x8xf32>
    %129 = arith.addf %123, %128 : vector<16x8xf32>
    %c0_134 = arith.constant 0 : index
    %c11_135 = arith.constant 11 : index
    %c0_136 = arith.constant 0 : index
    %130 = vector.load %arg3[%c0_134, %c11_135, %c0_136] : memref<1x36x8xf32, #tpu.memory_space<vmem>>, vector<1x16x8xf32>
    %131 = vector.shape_cast %130 : vector<1x16x8xf32> to vector<16x8xf32>
    %c17_137 = arith.constant 17 : index
    %c0_138 = arith.constant 0 : index
    %c0_139 = arith.constant 0 : index
    %132 = vector.load %arg5[%c17_137, %c0_138, %c0_139] : memref<45x8x8xf32, #tpu.memory_space<vmem>>, vector<1x8x8xf32>
    %133 = vector.shape_cast %132 : vector<1x8x8xf32> to vector<8x8xf32>
    %cst_140 = arith.constant dense<0.000000e+00> : vector<16x8xf32>
    %134 = tpu.matmul %131, %133, %cst_140 {dimension_numbers = #tpu.dot_dimension_numbers<[1], [0], [0], [1], [0, 0, 1, 1], [], []>} : vector<16x8xf32>, vector<8x8xf32>, vector<16x8xf32> -> vector<16x8xf32>
    %135 = arith.addf %129, %134 : vector<16x8xf32>
    %c0_141 = arith.constant 0 : index
    %c12_142 = arith.constant 12 : index
    %c0_143 = arith.constant 0 : index
    %136 = vector.load %arg3[%c0_141, %c12_142, %c0_143] : memref<1x36x8xf32, #tpu.memory_space<vmem>>, vector<1x16x8xf32>
    %137 = vector.shape_cast %136 : vector<1x16x8xf32> to vector<16x8xf32>
    %c18 = arith.constant 18 : index
    %c0_144 = arith.constant 0 : index
    %c0_145 = arith.constant 0 : index
    %138 = vector.load %arg5[%c18, %c0_144, %c0_145] : memref<45x8x8xf32, #tpu.memory_space<vmem>>, vector<1x8x8xf32>
    %139 = vector.shape_cast %138 : vector<1x8x8xf32> to vector<8x8xf32>
    %cst_146 = arith.constant dense<0.000000e+00> : vector<16x8xf32>
    %140 = tpu.matmul %137, %139, %cst_146 {dimension_numbers = #tpu.dot_dimension_numbers<[1], [0], [0], [1], [0, 0, 1, 1], [], []>} : vector<16x8xf32>, vector<8x8xf32>, vector<16x8xf32> -> vector<16x8xf32>
    %141 = arith.addf %135, %140 : vector<16x8xf32>
    %c0_147 = arith.constant 0 : index
    %c13_148 = arith.constant 13 : index
    %c0_149 = arith.constant 0 : index
    %142 = vector.load %arg3[%c0_147, %c13_148, %c0_149] : memref<1x36x8xf32, #tpu.memory_space<vmem>>, vector<1x16x8xf32>
    %143 = vector.shape_cast %142 : vector<1x16x8xf32> to vector<16x8xf32>
    %c19 = arith.constant 19 : index
    %c0_150 = arith.constant 0 : index
    %c0_151 = arith.constant 0 : index
    %144 = vector.load %arg5[%c19, %c0_150, %c0_151] : memref<45x8x8xf32, #tpu.memory_space<vmem>>, vector<1x8x8xf32>
    %145 = vector.shape_cast %144 : vector<1x8x8xf32> to vector<8x8xf32>
    %cst_152 = arith.constant dense<0.000000e+00> : vector<16x8xf32>
    %146 = tpu.matmul %143, %145, %cst_152 {dimension_numbers = #tpu.dot_dimension_numbers<[1], [0], [0], [1], [0, 0, 1, 1], [], []>} : vector<16x8xf32>, vector<8x8xf32>, vector<16x8xf32> -> vector<16x8xf32>
    %147 = arith.addf %141, %146 : vector<16x8xf32>
    %c0_153 = arith.constant 0 : index
    %c14_154 = arith.constant 14 : index
    %c0_155 = arith.constant 0 : index
    %148 = vector.load %arg3[%c0_153, %c14_154, %c0_155] : memref<1x36x8xf32, #tpu.memory_space<vmem>>, vector<1x16x8xf32>
    %149 = vector.shape_cast %148 : vector<1x16x8xf32> to vector<16x8xf32>
    %c20 = arith.constant 20 : index
    %c0_156 = arith.constant 0 : index
    %c0_157 = arith.constant 0 : index
    %150 = vector.load %arg5[%c20, %c0_156, %c0_157] : memref<45x8x8xf32, #tpu.memory_space<vmem>>, vector<1x8x8xf32>
    %151 = vector.shape_cast %150 : vector<1x8x8xf32> to vector<8x8xf32>
    %cst_158 = arith.constant dense<0.000000e+00> : vector<16x8xf32>
    %152 = tpu.matmul %149, %151, %cst_158 {dimension_numbers = #tpu.dot_dimension_numbers<[1], [0], [0], [1], [0, 0, 1, 1], [], []>} : vector<16x8xf32>, vector<8x8xf32>, vector<16x8xf32> -> vector<16x8xf32>
    %153 = arith.addf %147, %152 : vector<16x8xf32>
    %c0_159 = arith.constant 0 : index
    %c15_160 = arith.constant 15 : index
    %c0_161 = arith.constant 0 : index
    %154 = vector.load %arg3[%c0_159, %c15_160, %c0_161] : memref<1x36x8xf32, #tpu.memory_space<vmem>>, vector<1x16x8xf32>
    %155 = vector.shape_cast %154 : vector<1x16x8xf32> to vector<16x8xf32>
    %c21 = arith.constant 21 : index
    %c0_162 = arith.constant 0 : index
    %c0_163 = arith.constant 0 : index
    %156 = vector.load %arg5[%c21, %c0_162, %c0_163] : memref<45x8x8xf32, #tpu.memory_space<vmem>>, vector<1x8x8xf32>
    %157 = vector.shape_cast %156 : vector<1x8x8xf32> to vector<8x8xf32>
    %cst_164 = arith.constant dense<0.000000e+00> : vector<16x8xf32>
    %158 = tpu.matmul %155, %157, %cst_164 {dimension_numbers = #tpu.dot_dimension_numbers<[1], [0], [0], [1], [0, 0, 1, 1], [], []>} : vector<16x8xf32>, vector<8x8xf32>, vector<16x8xf32> -> vector<16x8xf32>
    %159 = arith.addf %153, %158 : vector<16x8xf32>
    %c0_165 = arith.constant 0 : index
    %c16_166 = arith.constant 16 : index
    %c0_167 = arith.constant 0 : index
    %160 = vector.load %arg3[%c0_165, %c16_166, %c0_167] : memref<1x36x8xf32, #tpu.memory_space<vmem>>, vector<1x16x8xf32>
    %161 = vector.shape_cast %160 : vector<1x16x8xf32> to vector<16x8xf32>
    %c22 = arith.constant 22 : index
    %c0_168 = arith.constant 0 : index
    %c0_169 = arith.constant 0 : index
    %162 = vector.load %arg5[%c22, %c0_168, %c0_169] : memref<45x8x8xf32, #tpu.memory_space<vmem>>, vector<1x8x8xf32>
    %163 = vector.shape_cast %162 : vector<1x8x8xf32> to vector<8x8xf32>
    %cst_170 = arith.constant dense<0.000000e+00> : vector<16x8xf32>
    %164 = tpu.matmul %161, %163, %cst_170 {dimension_numbers = #tpu.dot_dimension_numbers<[1], [0], [0], [1], [0, 0, 1, 1], [], []>} : vector<16x8xf32>, vector<8x8xf32>, vector<16x8xf32> -> vector<16x8xf32>
    %165 = arith.addf %159, %164 : vector<16x8xf32>
    %c0_171 = arith.constant 0 : index
    %c17_172 = arith.constant 17 : index
    %c0_173 = arith.constant 0 : index
    %166 = vector.load %arg3[%c0_171, %c17_172, %c0_173] : memref<1x36x8xf32, #tpu.memory_space<vmem>>, vector<1x16x8xf32>
    %167 = vector.shape_cast %166 : vector<1x16x8xf32> to vector<16x8xf32>
    %c23 = arith.constant 23 : index
    %c0_174 = arith.constant 0 : index
    %c0_175 = arith.constant 0 : index
    %168 = vector.load %arg5[%c23, %c0_174, %c0_175] : memref<45x8x8xf32, #tpu.memory_space<vmem>>, vector<1x8x8xf32>
    %169 = vector.shape_cast %168 : vector<1x8x8xf32> to vector<8x8xf32>
    %cst_176 = arith.constant dense<0.000000e+00> : vector<16x8xf32>
    %170 = tpu.matmul %167, %169, %cst_176 {dimension_numbers = #tpu.dot_dimension_numbers<[1], [0], [0], [1], [0, 0, 1, 1], [], []>} : vector<16x8xf32>, vector<8x8xf32>, vector<16x8xf32> -> vector<16x8xf32>
    %171 = arith.addf %165, %170 : vector<16x8xf32>
    %cst_177 = arith.constant 0.000000e+00 : f32
    %172 = vector.broadcast %cst_177 : f32 to vector<16x8xf32>
    %173 = arith.cmpf ogt, %171, %172 : vector<16x8xf32>
    %cst_178 = arith.constant 1.000000e-01 : f32
    %174 = vector.broadcast %cst_178 : f32 to vector<16x8xf32>
    %175 = arith.mulf %174, %171 : vector<16x8xf32>
    %176 = arith.select %173, %171, %175 : vector<16x8xi1>, vector<16x8xf32>
    %c3_179 = arith.constant 3 : index
    %c1_180 = arith.constant 1 : index
    %c0_181 = arith.constant 0 : index
    %177 = vector.load %arg9[%c3_179, %c1_180, %c0_181] : memref<7x18x16xf32, #tpu.memory_space<vmem>>, vector<1x16x8xf32>
    %178 = vector.shape_cast %177 : vector<1x16x8xf32> to vector<16x8xf32>
    %179 = vector.shape_cast %176 : vector<16x8xf32> to vector<1x16x8xf32>
    tpu.vector_store %arg9[%c3_179, %c1_180, %c0_181], %179 {strides = array<i32>} : memref<7x18x16xf32, #tpu.memory_space<vmem>>, vector<1x16x8xf32>,
    %c0_182 = arith.constant 0 : index
    %c0_183 = arith.constant 0 : index
    %c0_184 = arith.constant 0 : index
    %180 = vector.load %arg3[%c0_182, %c0_183, %c0_184] : memref<1x36x8xf32, #tpu.memory_space<vmem>>, vector<1x16x8xf32>
    %181 = vector.shape_cast %180 : vector<1x16x8xf32> to vector<16x8xf32>
    %c24 = arith.constant 24 : index
    %c0_185 = arith.constant 0 : index
    %c0_186 = arith.constant 0 : index
    %182 = vector.load %arg5[%c24, %c0_185, %c0_186] : memref<45x8x8xf32, #tpu.memory_space<vmem>>, vector<1x8x8xf32>
    %183 = vector.shape_cast %182 : vector<1x8x8xf32> to vector<8x8xf32>
    %cst_187 = arith.constant dense<0.000000e+00> : vector<16x8xf32>
    %184 = tpu.matmul %181, %183, %cst_187 {dimension_numbers = #tpu.dot_dimension_numbers<[1], [0], [0], [1], [0, 0, 1, 1], [], []>} : vector<16x8xf32>, vector<8x8xf32>, vector<16x8xf32> -> vector<16x8xf32>
    %c0_188 = arith.constant 0 : index
    %c1_189 = arith.constant 1 : index
    %c0_190 = arith.constant 0 : index
    %185 = vector.load %arg3[%c0_188, %c1_189, %c0_190] : memref<1x36x8xf32, #tpu.memory_space<vmem>>, vector<1x16x8xf32>
    %186 = vector.shape_cast %185 : vector<1x16x8xf32> to vector<16x8xf32>
    %c25 = arith.constant 25 : index
    %c0_191 = arith.constant 0 : index
    %c0_192 = arith.constant 0 : index
    %187 = vector.load %arg5[%c25, %c0_191, %c0_192] : memref<45x8x8xf32, #tpu.memory_space<vmem>>, vector<1x8x8xf32>
    %188 = vector.shape_cast %187 : vector<1x8x8xf32> to vector<8x8xf32>
    %cst_193 = arith.constant dense<0.000000e+00> : vector<16x8xf32>
    %189 = tpu.matmul %186, %188, %cst_193 {dimension_numbers = #tpu.dot_dimension_numbers<[1], [0], [0], [1], [0, 0, 1, 1], [], []>} : vector<16x8xf32>, vector<8x8xf32>, vector<16x8xf32> -> vector<16x8xf32>
    %190 = arith.addf %184, %189 : vector<16x8xf32>
    %c0_194 = arith.constant 0 : index
    %c2_195 = arith.constant 2 : index
    %c0_196 = arith.constant 0 : index
    %191 = vector.load %arg3[%c0_194, %c2_195, %c0_196] : memref<1x36x8xf32, #tpu.memory_space<vmem>>, vector<1x16x8xf32>
    %192 = vector.shape_cast %191 : vector<1x16x8xf32> to vector<16x8xf32>
    %c26 = arith.constant 26 : index
    %c0_197 = arith.constant 0 : index
    %c0_198 = arith.constant 0 : index
    %193 = vector.load %arg5[%c26, %c0_197, %c0_198] : memref<45x8x8xf32, #tpu.memory_space<vmem>>, vector<1x8x8xf32>
    %194 = vector.shape_cast %193 : vector<1x8x8xf32> to vector<8x8xf32>
    %cst_199 = arith.constant dense<0.000000e+00> : vector<16x8xf32>
    %195 = tpu.matmul %192, %194, %cst_199 {dimension_numbers = #tpu.dot_dimension_numbers<[1], [0], [0], [1], [0, 0, 1, 1], [], []>} : vector<16x8xf32>, vector<8x8xf32>, vector<16x8xf32> -> vector<16x8xf32>
    %196 = arith.addf %190, %195 : vector<16x8xf32>
    %c0_200 = arith.constant 0 : index
    %c3_201 = arith.constant 3 : index
    %c0_202 = arith.constant 0 : index
    %197 = vector.load %arg3[%c0_200, %c3_201, %c0_202] : memref<1x36x8xf32, #tpu.memory_space<vmem>>, vector<1x16x8xf32>
    %198 = vector.shape_cast %197 : vector<1x16x8xf32> to vector<16x8xf32>
    %c27 = arith.constant 27 : index
    %c0_203 = arith.constant 0 : index
    %c0_204 = arith.constant 0 : index
    %199 = vector.load %arg5[%c27, %c0_203, %c0_204] : memref<45x8x8xf32, #tpu.memory_space<vmem>>, vector<1x8x8xf32>
    %200 = vector.shape_cast %199 : vector<1x8x8xf32> to vector<8x8xf32>
    %cst_205 = arith.constant dense<0.000000e+00> : vector<16x8xf32>
    %201 = tpu.matmul %198, %200, %cst_205 {dimension_numbers = #tpu.dot_dimension_numbers<[1], [0], [0], [1], [0, 0, 1, 1], [], []>} : vector<16x8xf32>, vector<8x8xf32>, vector<16x8xf32> -> vector<16x8xf32>
    %202 = arith.addf %196, %201 : vector<16x8xf32>
    %c0_206 = arith.constant 0 : index
    %c4_207 = arith.constant 4 : index
    %c0_208 = arith.constant 0 : index
    %203 = vector.load %arg3[%c0_206, %c4_207, %c0_208] : memref<1x36x8xf32, #tpu.memory_space<vmem>>, vector<1x16x8xf32>
    %204 = vector.shape_cast %203 : vector<1x16x8xf32> to vector<16x8xf32>
    %c28 = arith.constant 28 : index
    %c0_209 = arith.constant 0 : index
    %c0_210 = arith.constant 0 : index
    %205 = vector.load %arg5[%c28, %c0_209, %c0_210] : memref<45x8x8xf32, #tpu.memory_space<vmem>>, vector<1x8x8xf32>
    %206 = vector.shape_cast %205 : vector<1x8x8xf32> to vector<8x8xf32>
    %cst_211 = arith.constant dense<0.000000e+00> : vector<16x8xf32>
    %207 = tpu.matmul %204, %206, %cst_211 {dimension_numbers = #tpu.dot_dimension_numbers<[1], [0], [0], [1], [0, 0, 1, 1], [], []>} : vector<16x8xf32>, vector<8x8xf32>, vector<16x8xf32> -> vector<16x8xf32>
    %208 = arith.addf %202, %207 : vector<16x8xf32>
    %c0_212 = arith.constant 0 : index
    %c5_213 = arith.constant 5 : index
    %c0_214 = arith.constant 0 : index
    %209 = vector.load %arg3[%c0_212, %c5_213, %c0_214] : memref<1x36x8xf32, #tpu.memory_space<vmem>>, vector<1x16x8xf32>
    %210 = vector.shape_cast %209 : vector<1x16x8xf32> to vector<16x8xf32>
    %c29 = arith.constant 29 : index
    %c0_215 = arith.constant 0 : index
    %c0_216 = arith.constant 0 : index
    %211 = vector.load %arg5[%c29, %c0_215, %c0_216] : memref<45x8x8xf32, #tpu.memory_space<vmem>>, vector<1x8x8xf32>
    %212 = vector.shape_cast %211 : vector<1x8x8xf32> to vector<8x8xf32>
    %cst_217 = arith.constant dense<0.000000e+00> : vector<16x8xf32>
    %213 = tpu.matmul %210, %212, %cst_217 {dimension_numbers = #tpu.dot_dimension_numbers<[1], [0], [0], [1], [0, 0, 1, 1], [], []>} : vector<16x8xf32>, vector<8x8xf32>, vector<16x8xf32> -> vector<16x8xf32>
    %214 = arith.addf %208, %213 : vector<16x8xf32>
    %c0_218 = arith.constant 0 : index
    %c6_219 = arith.constant 6 : index
    %c0_220 = arith.constant 0 : index
    %215 = vector.load %arg3[%c0_218, %c6_219, %c0_220] : memref<1x36x8xf32, #tpu.memory_space<vmem>>, vector<1x16x8xf32>
    %216 = vector.shape_cast %215 : vector<1x16x8xf32> to vector<16x8xf32>
    %c30 = arith.constant 30 : index
    %c0_221 = arith.constant 0 : index
    %c0_222 = arith.constant 0 : index
    %217 = vector.load %arg5[%c30, %c0_221, %c0_222] : memref<45x8x8xf32, #tpu.memory_space<vmem>>, vector<1x8x8xf32>
    %218 = vector.shape_cast %217 : vector<1x8x8xf32> to vector<8x8xf32>
    %cst_223 = arith.constant dense<0.000000e+00> : vector<16x8xf32>
    %219 = tpu.matmul %216, %218, %cst_223 {dimension_numbers = #tpu.dot_dimension_numbers<[1], [0], [0], [1], [0, 0, 1, 1], [], []>} : vector<16x8xf32>, vector<8x8xf32>, vector<16x8xf32> -> vector<16x8xf32>
    %220 = arith.addf %214, %219 : vector<16x8xf32>
    %c0_224 = arith.constant 0 : index
    %c7_225 = arith.constant 7 : index
    %c0_226 = arith.constant 0 : index
    %221 = vector.load %arg3[%c0_224, %c7_225, %c0_226] : memref<1x36x8xf32, #tpu.memory_space<vmem>>, vector<1x16x8xf32>
    %222 = vector.shape_cast %221 : vector<1x16x8xf32> to vector<16x8xf32>
    %c31 = arith.constant 31 : index
    %c0_227 = arith.constant 0 : index
    %c0_228 = arith.constant 0 : index
    %223 = vector.load %arg5[%c31, %c0_227, %c0_228] : memref<45x8x8xf32, #tpu.memory_space<vmem>>, vector<1x8x8xf32>
    %224 = vector.shape_cast %223 : vector<1x8x8xf32> to vector<8x8xf32>
    %cst_229 = arith.constant dense<0.000000e+00> : vector<16x8xf32>
    %225 = tpu.matmul %222, %224, %cst_229 {dimension_numbers = #tpu.dot_dimension_numbers<[1], [0], [0], [1], [0, 0, 1, 1], [], []>} : vector<16x8xf32>, vector<8x8xf32>, vector<16x8xf32> -> vector<16x8xf32>
    %226 = arith.addf %220, %225 : vector<16x8xf32>
    %c0_230 = arith.constant 0 : index
    %c8_231 = arith.constant 8 : index
    %c0_232 = arith.constant 0 : index
    %227 = vector.load %arg3[%c0_230, %c8_231, %c0_232] : memref<1x36x8xf32, #tpu.memory_space<vmem>>, vector<1x16x8xf32>
    %228 = vector.shape_cast %227 : vector<1x16x8xf32> to vector<16x8xf32>
    %c32 = arith.constant 32 : index
    %c0_233 = arith.constant 0 : index
    %c0_234 = arith.constant 0 : index
    %229 = vector.load %arg5[%c32, %c0_233, %c0_234] : memref<45x8x8xf32, #tpu.memory_space<vmem>>, vector<1x8x8xf32>
    %230 = vector.shape_cast %229 : vector<1x8x8xf32> to vector<8x8xf32>
    %cst_235 = arith.constant dense<0.000000e+00> : vector<16x8xf32>
    %231 = tpu.matmul %228, %230, %cst_235 {dimension_numbers = #tpu.dot_dimension_numbers<[1], [0], [0], [1], [0, 0, 1, 1], [], []>} : vector<16x8xf32>, vector<8x8xf32>, vector<16x8xf32> -> vector<16x8xf32>
    %232 = arith.addf %226, %231 : vector<16x8xf32>
    %c0_236 = arith.constant 0 : index
    %c9_237 = arith.constant 9 : index
    %c0_238 = arith.constant 0 : index
    %233 = vector.load %arg3[%c0_236, %c9_237, %c0_238] : memref<1x36x8xf32, #tpu.memory_space<vmem>>, vector<1x16x8xf32>
    %234 = vector.shape_cast %233 : vector<1x16x8xf32> to vector<16x8xf32>
    %c33 = arith.constant 33 : index
    %c0_239 = arith.constant 0 : index
    %c0_240 = arith.constant 0 : index
    %235 = vector.load %arg5[%c33, %c0_239, %c0_240] : memref<45x8x8xf32, #tpu.memory_space<vmem>>, vector<1x8x8xf32>
    %236 = vector.shape_cast %235 : vector<1x8x8xf32> to vector<8x8xf32>
    %cst_241 = arith.constant dense<0.000000e+00> : vector<16x8xf32>
    %237 = tpu.matmul %234, %236, %cst_241 {dimension_numbers = #tpu.dot_dimension_numbers<[1], [0], [0], [1], [0, 0, 1, 1], [], []>} : vector<16x8xf32>, vector<8x8xf32>, vector<16x8xf32> -> vector<16x8xf32>
    %238 = arith.addf %232, %237 : vector<16x8xf32>
    %c0_242 = arith.constant 0 : index
    %c10_243 = arith.constant 10 : index
    %c0_244 = arith.constant 0 : index
    %239 = vector.load %arg3[%c0_242, %c10_243, %c0_244] : memref<1x36x8xf32, #tpu.memory_space<vmem>>, vector<1x16x8xf32>
    %240 = vector.shape_cast %239 : vector<1x16x8xf32> to vector<16x8xf32>
    %c34 = arith.constant 34 : index
    %c0_245 = arith.constant 0 : index
    %c0_246 = arith.constant 0 : index
    %241 = vector.load %arg5[%c34, %c0_245, %c0_246] : memref<45x8x8xf32, #tpu.memory_space<vmem>>, vector<1x8x8xf32>
    %242 = vector.shape_cast %241 : vector<1x8x8xf32> to vector<8x8xf32>
    %cst_247 = arith.constant dense<0.000000e+00> : vector<16x8xf32>
    %243 = tpu.matmul %240, %242, %cst_247 {dimension_numbers = #tpu.dot_dimension_numbers<[1], [0], [0], [1], [0, 0, 1, 1], [], []>} : vector<16x8xf32>, vector<8x8xf32>, vector<16x8xf32> -> vector<16x8xf32>
    %244 = arith.addf %238, %243 : vector<16x8xf32>
    %c0_248 = arith.constant 0 : index
    %c11_249 = arith.constant 11 : index
    %c0_250 = arith.constant 0 : index
    %245 = vector.load %arg3[%c0_248, %c11_249, %c0_250] : memref<1x36x8xf32, #tpu.memory_space<vmem>>, vector<1x16x8xf32>
    %246 = vector.shape_cast %245 : vector<1x16x8xf32> to vector<16x8xf32>
    %c35 = arith.constant 35 : index
    %c0_251 = arith.constant 0 : index
    %c0_252 = arith.constant 0 : index
    %247 = vector.load %arg5[%c35, %c0_251, %c0_252] : memref<45x8x8xf32, #tpu.memory_space<vmem>>, vector<1x8x8xf32>
    %248 = vector.shape_cast %247 : vector<1x8x8xf32> to vector<8x8xf32>
    %cst_253 = arith.constant dense<0.000000e+00> : vector<16x8xf32>
    %249 = tpu.matmul %246, %248, %cst_253 {dimension_numbers = #tpu.dot_dimension_numbers<[1], [0], [0], [1], [0, 0, 1, 1], [], []>} : vector<16x8xf32>, vector<8x8xf32>, vector<16x8xf32> -> vector<16x8xf32>
    %250 = arith.addf %244, %249 : vector<16x8xf32>
    %c0_254 = arith.constant 0 : index
    %c12_255 = arith.constant 12 : index
    %c0_256 = arith.constant 0 : index
    %251 = vector.load %arg3[%c0_254, %c12_255, %c0_256] : memref<1x36x8xf32, #tpu.memory_space<vmem>>, vector<1x16x8xf32>
    %252 = vector.shape_cast %251 : vector<1x16x8xf32> to vector<16x8xf32>
    %c36 = arith.constant 36 : index
    %c0_257 = arith.constant 0 : index
    %c0_258 = arith.constant 0 : index
    %253 = vector.load %arg5[%c36, %c0_257, %c0_258] : memref<45x8x8xf32, #tpu.memory_space<vmem>>, vector<1x8x8xf32>
    %254 = vector.shape_cast %253 : vector<1x8x8xf32> to vector<8x8xf32>
    %cst_259 = arith.constant dense<0.000000e+00> : vector<16x8xf32>
    %255 = tpu.matmul %252, %254, %cst_259 {dimension_numbers = #tpu.dot_dimension_numbers<[1], [0], [0], [1], [0, 0, 1, 1], [], []>} : vector<16x8xf32>, vector<8x8xf32>, vector<16x8xf32> -> vector<16x8xf32>
    %256 = arith.addf %250, %255 : vector<16x8xf32>
    %c0_260 = arith.constant 0 : index
    %c13_261 = arith.constant 13 : index
    %c0_262 = arith.constant 0 : index
    %257 = vector.load %arg3[%c0_260, %c13_261, %c0_262] : memref<1x36x8xf32, #tpu.memory_space<vmem>>, vector<1x16x8xf32>
    %258 = vector.shape_cast %257 : vector<1x16x8xf32> to vector<16x8xf32>
    %c37 = arith.constant 37 : index
    %c0_263 = arith.constant 0 : index
    %c0_264 = arith.constant 0 : index
    %259 = vector.load %arg5[%c37, %c0_263, %c0_264] : memref<45x8x8xf32, #tpu.memory_space<vmem>>, vector<1x8x8xf32>
    %260 = vector.shape_cast %259 : vector<1x8x8xf32> to vector<8x8xf32>
    %cst_265 = arith.constant dense<0.000000e+00> : vector<16x8xf32>
    %261 = tpu.matmul %258, %260, %cst_265 {dimension_numbers = #tpu.dot_dimension_numbers<[1], [0], [0], [1], [0, 0, 1, 1], [], []>} : vector<16x8xf32>, vector<8x8xf32>, vector<16x8xf32> -> vector<16x8xf32>
    %262 = arith.addf %256, %261 : vector<16x8xf32>
    %c0_266 = arith.constant 0 : index
    %c14_267 = arith.constant 14 : index
    %c0_268 = arith.constant 0 : index
    %263 = vector.load %arg3[%c0_266, %c14_267, %c0_268] : memref<1x36x8xf32, #tpu.memory_space<vmem>>, vector<1x16x8xf32>
    %264 = vector.shape_cast %263 : vector<1x16x8xf32> to vector<16x8xf32>
    %c38 = arith.constant 38 : index
    %c0_269 = arith.constant 0 : index
    %c0_270 = arith.constant 0 : index
    %265 = vector.load %arg5[%c38, %c0_269, %c0_270] : memref<45x8x8xf32, #tpu.memory_space<vmem>>, vector<1x8x8xf32>
    %266 = vector.shape_cast %265 : vector<1x8x8xf32> to vector<8x8xf32>
    %cst_271 = arith.constant dense<0.000000e+00> : vector<16x8xf32>
    %267 = tpu.matmul %264, %266, %cst_271 {dimension_numbers = #tpu.dot_dimension_numbers<[1], [0], [0], [1], [0, 0, 1, 1], [], []>} : vector<16x8xf32>, vector<8x8xf32>, vector<16x8xf32> -> vector<16x8xf32>
    %268 = arith.addf %262, %267 : vector<16x8xf32>
    %c0_272 = arith.constant 0 : index
    %c15_273 = arith.constant 15 : index
    %c0_274 = arith.constant 0 : index
    %269 = vector.load %arg3[%c0_272, %c15_273, %c0_274] : memref<1x36x8xf32, #tpu.memory_space<vmem>>, vector<1x16x8xf32>
    %270 = vector.shape_cast %269 : vector<1x16x8xf32> to vector<16x8xf32>
    %c39 = arith.constant 39 : index
    %c0_275 = arith.constant 0 : index
    %c0_276 = arith.constant 0 : index
    %271 = vector.load %arg5[%c39, %c0_275, %c0_276] : memref<45x8x8xf32, #tpu.memory_space<vmem>>, vector<1x8x8xf32>
    %272 = vector.shape_cast %271 : vector<1x8x8xf32> to vector<8x8xf32>
    %cst_277 = arith.constant dense<0.000000e+00> : vector<16x8xf32>
    %273 = tpu.matmul %270, %272, %cst_277 {dimension_numbers = #tpu.dot_dimension_numbers<[1], [0], [0], [1], [0, 0, 1, 1], [], []>} : vector<16x8xf32>, vector<8x8xf32>, vector<16x8xf32> -> vector<16x8xf32>
    %274 = arith.addf %268, %273 : vector<16x8xf32>
    %c0_278 = arith.constant 0 : index
    %c16_279 = arith.constant 16 : index
    %c0_280 = arith.constant 0 : index
    %275 = vector.load %arg3[%c0_278, %c16_279, %c0_280] : memref<1x36x8xf32, #tpu.memory_space<vmem>>, vector<1x16x8xf32>
    %276 = vector.shape_cast %275 : vector<1x16x8xf32> to vector<16x8xf32>
    %c40 = arith.constant 40 : index
    %c0_281 = arith.constant 0 : index
    %c0_282 = arith.constant 0 : index
    %277 = vector.load %arg5[%c40, %c0_281, %c0_282] : memref<45x8x8xf32, #tpu.memory_space<vmem>>, vector<1x8x8xf32>
    %278 = vector.shape_cast %277 : vector<1x8x8xf32> to vector<8x8xf32>
    %cst_283 = arith.constant dense<0.000000e+00> : vector<16x8xf32>
    %279 = tpu.matmul %276, %278, %cst_283 {dimension_numbers = #tpu.dot_dimension_numbers<[1], [0], [0], [1], [0, 0, 1, 1], [], []>} : vector<16x8xf32>, vector<8x8xf32>, vector<16x8xf32> -> vector<16x8xf32>
    %280 = arith.addf %274, %279 : vector<16x8xf32>
    %c0_284 = arith.constant 0 : index
    %c17_285 = arith.constant 17 : index
    %c0_286 = arith.constant 0 : index
    %281 = vector.load %arg3[%c0_284, %c17_285, %c0_286] : memref<1x36x8xf32, #tpu.memory_space<vmem>>, vector<1x16x8xf32>
    %282 = vector.shape_cast %281 : vector<1x16x8xf32> to vector<16x8xf32>
    %c41 = arith.constant 41 : index
    %c0_287 = arith.constant 0 : index
    %c0_288 = arith.constant 0 : index
    %283 = vector.load %arg5[%c41, %c0_287, %c0_288] : memref<45x8x8xf32, #tpu.memory_space<vmem>>, vector<1x8x8xf32>
    %284 = vector.shape_cast %283 : vector<1x8x8xf32> to vector<8x8xf32>
    %cst_289 = arith.constant dense<0.000000e+00> : vector<16x8xf32>
    %285 = tpu.matmul %282, %284, %cst_289 {dimension_numbers = #tpu.dot_dimension_numbers<[1], [0], [0], [1], [0, 0, 1, 1], [], []>} : vector<16x8xf32>, vector<8x8xf32>, vector<16x8xf32> -> vector<16x8xf32>
    %286 = arith.addf %280, %285 : vector<16x8xf32>
    %c0_290 = arith.constant 0 : index
    %c18_291 = arith.constant 18 : index
    %c0_292 = arith.constant 0 : index
    %287 = vector.load %arg3[%c0_290, %c18_291, %c0_292] : memref<1x36x8xf32, #tpu.memory_space<vmem>>, vector<1x16x8xf32>
    %288 = vector.shape_cast %287 : vector<1x16x8xf32> to vector<16x8xf32>
    %c42 = arith.constant 42 : index
    %c0_293 = arith.constant 0 : index
    %c0_294 = arith.constant 0 : index
    %289 = vector.load %arg5[%c42, %c0_293, %c0_294] : memref<45x8x8xf32, #tpu.memory_space<vmem>>, vector<1x8x8xf32>
    %290 = vector.shape_cast %289 : vector<1x8x8xf32> to vector<8x8xf32>
    %cst_295 = arith.constant dense<0.000000e+00> : vector<16x8xf32>
    %291 = tpu.matmul %288, %290, %cst_295 {dimension_numbers = #tpu.dot_dimension_numbers<[1], [0], [0], [1], [0, 0, 1, 1], [], []>} : vector<16x8xf32>, vector<8x8xf32>, vector<16x8xf32> -> vector<16x8xf32>
    %292 = arith.addf %286, %291 : vector<16x8xf32>
    %c0_296 = arith.constant 0 : index
    %c19_297 = arith.constant 19 : index
    %c0_298 = arith.constant 0 : index
    %293 = vector.load %arg3[%c0_296, %c19_297, %c0_298] : memref<1x36x8xf32, #tpu.memory_space<vmem>>, vector<1x16x8xf32>
    %294 = vector.shape_cast %293 : vector<1x16x8xf32> to vector<16x8xf32>
    %c43 = arith.constant 43 : index
    %c0_299 = arith.constant 0 : index
    %c0_300 = arith.constant 0 : index
    %295 = vector.load %arg5[%c43, %c0_299, %c0_300] : memref<45x8x8xf32, #tpu.memory_space<vmem>>, vector<1x8x8xf32>
    %296 = vector.shape_cast %295 : vector<1x8x8xf32> to vector<8x8xf32>
    %cst_301 = arith.constant dense<0.000000e+00> : vector<16x8xf32>
    %297 = tpu.matmul %294, %296, %cst_301 {dimension_numbers = #tpu.dot_dimension_numbers<[1], [0], [0], [1], [0, 0, 1, 1], [], []>} : vector<16x8xf32>, vector<8x8xf32>, vector<16x8xf32> -> vector<16x8xf32>
    %298 = arith.addf %292, %297 : vector<16x8xf32>
    %c0_302 = arith.constant 0 : index
    %c20_303 = arith.constant 20 : index
    %c0_304 = arith.constant 0 : index
    %299 = vector.load %arg3[%c0_302, %c20_303, %c0_304] : memref<1x36x8xf32, #tpu.memory_space<vmem>>, vector<1x16x8xf32>
    %300 = vector.shape_cast %299 : vector<1x16x8xf32> to vector<16x8xf32>
    %c44 = arith.constant 44 : index
    %c0_305 = arith.constant 0 : index
    %c0_306 = arith.constant 0 : index
    %301 = vector.load %arg5[%c44, %c0_305, %c0_306] : memref<45x8x8xf32, #tpu.memory_space<vmem>>, vector<1x8x8xf32>
    %302 = vector.shape_cast %301 : vector<1x8x8xf32> to vector<8x8xf32>
    %cst_307 = arith.constant dense<0.000000e+00> : vector<16x8xf32>
    %303 = tpu.matmul %300, %302, %cst_307 {dimension_numbers = #tpu.dot_dimension_numbers<[1], [0], [0], [1], [0, 0, 1, 1], [], []>} : vector<16x8xf32>, vector<8x8xf32>, vector<16x8xf32> -> vector<16x8xf32>
    %304 = arith.addf %298, %303 : vector<16x8xf32>
    %cst_308 = arith.constant 0.000000e+00 : f32
    %305 = vector.broadcast %cst_308 : f32 to vector<16x8xf32>
    %306 = arith.cmpf ogt, %304, %305 : vector<16x8xf32>
    %cst_309 = arith.constant 1.000000e-01 : f32
    %307 = vector.broadcast %cst_309 : f32 to vector<16x8xf32>
    %308 = arith.mulf %307, %304 : vector<16x8xf32>
    %309 = arith.select %306, %304, %308 : vector<16x8xi1>, vector<16x8xf32>
    %c4_310 = arith.constant 4 : index
    %c1_311 = arith.constant 1 : index
    %c0_312 = arith.constant 0 : index
    %310 = vector.load %arg9[%c4_310, %c1_311, %c0_312] : memref<7x18x16xf32, #tpu.memory_space<vmem>>, vector<1x16x8xf32>
    %311 = vector.shape_cast %310 : vector<1x16x8xf32> to vector<16x8xf32>
    %312 = vector.shape_cast %309 : vector<16x8xf32> to vector<1x16x8xf32>
    tpu.vector_store %arg9[%c4_310, %c1_311, %c0_312], %312 {strides = array<i32>} : memref<7x18x16xf32, #tpu.memory_space<vmem>>, vector<1x16x8xf32>,
    %c0_313 = arith.constant 0 : index
    %c0_314 = arith.constant 0 : index
    %c0_315 = arith.constant 0 : index
    %313 = vector.load %arg9[%c0_313, %c0_314, %c0_315] : memref<7x18x16xf32, #tpu.memory_space<vmem>>, vector<3x16x16xf32>
    %314 = vector.shape_cast %313 : vector<3x16x16xf32> to vector<48x16xf32>
    %c0_316 = arith.constant 0 : index
    %c0_317 = arith.constant 0 : index
    %c0_318 = arith.constant 0 : index
    %315 = vector.load %arg6[%c0_316, %c0_317, %c0_318] : memref<45x16x16xf32, #tpu.memory_space<vmem>>, vector<1x16x16xf32>
    %316 = vector.shape_cast %315 : vector<1x16x16xf32> to vector<16x16xf32>
    %cst_319 = arith.constant dense<0.000000e+00> : vector<48x16xf32>
    %317 = tpu.matmul %314, %316, %cst_319 {dimension_numbers = #tpu.dot_dimension_numbers<[1], [0], [0], [1], [0, 0, 1, 1], [], []>} : vector<48x16xf32>, vector<16x16xf32>, vector<48x16xf32> -> vector<48x16xf32>
    %c0_320 = arith.constant 0 : index
    %c1_321 = arith.constant 1 : index
    %c0_322 = arith.constant 0 : index
    %318 = vector.load %arg9[%c0_320, %c1_321, %c0_322] : memref<7x18x16xf32, #tpu.memory_space<vmem>>, vector<3x16x16xf32>
    %319 = vector.shape_cast %318 : vector<3x16x16xf32> to vector<48x16xf32>
    %c1_323 = arith.constant 1 : index
    %c0_324 = arith.constant 0 : index
    %c0_325 = arith.constant 0 : index
    %320 = vector.load %arg6[%c1_323, %c0_324, %c0_325] : memref<45x16x16xf32, #tpu.memory_space<vmem>>, vector<1x16x16xf32>
    %321 = vector.shape_cast %320 : vector<1x16x16xf32> to vector<16x16xf32>
    %cst_326 = arith.constant dense<0.000000e+00> : vector<48x16xf32>
    %322 = tpu.matmul %319, %321, %cst_326 {dimension_numbers = #tpu.dot_dimension_numbers<[1], [0], [0], [1], [0, 0, 1, 1], [], []>} : vector<48x16xf32>, vector<16x16xf32>, vector<48x16xf32> -> vector<48x16xf32>
    %323 = arith.addf %317, %322 : vector<48x16xf32>
    %c0_327 = arith.constant 0 : index
    %c2_328 = arith.constant 2 : index
    %c0_329 = arith.constant 0 : index
    %324 = vector.load %arg9[%c0_327, %c2_328, %c0_329] : memref<7x18x16xf32, #tpu.memory_space<vmem>>, vector<3x16x16xf32>
    %325 = vector.shape_cast %324 : vector<3x16x16xf32> to vector<48x16xf32>
    %c2_330 = arith.constant 2 : index
    %c0_331 = arith.constant 0 : index
    %c0_332 = arith.constant 0 : index
    %326 = vector.load %arg6[%c2_330, %c0_331, %c0_332] : memref<45x16x16xf32, #tpu.memory_space<vmem>>, vector<1x16x16xf32>
    %327 = vector.shape_cast %326 : vector<1x16x16xf32> to vector<16x16xf32>
    %cst_333 = arith.constant dense<0.000000e+00> : vector<48x16xf32>
    %328 = tpu.matmul %325, %327, %cst_333 {dimension_numbers = #tpu.dot_dimension_numbers<[1], [0], [0], [1], [0, 0, 1, 1], [], []>} : vector<48x16xf32>, vector<16x16xf32>, vector<48x16xf32> -> vector<48x16xf32>
    %329 = arith.addf %323, %328 : vector<48x16xf32>
    %c1_334 = arith.constant 1 : index
    %c0_335 = arith.constant 0 : index
    %c0_336 = arith.constant 0 : index
    %330 = vector.load %arg9[%c1_334, %c0_335, %c0_336] : memref<7x18x16xf32, #tpu.memory_space<vmem>>, vector<3x16x16xf32>
    %331 = vector.shape_cast %330 : vector<3x16x16xf32> to vector<48x16xf32>
    %c3_337 = arith.constant 3 : index
    %c0_338 = arith.constant 0 : index
    %c0_339 = arith.constant 0 : index
    %332 = vector.load %arg6[%c3_337, %c0_338, %c0_339] : memref<45x16x16xf32, #tpu.memory_space<vmem>>, vector<1x16x16xf32>
    %333 = vector.shape_cast %332 : vector<1x16x16xf32> to vector<16x16xf32>
    %cst_340 = arith.constant dense<0.000000e+00> : vector<48x16xf32>
    %334 = tpu.matmul %331, %333, %cst_340 {dimension_numbers = #tpu.dot_dimension_numbers<[1], [0], [0], [1], [0, 0, 1, 1], [], []>} : vector<48x16xf32>, vector<16x16xf32>, vector<48x16xf32> -> vector<48x16xf32>
    %335 = arith.addf %329, %334 : vector<48x16xf32>
    %c1_341 = arith.constant 1 : index
    %c1_342 = arith.constant 1 : index
    %c0_343 = arith.constant 0 : index
    %336 = vector.load %arg9[%c1_341, %c1_342, %c0_343] : memref<7x18x16xf32, #tpu.memory_space<vmem>>, vector<3x16x16xf32>
    %337 = vector.shape_cast %336 : vector<3x16x16xf32> to vector<48x16xf32>
    %c4_344 = arith.constant 4 : index
    %c0_345 = arith.constant 0 : index
    %c0_346 = arith.constant 0 : index
    %338 = vector.load %arg6[%c4_344, %c0_345, %c0_346] : memref<45x16x16xf32, #tpu.memory_space<vmem>>, vector<1x16x16xf32>
    %339 = vector.shape_cast %338 : vector<1x16x16xf32> to vector<16x16xf32>
    %cst_347 = arith.constant dense<0.000000e+00> : vector<48x16xf32>
    %340 = tpu.matmul %337, %339, %cst_347 {dimension_numbers = #tpu.dot_dimension_numbers<[1], [0], [0], [1], [0, 0, 1, 1], [], []>} : vector<48x16xf32>, vector<16x16xf32>, vector<48x16xf32> -> vector<48x16xf32>
    %341 = arith.addf %335, %340 : vector<48x16xf32>
    %c1_348 = arith.constant 1 : index
    %c2_349 = arith.constant 2 : index
    %c0_350 = arith.constant 0 : index
    %342 = vector.load %arg9[%c1_348, %c2_349, %c0_350] : memref<7x18x16xf32, #tpu.memory_space<vmem>>, vector<3x16x16xf32>
    %343 = vector.shape_cast %342 : vector<3x16x16xf32> to vector<48x16xf32>
    %c5_351 = arith.constant 5 : index
    %c0_352 = arith.constant 0 : index
    %c0_353 = arith.constant 0 : index
    %344 = vector.load %arg6[%c5_351, %c0_352, %c0_353] : memref<45x16x16xf32, #tpu.memory_space<vmem>>, vector<1x16x16xf32>
    %345 = vector.shape_cast %344 : vector<1x16x16xf32> to vector<16x16xf32>
    %cst_354 = arith.constant dense<0.000000e+00> : vector<48x16xf32>
    %346 = tpu.matmul %343, %345, %cst_354 {dimension_numbers = #tpu.dot_dimension_numbers<[1], [0], [0], [1], [0, 0, 1, 1], [], []>} : vector<48x16xf32>, vector<16x16xf32>, vector<48x16xf32> -> vector<48x16xf32>
    %347 = arith.addf %341, %346 : vector<48x16xf32>
    %c2_355 = arith.constant 2 : index
    %c0_356 = arith.constant 0 : index
    %c0_357 = arith.constant 0 : index
    %348 = vector.load %arg9[%c2_355, %c0_356, %c0_357] : memref<7x18x16xf32, #tpu.memory_space<vmem>>, vector<3x16x16xf32>
    %349 = vector.shape_cast %348 : vector<3x16x16xf32> to vector<48x16xf32>
    %c6_358 = arith.constant 6 : index
    %c0_359 = arith.constant 0 : index
    %c0_360 = arith.constant 0 : index
    %350 = vector.load %arg6[%c6_358, %c0_359, %c0_360] : memref<45x16x16xf32, #tpu.memory_space<vmem>>, vector<1x16x16xf32>
    %351 = vector.shape_cast %350 : vector<1x16x16xf32> to vector<16x16xf32>
    %cst_361 = arith.constant dense<0.000000e+00> : vector<48x16xf32>
    %352 = tpu.matmul %349, %351, %cst_361 {dimension_numbers = #tpu.dot_dimension_numbers<[1], [0], [0], [1], [0, 0, 1, 1], [], []>} : vector<48x16xf32>, vector<16x16xf32>, vector<48x16xf32> -> vector<48x16xf32>
    %353 = arith.addf %347, %352 : vector<48x16xf32>
    %c2_362 = arith.constant 2 : index
    %c1_363 = arith.constant 1 : index
    %c0_364 = arith.constant 0 : index
    %354 = vector.load %arg9[%c2_362, %c1_363, %c0_364] : memref<7x18x16xf32, #tpu.memory_space<vmem>>, vector<3x16x16xf32>
    %355 = vector.shape_cast %354 : vector<3x16x16xf32> to vector<48x16xf32>
    %c7_365 = arith.constant 7 : index
    %c0_366 = arith.constant 0 : index
    %c0_367 = arith.constant 0 : index
    %356 = vector.load %arg6[%c7_365, %c0_366, %c0_367] : memref<45x16x16xf32, #tpu.memory_space<vmem>>, vector<1x16x16xf32>
    %357 = vector.shape_cast %356 : vector<1x16x16xf32> to vector<16x16xf32>
    %cst_368 = arith.constant dense<0.000000e+00> : vector<48x16xf32>
    %358 = tpu.matmul %355, %357, %cst_368 {dimension_numbers = #tpu.dot_dimension_numbers<[1], [0], [0], [1], [0, 0, 1, 1], [], []>} : vector<48x16xf32>, vector<16x16xf32>, vector<48x16xf32> -> vector<48x16xf32>
    %359 = arith.addf %353, %358 : vector<48x16xf32>
    %c2_369 = arith.constant 2 : index
    %c2_370 = arith.constant 2 : index
    %c0_371 = arith.constant 0 : index
    %360 = vector.load %arg9[%c2_369, %c2_370, %c0_371] : memref<7x18x16xf32, #tpu.memory_space<vmem>>, vector<3x16x16xf32>
    %361 = vector.shape_cast %360 : vector<3x16x16xf32> to vector<48x16xf32>
    %c8_372 = arith.constant 8 : index
    %c0_373 = arith.constant 0 : index
    %c0_374 = arith.constant 0 : index
    %362 = vector.load %arg6[%c8_372, %c0_373, %c0_374] : memref<45x16x16xf32, #tpu.memory_space<vmem>>, vector<1x16x16xf32>
    %363 = vector.shape_cast %362 : vector<1x16x16xf32> to vector<16x16xf32>
    %cst_375 = arith.constant dense<0.000000e+00> : vector<48x16xf32>
    %364 = tpu.matmul %361, %363, %cst_375 {dimension_numbers = #tpu.dot_dimension_numbers<[1], [0], [0], [1], [0, 0, 1, 1], [], []>} : vector<48x16xf32>, vector<16x16xf32>, vector<48x16xf32> -> vector<48x16xf32>
    %365 = arith.addf %359, %364 : vector<48x16xf32>
    %c3_376 = arith.constant 3 : index
    %c0_377 = arith.constant 0 : index
    %c0_378 = arith.constant 0 : index
    %366 = vector.load %arg9[%c3_376, %c0_377, %c0_378] : memref<7x18x16xf32, #tpu.memory_space<vmem>>, vector<3x16x16xf32>
    %367 = vector.shape_cast %366 : vector<3x16x16xf32> to vector<48x16xf32>
    %c9_379 = arith.constant 9 : index
    %c0_380 = arith.constant 0 : index
    %c0_381 = arith.constant 0 : index
    %368 = vector.load %arg6[%c9_379, %c0_380, %c0_381] : memref<45x16x16xf32, #tpu.memory_space<vmem>>, vector<1x16x16xf32>
    %369 = vector.shape_cast %368 : vector<1x16x16xf32> to vector<16x16xf32>
    %cst_382 = arith.constant dense<0.000000e+00> : vector<48x16xf32>
    %370 = tpu.matmul %367, %369, %cst_382 {dimension_numbers = #tpu.dot_dimension_numbers<[1], [0], [0], [1], [0, 0, 1, 1], [], []>} : vector<48x16xf32>, vector<16x16xf32>, vector<48x16xf32> -> vector<48x16xf32>
    %371 = arith.addf %365, %370 : vector<48x16xf32>
    %c3_383 = arith.constant 3 : index
    %c1_384 = arith.constant 1 : index
    %c0_385 = arith.constant 0 : index
    %372 = vector.load %arg9[%c3_383, %c1_384, %c0_385] : memref<7x18x16xf32, #tpu.memory_space<vmem>>, vector<3x16x16xf32>
    %373 = vector.shape_cast %372 : vector<3x16x16xf32> to vector<48x16xf32>
    %c10_386 = arith.constant 10 : index
    %c0_387 = arith.constant 0 : index
    %c0_388 = arith.constant 0 : index
    %374 = vector.load %arg6[%c10_386, %c0_387, %c0_388] : memref<45x16x16xf32, #tpu.memory_space<vmem>>, vector<1x16x16xf32>
    %375 = vector.shape_cast %374 : vector<1x16x16xf32> to vector<16x16xf32>
    %cst_389 = arith.constant dense<0.000000e+00> : vector<48x16xf32>
    %376 = tpu.matmul %373, %375, %cst_389 {dimension_numbers = #tpu.dot_dimension_numbers<[1], [0], [0], [1], [0, 0, 1, 1], [], []>} : vector<48x16xf32>, vector<16x16xf32>, vector<48x16xf32> -> vector<48x16xf32>
    %377 = arith.addf %371, %376 : vector<48x16xf32>
    %c3_390 = arith.constant 3 : index
    %c2_391 = arith.constant 2 : index
    %c0_392 = arith.constant 0 : index
    %378 = vector.load %arg9[%c3_390, %c2_391, %c0_392] : memref<7x18x16xf32, #tpu.memory_space<vmem>>, vector<3x16x16xf32>
    %379 = vector.shape_cast %378 : vector<3x16x16xf32> to vector<48x16xf32>
    %c11_393 = arith.constant 11 : index
    %c0_394 = arith.constant 0 : index
    %c0_395 = arith.constant 0 : index
    %380 = vector.load %arg6[%c11_393, %c0_394, %c0_395] : memref<45x16x16xf32, #tpu.memory_space<vmem>>, vector<1x16x16xf32>
    %381 = vector.shape_cast %380 : vector<1x16x16xf32> to vector<16x16xf32>
    %cst_396 = arith.constant dense<0.000000e+00> : vector<48x16xf32>
    %382 = tpu.matmul %379, %381, %cst_396 {dimension_numbers = #tpu.dot_dimension_numbers<[1], [0], [0], [1], [0, 0, 1, 1], [], []>} : vector<48x16xf32>, vector<16x16xf32>, vector<48x16xf32> -> vector<48x16xf32>
    %383 = arith.addf %377, %382 : vector<48x16xf32>
    %c4_397 = arith.constant 4 : index
    %c0_398 = arith.constant 0 : index
    %c0_399 = arith.constant 0 : index
    %384 = vector.load %arg9[%c4_397, %c0_398, %c0_399] : memref<7x18x16xf32, #tpu.memory_space<vmem>>, vector<3x16x16xf32>
    %385 = vector.shape_cast %384 : vector<3x16x16xf32> to vector<48x16xf32>
    %c12_400 = arith.constant 12 : index
    %c0_401 = arith.constant 0 : index
    %c0_402 = arith.constant 0 : index
    %386 = vector.load %arg6[%c12_400, %c0_401, %c0_402] : memref<45x16x16xf32, #tpu.memory_space<vmem>>, vector<1x16x16xf32>
    %387 = vector.shape_cast %386 : vector<1x16x16xf32> to vector<16x16xf32>
    %cst_403 = arith.constant dense<0.000000e+00> : vector<48x16xf32>
    %388 = tpu.matmul %385, %387, %cst_403 {dimension_numbers = #tpu.dot_dimension_numbers<[1], [0], [0], [1], [0, 0, 1, 1], [], []>} : vector<48x16xf32>, vector<16x16xf32>, vector<48x16xf32> -> vector<48x16xf32>
    %389 = arith.addf %383, %388 : vector<48x16xf32>
    %c4_404 = arith.constant 4 : index
    %c1_405 = arith.constant 1 : index
    %c0_406 = arith.constant 0 : index
    %390 = vector.load %arg9[%c4_404, %c1_405, %c0_406] : memref<7x18x16xf32, #tpu.memory_space<vmem>>, vector<3x16x16xf32>
    %391 = vector.shape_cast %390 : vector<3x16x16xf32> to vector<48x16xf32>
    %c13_407 = arith.constant 13 : index
    %c0_408 = arith.constant 0 : index
    %c0_409 = arith.constant 0 : index
    %392 = vector.load %arg6[%c13_407, %c0_408, %c0_409] : memref<45x16x16xf32, #tpu.memory_space<vmem>>, vector<1x16x16xf32>
    %393 = vector.shape_cast %392 : vector<1x16x16xf32> to vector<16x16xf32>
    %cst_410 = arith.constant dense<0.000000e+00> : vector<48x16xf32>
    %394 = tpu.matmul %391, %393, %cst_410 {dimension_numbers = #tpu.dot_dimension_numbers<[1], [0], [0], [1], [0, 0, 1, 1], [], []>} : vector<48x16xf32>, vector<16x16xf32>, vector<48x16xf32> -> vector<48x16xf32>
    %395 = arith.addf %389, %394 : vector<48x16xf32>
    %c4_411 = arith.constant 4 : index
    %c2_412 = arith.constant 2 : index
    %c0_413 = arith.constant 0 : index
    %396 = vector.load %arg9[%c4_411, %c2_412, %c0_413] : memref<7x18x16xf32, #tpu.memory_space<vmem>>, vector<3x16x16xf32>
    %397 = vector.shape_cast %396 : vector<3x16x16xf32> to vector<48x16xf32>
    %c14_414 = arith.constant 14 : index
    %c0_415 = arith.constant 0 : index
    %c0_416 = arith.constant 0 : index
    %398 = vector.load %arg6[%c14_414, %c0_415, %c0_416] : memref<45x16x16xf32, #tpu.memory_space<vmem>>, vector<1x16x16xf32>
    %399 = vector.shape_cast %398 : vector<1x16x16xf32> to vector<16x16xf32>
    %cst_417 = arith.constant dense<0.000000e+00> : vector<48x16xf32>
    %400 = tpu.matmul %397, %399, %cst_417 {dimension_numbers = #tpu.dot_dimension_numbers<[1], [0], [0], [1], [0, 0, 1, 1], [], []>} : vector<48x16xf32>, vector<16x16xf32>, vector<48x16xf32> -> vector<48x16xf32>
    %401 = arith.addf %395, %400 : vector<48x16xf32>
    %cst_418 = arith.constant 0.000000e+00 : f32
    %402 = vector.broadcast %cst_418 : f32 to vector<48x16xf32>
    %403 = arith.cmpf ogt, %401, %402 : vector<48x16xf32>
    %cst_419 = arith.constant 1.000000e-01 : f32
    %404 = vector.broadcast %cst_419 : f32 to vector<48x16xf32>
    %405 = arith.mulf %404, %401 : vector<48x16xf32>
    %406 = arith.select %403, %401, %405 : vector<48x16xi1>, vector<48x16xf32>
    %407 = vector.shape_cast %406 : vector<48x16xf32> to vector<3x16x16xf32>
    %c2_420 = arith.constant 2 : index
    %c1_421 = arith.constant 1 : index
    %c0_422 = arith.constant 0 : index
    %408 = vector.load %arg9[%c2_420, %c1_421, %c0_422] : memref<7x18x16xf32, #tpu.memory_space<vmem>>, vector<3x16x16xf32>
    tpu.vector_store %arg9[%c2_420, %c1_421, %c0_422], %407 {strides = array<i32>} : memref<7x18x16xf32, #tpu.memory_space<vmem>>, vector<3x16x16xf32>,
    %c0_423 = arith.constant 0 : index
    %c0_424 = arith.constant 0 : index
    %c0_425 = arith.constant 0 : index
    %409 = vector.load %arg9[%c0_423, %c0_424, %c0_425] : memref<7x18x16xf32, #tpu.memory_space<vmem>>, vector<3x16x16xf32>
    %410 = vector.shape_cast %409 : vector<3x16x16xf32> to vector<48x16xf32>
    %c15_426 = arith.constant 15 : index
    %c0_427 = arith.constant 0 : index
    %c0_428 = arith.constant 0 : index
    %411 = vector.load %arg6[%c15_426, %c0_427, %c0_428] : memref<45x16x16xf32, #tpu.memory_space<vmem>>, vector<1x16x16xf32>
    %412 = vector.shape_cast %411 : vector<1x16x16xf32> to vector<16x16xf32>
    %cst_429 = arith.constant dense<0.000000e+00> : vector<48x16xf32>
    %413 = tpu.matmul %410, %412, %cst_429 {dimension_numbers = #tpu.dot_dimension_numbers<[1], [0], [0], [1], [0, 0, 1, 1], [], []>} : vector<48x16xf32>, vector<16x16xf32>, vector<48x16xf32> -> vector<48x16xf32>
    %c0_430 = arith.constant 0 : index
    %c1_431 = arith.constant 1 : index
    %c0_432 = arith.constant 0 : index
    %414 = vector.load %arg9[%c0_430, %c1_431, %c0_432] : memref<7x18x16xf32, #tpu.memory_space<vmem>>, vector<3x16x16xf32>
    %415 = vector.shape_cast %414 : vector<3x16x16xf32> to vector<48x16xf32>
    %c16_433 = arith.constant 16 : index
    %c0_434 = arith.constant 0 : index
    %c0_435 = arith.constant 0 : index
    %416 = vector.load %arg6[%c16_433, %c0_434, %c0_435] : memref<45x16x16xf32, #tpu.memory_space<vmem>>, vector<1x16x16xf32>
    %417 = vector.shape_cast %416 : vector<1x16x16xf32> to vector<16x16xf32>
    %cst_436 = arith.constant dense<0.000000e+00> : vector<48x16xf32>
    %418 = tpu.matmul %415, %417, %cst_436 {dimension_numbers = #tpu.dot_dimension_numbers<[1], [0], [0], [1], [0, 0, 1, 1], [], []>} : vector<48x16xf32>, vector<16x16xf32>, vector<48x16xf32> -> vector<48x16xf32>
    %419 = arith.addf %413, %418 : vector<48x16xf32>
    %c0_437 = arith.constant 0 : index
    %c2_438 = arith.constant 2 : index
    %c0_439 = arith.constant 0 : index
    %420 = vector.load %arg9[%c0_437, %c2_438, %c0_439] : memref<7x18x16xf32, #tpu.memory_space<vmem>>, vector<3x16x16xf32>
    %421 = vector.shape_cast %420 : vector<3x16x16xf32> to vector<48x16xf32>
    %c17_440 = arith.constant 17 : index
    %c0_441 = arith.constant 0 : index
    %c0_442 = arith.constant 0 : index
    %422 = vector.load %arg6[%c17_440, %c0_441, %c0_442] : memref<45x16x16xf32, #tpu.memory_space<vmem>>, vector<1x16x16xf32>
    %423 = vector.shape_cast %422 : vector<1x16x16xf32> to vector<16x16xf32>
    %cst_443 = arith.constant dense<0.000000e+00> : vector<48x16xf32>
    %424 = tpu.matmul %421, %423, %cst_443 {dimension_numbers = #tpu.dot_dimension_numbers<[1], [0], [0], [1], [0, 0, 1, 1], [], []>} : vector<48x16xf32>, vector<16x16xf32>, vector<48x16xf32> -> vector<48x16xf32>
    %425 = arith.addf %419, %424 : vector<48x16xf32>
    %c1_444 = arith.constant 1 : index
    %c0_445 = arith.constant 0 : index
    %c0_446 = arith.constant 0 : index
    %426 = vector.load %arg9[%c1_444, %c0_445, %c0_446] : memref<7x18x16xf32, #tpu.memory_space<vmem>>, vector<3x16x16xf32>
    %427 = vector.shape_cast %426 : vector<3x16x16xf32> to vector<48x16xf32>
    %c18_447 = arith.constant 18 : index
    %c0_448 = arith.constant 0 : index
    %c0_449 = arith.constant 0 : index
    %428 = vector.load %arg6[%c18_447, %c0_448, %c0_449] : memref<45x16x16xf32, #tpu.memory_space<vmem>>, vector<1x16x16xf32>
    %429 = vector.shape_cast %428 : vector<1x16x16xf32> to vector<16x16xf32>
    %cst_450 = arith.constant dense<0.000000e+00> : vector<48x16xf32>
    %430 = tpu.matmul %427, %429, %cst_450 {dimension_numbers = #tpu.dot_dimension_numbers<[1], [0], [0], [1], [0, 0, 1, 1], [], []>} : vector<48x16xf32>, vector<16x16xf32>, vector<48x16xf32> -> vector<48x16xf32>
    %431 = arith.addf %425, %430 : vector<48x16xf32>
    %c1_451 = arith.constant 1 : index
    %c1_452 = arith.constant 1 : index
    %c0_453 = arith.constant 0 : index
    %432 = vector.load %arg9[%c1_451, %c1_452, %c0_453] : memref<7x18x16xf32, #tpu.memory_space<vmem>>, vector<3x16x16xf32>
    %433 = vector.shape_cast %432 : vector<3x16x16xf32> to vector<48x16xf32>
    %c19_454 = arith.constant 19 : index
    %c0_455 = arith.constant 0 : index
    %c0_456 = arith.constant 0 : index
    %434 = vector.load %arg6[%c19_454, %c0_455, %c0_456] : memref<45x16x16xf32, #tpu.memory_space<vmem>>, vector<1x16x16xf32>
    %435 = vector.shape_cast %434 : vector<1x16x16xf32> to vector<16x16xf32>
    %cst_457 = arith.constant dense<0.000000e+00> : vector<48x16xf32>
    %436 = tpu.matmul %433, %435, %cst_457 {dimension_numbers = #tpu.dot_dimension_numbers<[1], [0], [0], [1], [0, 0, 1, 1], [], []>} : vector<48x16xf32>, vector<16x16xf32>, vector<48x16xf32> -> vector<48x16xf32>
    %437 = arith.addf %431, %436 : vector<48x16xf32>
    %c1_458 = arith.constant 1 : index
    %c2_459 = arith.constant 2 : index
    %c0_460 = arith.constant 0 : index
    %438 = vector.load %arg9[%c1_458, %c2_459, %c0_460] : memref<7x18x16xf32, #tpu.memory_space<vmem>>, vector<3x16x16xf32>
    %439 = vector.shape_cast %438 : vector<3x16x16xf32> to vector<48x16xf32>
    %c20_461 = arith.constant 20 : index
    %c0_462 = arith.constant 0 : index
    %c0_463 = arith.constant 0 : index
    %440 = vector.load %arg6[%c20_461, %c0_462, %c0_463] : memref<45x16x16xf32, #tpu.memory_space<vmem>>, vector<1x16x16xf32>
    %441 = vector.shape_cast %440 : vector<1x16x16xf32> to vector<16x16xf32>
    %cst_464 = arith.constant dense<0.000000e+00> : vector<48x16xf32>
    %442 = tpu.matmul %439, %441, %cst_464 {dimension_numbers = #tpu.dot_dimension_numbers<[1], [0], [0], [1], [0, 0, 1, 1], [], []>} : vector<48x16xf32>, vector<16x16xf32>, vector<48x16xf32> -> vector<48x16xf32>
    %443 = arith.addf %437, %442 : vector<48x16xf32>
    %c2_465 = arith.constant 2 : index
    %c0_466 = arith.constant 0 : index
    %c0_467 = arith.constant 0 : index
    %444 = vector.load %arg9[%c2_465, %c0_466, %c0_467] : memref<7x18x16xf32, #tpu.memory_space<vmem>>, vector<3x16x16xf32>
    %445 = vector.shape_cast %444 : vector<3x16x16xf32> to vector<48x16xf32>
    %c21_468 = arith.constant 21 : index
    %c0_469 = arith.constant 0 : index
    %c0_470 = arith.constant 0 : index
    %446 = vector.load %arg6[%c21_468, %c0_469, %c0_470] : memref<45x16x16xf32, #tpu.memory_space<vmem>>, vector<1x16x16xf32>
    %447 = vector.shape_cast %446 : vector<1x16x16xf32> to vector<16x16xf32>
    %cst_471 = arith.constant dense<0.000000e+00> : vector<48x16xf32>
    %448 = tpu.matmul %445, %447, %cst_471 {dimension_numbers = #tpu.dot_dimension_numbers<[1], [0], [0], [1], [0, 0, 1, 1], [], []>} : vector<48x16xf32>, vector<16x16xf32>, vector<48x16xf32> -> vector<48x16xf32>
    %449 = arith.addf %443, %448 : vector<48x16xf32>
    %c2_472 = arith.constant 2 : index
    %c1_473 = arith.constant 1 : index
    %c0_474 = arith.constant 0 : index
    %450 = vector.load %arg9[%c2_472, %c1_473, %c0_474] : memref<7x18x16xf32, #tpu.memory_space<vmem>>, vector<3x16x16xf32>
    %451 = vector.shape_cast %450 : vector<3x16x16xf32> to vector<48x16xf32>
    %c22_475 = arith.constant 22 : index
    %c0_476 = arith.constant 0 : index
    %c0_477 = arith.constant 0 : index
    %452 = vector.load %arg6[%c22_475, %c0_476, %c0_477] : memref<45x16x16xf32, #tpu.memory_space<vmem>>, vector<1x16x16xf32>
    %453 = vector.shape_cast %452 : vector<1x16x16xf32> to vector<16x16xf32>
    %cst_478 = arith.constant dense<0.000000e+00> : vector<48x16xf32>
    %454 = tpu.matmul %451, %453, %cst_478 {dimension_numbers = #tpu.dot_dimension_numbers<[1], [0], [0], [1], [0, 0, 1, 1], [], []>} : vector<48x16xf32>, vector<16x16xf32>, vector<48x16xf32> -> vector<48x16xf32>
    %455 = arith.addf %449, %454 : vector<48x16xf32>
    %c2_479 = arith.constant 2 : index
    %c2_480 = arith.constant 2 : index
    %c0_481 = arith.constant 0 : index
    %456 = vector.load %arg9[%c2_479, %c2_480, %c0_481] : memref<7x18x16xf32, #tpu.memory_space<vmem>>, vector<3x16x16xf32>
    %457 = vector.shape_cast %456 : vector<3x16x16xf32> to vector<48x16xf32>
    %c23_482 = arith.constant 23 : index
    %c0_483 = arith.constant 0 : index
    %c0_484 = arith.constant 0 : index
    %458 = vector.load %arg6[%c23_482, %c0_483, %c0_484] : memref<45x16x16xf32, #tpu.memory_space<vmem>>, vector<1x16x16xf32>
    %459 = vector.shape_cast %458 : vector<1x16x16xf32> to vector<16x16xf32>
    %cst_485 = arith.constant dense<0.000000e+00> : vector<48x16xf32>
    %460 = tpu.matmul %457, %459, %cst_485 {dimension_numbers = #tpu.dot_dimension_numbers<[1], [0], [0], [1], [0, 0, 1, 1], [], []>} : vector<48x16xf32>, vector<16x16xf32>, vector<48x16xf32> -> vector<48x16xf32>
    %461 = arith.addf %455, %460 : vector<48x16xf32>
    %c3_486 = arith.constant 3 : index
    %c0_487 = arith.constant 0 : index
    %c0_488 = arith.constant 0 : index
    %462 = vector.load %arg9[%c3_486, %c0_487, %c0_488] : memref<7x18x16xf32, #tpu.memory_space<vmem>>, vector<3x16x16xf32>
    %463 = vector.shape_cast %462 : vector<3x16x16xf32> to vector<48x16xf32>
    %c24_489 = arith.constant 24 : index
    %c0_490 = arith.constant 0 : index
    %c0_491 = arith.constant 0 : index
    %464 = vector.load %arg6[%c24_489, %c0_490, %c0_491] : memref<45x16x16xf32, #tpu.memory_space<vmem>>, vector<1x16x16xf32>
    %465 = vector.shape_cast %464 : vector<1x16x16xf32> to vector<16x16xf32>
    %cst_492 = arith.constant dense<0.000000e+00> : vector<48x16xf32>
    %466 = tpu.matmul %463, %465, %cst_492 {dimension_numbers = #tpu.dot_dimension_numbers<[1], [0], [0], [1], [0, 0, 1, 1], [], []>} : vector<48x16xf32>, vector<16x16xf32>, vector<48x16xf32> -> vector<48x16xf32>
    %467 = arith.addf %461, %466 : vector<48x16xf32>
    %c3_493 = arith.constant 3 : index
    %c1_494 = arith.constant 1 : index
    %c0_495 = arith.constant 0 : index
    %468 = vector.load %arg9[%c3_493, %c1_494, %c0_495] : memref<7x18x16xf32, #tpu.memory_space<vmem>>, vector<3x16x16xf32>
    %469 = vector.shape_cast %468 : vector<3x16x16xf32> to vector<48x16xf32>
    %c25_496 = arith.constant 25 : index
    %c0_497 = arith.constant 0 : index
    %c0_498 = arith.constant 0 : index
    %470 = vector.load %arg6[%c25_496, %c0_497, %c0_498] : memref<45x16x16xf32, #tpu.memory_space<vmem>>, vector<1x16x16xf32>
    %471 = vector.shape_cast %470 : vector<1x16x16xf32> to vector<16x16xf32>
    %cst_499 = arith.constant dense<0.000000e+00> : vector<48x16xf32>
    %472 = tpu.matmul %469, %471, %cst_499 {dimension_numbers = #tpu.dot_dimension_numbers<[1], [0], [0], [1], [0, 0, 1, 1], [], []>} : vector<48x16xf32>, vector<16x16xf32>, vector<48x16xf32> -> vector<48x16xf32>
    %473 = arith.addf %467, %472 : vector<48x16xf32>
    %c3_500 = arith.constant 3 : index
    %c2_501 = arith.constant 2 : index
    %c0_502 = arith.constant 0 : index
    %474 = vector.load %arg9[%c3_500, %c2_501, %c0_502] : memref<7x18x16xf32, #tpu.memory_space<vmem>>, vector<3x16x16xf32>
    %475 = vector.shape_cast %474 : vector<3x16x16xf32> to vector<48x16xf32>
    %c26_503 = arith.constant 26 : index
    %c0_504 = arith.constant 0 : index
    %c0_505 = arith.constant 0 : index
    %476 = vector.load %arg6[%c26_503, %c0_504, %c0_505] : memref<45x16x16xf32, #tpu.memory_space<vmem>>, vector<1x16x16xf32>
    %477 = vector.shape_cast %476 : vector<1x16x16xf32> to vector<16x16xf32>
    %cst_506 = arith.constant dense<0.000000e+00> : vector<48x16xf32>
    %478 = tpu.matmul %475, %477, %cst_506 {dimension_numbers = #tpu.dot_dimension_numbers<[1], [0], [0], [1], [0, 0, 1, 1], [], []>} : vector<48x16xf32>, vector<16x16xf32>, vector<48x16xf32> -> vector<48x16xf32>
    %479 = arith.addf %473, %478 : vector<48x16xf32>
    %c4_507 = arith.constant 4 : index
    %c0_508 = arith.constant 0 : index
    %c0_509 = arith.constant 0 : index
    %480 = vector.load %arg9[%c4_507, %c0_508, %c0_509] : memref<7x18x16xf32, #tpu.memory_space<vmem>>, vector<3x16x16xf32>
    %481 = vector.shape_cast %480 : vector<3x16x16xf32> to vector<48x16xf32>
    %c27_510 = arith.constant 27 : index
    %c0_511 = arith.constant 0 : index
    %c0_512 = arith.constant 0 : index
    %482 = vector.load %arg6[%c27_510, %c0_511, %c0_512] : memref<45x16x16xf32, #tpu.memory_space<vmem>>, vector<1x16x16xf32>
    %483 = vector.shape_cast %482 : vector<1x16x16xf32> to vector<16x16xf32>
    %cst_513 = arith.constant dense<0.000000e+00> : vector<48x16xf32>
    %484 = tpu.matmul %481, %483, %cst_513 {dimension_numbers = #tpu.dot_dimension_numbers<[1], [0], [0], [1], [0, 0, 1, 1], [], []>} : vector<48x16xf32>, vector<16x16xf32>, vector<48x16xf32> -> vector<48x16xf32>
    %485 = arith.addf %479, %484 : vector<48x16xf32>
    %c4_514 = arith.constant 4 : index
    %c1_515 = arith.constant 1 : index
    %c0_516 = arith.constant 0 : index
    %486 = vector.load %arg9[%c4_514, %c1_515, %c0_516] : memref<7x18x16xf32, #tpu.memory_space<vmem>>, vector<3x16x16xf32>
    %487 = vector.shape_cast %486 : vector<3x16x16xf32> to vector<48x16xf32>
    %c28_517 = arith.constant 28 : index
    %c0_518 = arith.constant 0 : index
    %c0_519 = arith.constant 0 : index
    %488 = vector.load %arg6[%c28_517, %c0_518, %c0_519] : memref<45x16x16xf32, #tpu.memory_space<vmem>>, vector<1x16x16xf32>
    %489 = vector.shape_cast %488 : vector<1x16x16xf32> to vector<16x16xf32>
    %cst_520 = arith.constant dense<0.000000e+00> : vector<48x16xf32>
    %490 = tpu.matmul %487, %489, %cst_520 {dimension_numbers = #tpu.dot_dimension_numbers<[1], [0], [0], [1], [0, 0, 1, 1], [], []>} : vector<48x16xf32>, vector<16x16xf32>, vector<48x16xf32> -> vector<48x16xf32>
    %491 = arith.addf %485, %490 : vector<48x16xf32>
    %c4_521 = arith.constant 4 : index
    %c2_522 = arith.constant 2 : index
    %c0_523 = arith.constant 0 : index
    %492 = vector.load %arg9[%c4_521, %c2_522, %c0_523] : memref<7x18x16xf32, #tpu.memory_space<vmem>>, vector<3x16x16xf32>
    %493 = vector.shape_cast %492 : vector<3x16x16xf32> to vector<48x16xf32>
    %c29_524 = arith.constant 29 : index
    %c0_525 = arith.constant 0 : index
    %c0_526 = arith.constant 0 : index
    %494 = vector.load %arg6[%c29_524, %c0_525, %c0_526] : memref<45x16x16xf32, #tpu.memory_space<vmem>>, vector<1x16x16xf32>
    %495 = vector.shape_cast %494 : vector<1x16x16xf32> to vector<16x16xf32>
    %cst_527 = arith.constant dense<0.000000e+00> : vector<48x16xf32>
    %496 = tpu.matmul %493, %495, %cst_527 {dimension_numbers = #tpu.dot_dimension_numbers<[1], [0], [0], [1], [0, 0, 1, 1], [], []>} : vector<48x16xf32>, vector<16x16xf32>, vector<48x16xf32> -> vector<48x16xf32>
    %497 = arith.addf %491, %496 : vector<48x16xf32>
    %cst_528 = arith.constant 0.000000e+00 : f32
    %498 = vector.broadcast %cst_528 : f32 to vector<48x16xf32>
    %499 = arith.cmpf ogt, %497, %498 : vector<48x16xf32>
    %cst_529 = arith.constant 1.000000e-01 : f32
    %500 = vector.broadcast %cst_529 : f32 to vector<48x16xf32>
    %501 = arith.mulf %500, %497 : vector<48x16xf32>
    %502 = arith.select %499, %497, %501 : vector<48x16xi1>, vector<48x16xf32>
    %503 = vector.shape_cast %502 : vector<48x16xf32> to vector<3x16x16xf32>
    %c2_530 = arith.constant 2 : index
    %c1_531 = arith.constant 1 : index
    %c0_532 = arith.constant 0 : index
    %504 = vector.load %arg9[%c2_530, %c1_531, %c0_532] : memref<7x18x16xf32, #tpu.memory_space<vmem>>, vector<3x16x16xf32>
    tpu.vector_store %arg9[%c2_530, %c1_531, %c0_532], %503 {strides = array<i32>} : memref<7x18x16xf32, #tpu.memory_space<vmem>>, vector<3x16x16xf32>,
    %c0_533 = arith.constant 0 : index
    %c0_534 = arith.constant 0 : index
    %c0_535 = arith.constant 0 : index
    %505 = vector.load %arg9[%c0_533, %c0_534, %c0_535] : memref<7x18x16xf32, #tpu.memory_space<vmem>>, vector<3x16x16xf32>
    %506 = vector.shape_cast %505 : vector<3x16x16xf32> to vector<48x16xf32>
    %c30_536 = arith.constant 30 : index
    %c0_537 = arith.constant 0 : index
    %c0_538 = arith.constant 0 : index
    %507 = vector.load %arg6[%c30_536, %c0_537, %c0_538] : memref<45x16x16xf32, #tpu.memory_space<vmem>>, vector<1x16x16xf32>
    %508 = vector.shape_cast %507 : vector<1x16x16xf32> to vector<16x16xf32>
    %cst_539 = arith.constant dense<0.000000e+00> : vector<48x16xf32>
    %509 = tpu.matmul %506, %508, %cst_539 {dimension_numbers = #tpu.dot_dimension_numbers<[1], [0], [0], [1], [0, 0, 1, 1], [], []>} : vector<48x16xf32>, vector<16x16xf32>, vector<48x16xf32> -> vector<48x16xf32>
    %c0_540 = arith.constant 0 : index
    %c1_541 = arith.constant 1 : index
    %c0_542 = arith.constant 0 : index
    %510 = vector.load %arg9[%c0_540, %c1_541, %c0_542] : memref<7x18x16xf32, #tpu.memory_space<vmem>>, vector<3x16x16xf32>
    %511 = vector.shape_cast %510 : vector<3x16x16xf32> to vector<48x16xf32>
    %c31_543 = arith.constant 31 : index
    %c0_544 = arith.constant 0 : index
    %c0_545 = arith.constant 0 : index
    %512 = vector.load %arg6[%c31_543, %c0_544, %c0_545] : memref<45x16x16xf32, #tpu.memory_space<vmem>>, vector<1x16x16xf32>
    %513 = vector.shape_cast %512 : vector<1x16x16xf32> to vector<16x16xf32>
    %cst_546 = arith.constant dense<0.000000e+00> : vector<48x16xf32>
    %514 = tpu.matmul %511, %513, %cst_546 {dimension_numbers = #tpu.dot_dimension_numbers<[1], [0], [0], [1], [0, 0, 1, 1], [], []>} : vector<48x16xf32>, vector<16x16xf32>, vector<48x16xf32> -> vector<48x16xf32>
    %515 = arith.addf %509, %514 : vector<48x16xf32>
    %c0_547 = arith.constant 0 : index
    %c2_548 = arith.constant 2 : index
    %c0_549 = arith.constant 0 : index
    %516 = vector.load %arg9[%c0_547, %c2_548, %c0_549] : memref<7x18x16xf32, #tpu.memory_space<vmem>>, vector<3x16x16xf32>
    %517 = vector.shape_cast %516 : vector<3x16x16xf32> to vector<48x16xf32>
    %c32_550 = arith.constant 32 : index
    %c0_551 = arith.constant 0 : index
    %c0_552 = arith.constant 0 : index
    %518 = vector.load %arg6[%c32_550, %c0_551, %c0_552] : memref<45x16x16xf32, #tpu.memory_space<vmem>>, vector<1x16x16xf32>
    %519 = vector.shape_cast %518 : vector<1x16x16xf32> to vector<16x16xf32>
    %cst_553 = arith.constant dense<0.000000e+00> : vector<48x16xf32>
    %520 = tpu.matmul %517, %519, %cst_553 {dimension_numbers = #tpu.dot_dimension_numbers<[1], [0], [0], [1], [0, 0, 1, 1], [], []>} : vector<48x16xf32>, vector<16x16xf32>, vector<48x16xf32> -> vector<48x16xf32>
    %521 = arith.addf %515, %520 : vector<48x16xf32>
    %c1_554 = arith.constant 1 : index
    %c0_555 = arith.constant 0 : index
    %c0_556 = arith.constant 0 : index
    %522 = vector.load %arg9[%c1_554, %c0_555, %c0_556] : memref<7x18x16xf32, #tpu.memory_space<vmem>>, vector<3x16x16xf32>
    %523 = vector.shape_cast %522 : vector<3x16x16xf32> to vector<48x16xf32>
    %c33_557 = arith.constant 33 : index
    %c0_558 = arith.constant 0 : index
    %c0_559 = arith.constant 0 : index
    %524 = vector.load %arg6[%c33_557, %c0_558, %c0_559] : memref<45x16x16xf32, #tpu.memory_space<vmem>>, vector<1x16x16xf32>
    %525 = vector.shape_cast %524 : vector<1x16x16xf32> to vector<16x16xf32>
    %cst_560 = arith.constant dense<0.000000e+00> : vector<48x16xf32>
    %526 = tpu.matmul %523, %525, %cst_560 {dimension_numbers = #tpu.dot_dimension_numbers<[1], [0], [0], [1], [0, 0, 1, 1], [], []>} : vector<48x16xf32>, vector<16x16xf32>, vector<48x16xf32> -> vector<48x16xf32>
    %527 = arith.addf %521, %526 : vector<48x16xf32>
    %c1_561 = arith.constant 1 : index
    %c1_562 = arith.constant 1 : index
    %c0_563 = arith.constant 0 : index
    %528 = vector.load %arg9[%c1_561, %c1_562, %c0_563] : memref<7x18x16xf32, #tpu.memory_space<vmem>>, vector<3x16x16xf32>
    %529 = vector.shape_cast %528 : vector<3x16x16xf32> to vector<48x16xf32>
    %c34_564 = arith.constant 34 : index
    %c0_565 = arith.constant 0 : index
    %c0_566 = arith.constant 0 : index
    %530 = vector.load %arg6[%c34_564, %c0_565, %c0_566] : memref<45x16x16xf32, #tpu.memory_space<vmem>>, vector<1x16x16xf32>
    %531 = vector.shape_cast %530 : vector<1x16x16xf32> to vector<16x16xf32>
    %cst_567 = arith.constant dense<0.000000e+00> : vector<48x16xf32>
    %532 = tpu.matmul %529, %531, %cst_567 {dimension_numbers = #tpu.dot_dimension_numbers<[1], [0], [0], [1], [0, 0, 1, 1], [], []>} : vector<48x16xf32>, vector<16x16xf32>, vector<48x16xf32> -> vector<48x16xf32>
    %533 = arith.addf %527, %532 : vector<48x16xf32>
    %c1_568 = arith.constant 1 : index
    %c2_569 = arith.constant 2 : index
    %c0_570 = arith.constant 0 : index
    %534 = vector.load %arg9[%c1_568, %c2_569, %c0_570] : memref<7x18x16xf32, #tpu.memory_space<vmem>>, vector<3x16x16xf32>
    %535 = vector.shape_cast %534 : vector<3x16x16xf32> to vector<48x16xf32>
    %c35_571 = arith.constant 35 : index
    %c0_572 = arith.constant 0 : index
    %c0_573 = arith.constant 0 : index
    %536 = vector.load %arg6[%c35_571, %c0_572, %c0_573] : memref<45x16x16xf32, #tpu.memory_space<vmem>>, vector<1x16x16xf32>
    %537 = vector.shape_cast %536 : vector<1x16x16xf32> to vector<16x16xf32>
    %cst_574 = arith.constant dense<0.000000e+00> : vector<48x16xf32>
    %538 = tpu.matmul %535, %537, %cst_574 {dimension_numbers = #tpu.dot_dimension_numbers<[1], [0], [0], [1], [0, 0, 1, 1], [], []>} : vector<48x16xf32>, vector<16x16xf32>, vector<48x16xf32> -> vector<48x16xf32>
    %539 = arith.addf %533, %538 : vector<48x16xf32>
    %c2_575 = arith.constant 2 : index
    %c0_576 = arith.constant 0 : index
    %c0_577 = arith.constant 0 : index
    %540 = vector.load %arg9[%c2_575, %c0_576, %c0_577] : memref<7x18x16xf32, #tpu.memory_space<vmem>>, vector<3x16x16xf32>
    %541 = vector.shape_cast %540 : vector<3x16x16xf32> to vector<48x16xf32>
    %c36_578 = arith.constant 36 : index
    %c0_579 = arith.constant 0 : index
    %c0_580 = arith.constant 0 : index
    %542 = vector.load %arg6[%c36_578, %c0_579, %c0_580] : memref<45x16x16xf32, #tpu.memory_space<vmem>>, vector<1x16x16xf32>
    %543 = vector.shape_cast %542 : vector<1x16x16xf32> to vector<16x16xf32>
    %cst_581 = arith.constant dense<0.000000e+00> : vector<48x16xf32>
    %544 = tpu.matmul %541, %543, %cst_581 {dimension_numbers = #tpu.dot_dimension_numbers<[1], [0], [0], [1], [0, 0, 1, 1], [], []>} : vector<48x16xf32>, vector<16x16xf32>, vector<48x16xf32> -> vector<48x16xf32>
    %545 = arith.addf %539, %544 : vector<48x16xf32>
    %c2_582 = arith.constant 2 : index
    %c1_583 = arith.constant 1 : index
    %c0_584 = arith.constant 0 : index
    %546 = vector.load %arg9[%c2_582, %c1_583, %c0_584] : memref<7x18x16xf32, #tpu.memory_space<vmem>>, vector<3x16x16xf32>
    %547 = vector.shape_cast %546 : vector<3x16x16xf32> to vector<48x16xf32>
    %c37_585 = arith.constant 37 : index
    %c0_586 = arith.constant 0 : index
    %c0_587 = arith.constant 0 : index
    %548 = vector.load %arg6[%c37_585, %c0_586, %c0_587] : memref<45x16x16xf32, #tpu.memory_space<vmem>>, vector<1x16x16xf32>
    %549 = vector.shape_cast %548 : vector<1x16x16xf32> to vector<16x16xf32>
    %cst_588 = arith.constant dense<0.000000e+00> : vector<48x16xf32>
    %550 = tpu.matmul %547, %549, %cst_588 {dimension_numbers = #tpu.dot_dimension_numbers<[1], [0], [0], [1], [0, 0, 1, 1], [], []>} : vector<48x16xf32>, vector<16x16xf32>, vector<48x16xf32> -> vector<48x16xf32>
    %551 = arith.addf %545, %550 : vector<48x16xf32>
    %c2_589 = arith.constant 2 : index
    %c2_590 = arith.constant 2 : index
    %c0_591 = arith.constant 0 : index
    %552 = vector.load %arg9[%c2_589, %c2_590, %c0_591] : memref<7x18x16xf32, #tpu.memory_space<vmem>>, vector<3x16x16xf32>
    %553 = vector.shape_cast %552 : vector<3x16x16xf32> to vector<48x16xf32>
    %c38_592 = arith.constant 38 : index
    %c0_593 = arith.constant 0 : index
    %c0_594 = arith.constant 0 : index
    %554 = vector.load %arg6[%c38_592, %c0_593, %c0_594] : memref<45x16x16xf32, #tpu.memory_space<vmem>>, vector<1x16x16xf32>
    %555 = vector.shape_cast %554 : vector<1x16x16xf32> to vector<16x16xf32>
    %cst_595 = arith.constant dense<0.000000e+00> : vector<48x16xf32>
    %556 = tpu.matmul %553, %555, %cst_595 {dimension_numbers = #tpu.dot_dimension_numbers<[1], [0], [0], [1], [0, 0, 1, 1], [], []>} : vector<48x16xf32>, vector<16x16xf32>, vector<48x16xf32> -> vector<48x16xf32>
    %557 = arith.addf %551, %556 : vector<48x16xf32>
    %c3_596 = arith.constant 3 : index
    %c0_597 = arith.constant 0 : index
    %c0_598 = arith.constant 0 : index
    %558 = vector.load %arg9[%c3_596, %c0_597, %c0_598] : memref<7x18x16xf32, #tpu.memory_space<vmem>>, vector<3x16x16xf32>
    %559 = vector.shape_cast %558 : vector<3x16x16xf32> to vector<48x16xf32>
    %c39_599 = arith.constant 39 : index
    %c0_600 = arith.constant 0 : index
    %c0_601 = arith.constant 0 : index
    %560 = vector.load %arg6[%c39_599, %c0_600, %c0_601] : memref<45x16x16xf32, #tpu.memory_space<vmem>>, vector<1x16x16xf32>
    %561 = vector.shape_cast %560 : vector<1x16x16xf32> to vector<16x16xf32>
    %cst_602 = arith.constant dense<0.000000e+00> : vector<48x16xf32>
    %562 = tpu.matmul %559, %561, %cst_602 {dimension_numbers = #tpu.dot_dimension_numbers<[1], [0], [0], [1], [0, 0, 1, 1], [], []>} : vector<48x16xf32>, vector<16x16xf32>, vector<48x16xf32> -> vector<48x16xf32>
    %563 = arith.addf %557, %562 : vector<48x16xf32>
    %c3_603 = arith.constant 3 : index
    %c1_604 = arith.constant 1 : index
    %c0_605 = arith.constant 0 : index
    %564 = vector.load %arg9[%c3_603, %c1_604, %c0_605] : memref<7x18x16xf32, #tpu.memory_space<vmem>>, vector<3x16x16xf32>
    %565 = vector.shape_cast %564 : vector<3x16x16xf32> to vector<48x16xf32>
    %c40_606 = arith.constant 40 : index
    %c0_607 = arith.constant 0 : index
    %c0_608 = arith.constant 0 : index
    %566 = vector.load %arg6[%c40_606, %c0_607, %c0_608] : memref<45x16x16xf32, #tpu.memory_space<vmem>>, vector<1x16x16xf32>
    %567 = vector.shape_cast %566 : vector<1x16x16xf32> to vector<16x16xf32>
    %cst_609 = arith.constant dense<0.000000e+00> : vector<48x16xf32>
    %568 = tpu.matmul %565, %567, %cst_609 {dimension_numbers = #tpu.dot_dimension_numbers<[1], [0], [0], [1], [0, 0, 1, 1], [], []>} : vector<48x16xf32>, vector<16x16xf32>, vector<48x16xf32> -> vector<48x16xf32>
    %569 = arith.addf %563, %568 : vector<48x16xf32>
    %c3_610 = arith.constant 3 : index
    %c2_611 = arith.constant 2 : index
    %c0_612 = arith.constant 0 : index
    %570 = vector.load %arg9[%c3_610, %c2_611, %c0_612] : memref<7x18x16xf32, #tpu.memory_space<vmem>>, vector<3x16x16xf32>
    %571 = vector.shape_cast %570 : vector<3x16x16xf32> to vector<48x16xf32>
    %c41_613 = arith.constant 41 : index
    %c0_614 = arith.constant 0 : index
    %c0_615 = arith.constant 0 : index
    %572 = vector.load %arg6[%c41_613, %c0_614, %c0_615] : memref<45x16x16xf32, #tpu.memory_space<vmem>>, vector<1x16x16xf32>
    %573 = vector.shape_cast %572 : vector<1x16x16xf32> to vector<16x16xf32>
    %cst_616 = arith.constant dense<0.000000e+00> : vector<48x16xf32>
    %574 = tpu.matmul %571, %573, %cst_616 {dimension_numbers = #tpu.dot_dimension_numbers<[1], [0], [0], [1], [0, 0, 1, 1], [], []>} : vector<48x16xf32>, vector<16x16xf32>, vector<48x16xf32> -> vector<48x16xf32>
    %575 = arith.addf %569, %574 : vector<48x16xf32>
    %c4_617 = arith.constant 4 : index
    %c0_618 = arith.constant 0 : index
    %c0_619 = arith.constant 0 : index
    %576 = vector.load %arg9[%c4_617, %c0_618, %c0_619] : memref<7x18x16xf32, #tpu.memory_space<vmem>>, vector<3x16x16xf32>
    %577 = vector.shape_cast %576 : vector<3x16x16xf32> to vector<48x16xf32>
    %c42_620 = arith.constant 42 : index
    %c0_621 = arith.constant 0 : index
    %c0_622 = arith.constant 0 : index
    %578 = vector.load %arg6[%c42_620, %c0_621, %c0_622] : memref<45x16x16xf32, #tpu.memory_space<vmem>>, vector<1x16x16xf32>
    %579 = vector.shape_cast %578 : vector<1x16x16xf32> to vector<16x16xf32>
    %cst_623 = arith.constant dense<0.000000e+00> : vector<48x16xf32>
    %580 = tpu.matmul %577, %579, %cst_623 {dimension_numbers = #tpu.dot_dimension_numbers<[1], [0], [0], [1], [0, 0, 1, 1], [], []>} : vector<48x16xf32>, vector<16x16xf32>, vector<48x16xf32> -> vector<48x16xf32>
    %581 = arith.addf %575, %580 : vector<48x16xf32>
    %c4_624 = arith.constant 4 : index
    %c1_625 = arith.constant 1 : index
    %c0_626 = arith.constant 0 : index
    %582 = vector.load %arg9[%c4_624, %c1_625, %c0_626] : memref<7x18x16xf32, #tpu.memory_space<vmem>>, vector<3x16x16xf32>
    %583 = vector.shape_cast %582 : vector<3x16x16xf32> to vector<48x16xf32>
    %c43_627 = arith.constant 43 : index
    %c0_628 = arith.constant 0 : index
    %c0_629 = arith.constant 0 : index
    %584 = vector.load %arg6[%c43_627, %c0_628, %c0_629] : memref<45x16x16xf32, #tpu.memory_space<vmem>>, vector<1x16x16xf32>
    %585 = vector.shape_cast %584 : vector<1x16x16xf32> to vector<16x16xf32>
    %cst_630 = arith.constant dense<0.000000e+00> : vector<48x16xf32>
    %586 = tpu.matmul %583, %585, %cst_630 {dimension_numbers = #tpu.dot_dimension_numbers<[1], [0], [0], [1], [0, 0, 1, 1], [], []>} : vector<48x16xf32>, vector<16x16xf32>, vector<48x16xf32> -> vector<48x16xf32>
    %587 = arith.addf %581, %586 : vector<48x16xf32>
    %c4_631 = arith.constant 4 : index
    %c2_632 = arith.constant 2 : index
    %c0_633 = arith.constant 0 : index
    %588 = vector.load %arg9[%c4_631, %c2_632, %c0_633] : memref<7x18x16xf32, #tpu.memory_space<vmem>>, vector<3x16x16xf32>
    %589 = vector.shape_cast %588 : vector<3x16x16xf32> to vector<48x16xf32>
    %c44_634 = arith.constant 44 : index
    %c0_635 = arith.constant 0 : index
    %c0_636 = arith.constant 0 : index
    %590 = vector.load %arg6[%c44_634, %c0_635, %c0_636] : memref<45x16x16xf32, #tpu.memory_space<vmem>>, vector<1x16x16xf32>
    %591 = vector.shape_cast %590 : vector<1x16x16xf32> to vector<16x16xf32>
    %cst_637 = arith.constant dense<0.000000e+00> : vector<48x16xf32>
    %592 = tpu.matmul %589, %591, %cst_637 {dimension_numbers = #tpu.dot_dimension_numbers<[1], [0], [0], [1], [0, 0, 1, 1], [], []>} : vector<48x16xf32>, vector<16x16xf32>, vector<48x16xf32> -> vector<48x16xf32>
    %593 = arith.addf %587, %592 : vector<48x16xf32>
    %cst_638 = arith.constant 0.000000e+00 : f32
    %594 = vector.broadcast %cst_638 : f32 to vector<48x16xf32>
    %595 = arith.cmpf ogt, %593, %594 : vector<48x16xf32>
    %cst_639 = arith.constant 1.000000e-01 : f32
    %596 = vector.broadcast %cst_639 : f32 to vector<48x16xf32>
    %597 = arith.mulf %596, %593 : vector<48x16xf32>
    %598 = arith.select %595, %593, %597 : vector<48x16xi1>, vector<48x16xf32>
    %599 = vector.shape_cast %598 : vector<48x16xf32> to vector<3x16x16xf32>
    %c0_640 = arith.constant 0 : index
    %c0_641 = arith.constant 0 : index
    %c0_642 = arith.constant 0 : index
    %600 = vector.load %arg7[%c0_640, %c0_641, %c0_642] : memref<3x2x16xf32, #tpu.memory_space<vmem>>, vector<1x2x16xf32>
    %601 = vector.shape_cast %600 : vector<1x2x16xf32> to vector<2x16xf32>
    %602 = vector.extract_strided_slice %599 {offsets = [0, 0, 0], sizes = [1, 16, 16], strides = [1, 1, 1]} : vector<3x16x16xf32> to vector<1x16x16xf32>
    %603 = vector.shape_cast %602 : vector<1x16x16xf32> to vector<16x16xf32>
    %cst_643 = arith.constant dense<0.000000e+00> : vector<2x16xf32>
    %604 = tpu.matmul %601, %603, %cst_643 {dimension_numbers = #tpu.dot_dimension_numbers<[1], [1], [0], [0], [0, 0, 1, 0], [], []>} : vector<2x16xf32>, vector<16x16xf32>, vector<2x16xf32> -> vector<2x16xf32>
    %c1_644 = arith.constant 1 : index
    %c0_645 = arith.constant 0 : index
    %c0_646 = arith.constant 0 : index
    %605 = vector.load %arg7[%c1_644, %c0_645, %c0_646] : memref<3x2x16xf32, #tpu.memory_space<vmem>>, vector<1x2x16xf32>
    %606 = vector.shape_cast %605 : vector<1x2x16xf32> to vector<2x16xf32>
    %607 = vector.extract_strided_slice %599 {offsets = [1, 0, 0], sizes = [1, 16, 16], strides = [1, 1, 1]} : vector<3x16x16xf32> to vector<1x16x16xf32>
    %608 = vector.shape_cast %607 : vector<1x16x16xf32> to vector<16x16xf32>
    %cst_647 = arith.constant dense<0.000000e+00> : vector<2x16xf32>
    %609 = tpu.matmul %606, %608, %cst_647 {dimension_numbers = #tpu.dot_dimension_numbers<[1], [1], [0], [0], [0, 0, 1, 0], [], []>} : vector<2x16xf32>, vector<16x16xf32>, vector<2x16xf32> -> vector<2x16xf32>
    %610 = arith.addf %604, %609 : vector<2x16xf32>
    %c2_648 = arith.constant 2 : index
    %c0_649 = arith.constant 0 : index
    %c0_650 = arith.constant 0 : index
    %611 = vector.load %arg7[%c2_648, %c0_649, %c0_650] : memref<3x2x16xf32, #tpu.memory_space<vmem>>, vector<1x2x16xf32>
    %612 = vector.shape_cast %611 : vector<1x2x16xf32> to vector<2x16xf32>
    %613 = vector.extract_strided_slice %599 {offsets = [2, 0, 0], sizes = [1, 16, 16], strides = [1, 1, 1]} : vector<3x16x16xf32> to vector<1x16x16xf32>
    %614 = vector.shape_cast %613 : vector<1x16x16xf32> to vector<16x16xf32>
    %cst_651 = arith.constant dense<0.000000e+00> : vector<2x16xf32>
    %615 = tpu.matmul %612, %614, %cst_651 {dimension_numbers = #tpu.dot_dimension_numbers<[1], [1], [0], [0], [0, 0, 1, 0], [], []>} : vector<2x16xf32>, vector<16x16xf32>, vector<2x16xf32> -> vector<2x16xf32>
    %616 = arith.addf %610, %615 : vector<2x16xf32>
    %cst_652 = arith.constant dense<0xFF800000> : vector<2xf32>
    %617 = vector.multi_reduction <maximumf>, %616, %cst_652 [1] : vector<2x16xf32> to vector<2xf32>
    %618 = vector.shape_cast %617 : vector<2xf32> to vector<2x1xf32>
    %619 = vector.broadcast %618 : vector<2x1xf32> to vector<2x16xf32>
    %620 = arith.subf %616, %619 : vector<2x16xf32>
    %621 = math.exp %620 : vector<2x16xf32>
    %cst_653 = arith.constant dense<0.000000e+00> : vector<2xf32>
    %622 = vector.multi_reduction <add>, %621, %cst_653 [1] : vector<2x16xf32> to vector<2xf32>
    %623 = vector.shape_cast %622 : vector<2xf32> to vector<2x1xf32>
    %624 = math.log %623 : vector<2x1xf32>
    %625 = vector.broadcast %624 : vector<2x1xf32> to vector<2x16xf32>
    %626 = arith.subf %620, %625 : vector<2x16xf32>
    %c0_654 = arith.constant 0 : index
    %c0_655 = arith.constant 0 : index
    %c0_656 = arith.constant 0 : index
    %627 = vector.load %arg8[%c0_654, %c0_655, %c0_656] : memref<1x2x16xf32, #tpu.memory_space<vmem>>, vector<1x2x16xf32>
    %628 = vector.shape_cast %627 : vector<1x2x16xf32> to vector<2x16xf32>
    %629 = vector.shape_cast %626 : vector<2x16xf32> to vector<1x2x16xf32>
    tpu.vector_store %arg8[%c0_654, %c0_655, %c0_656], %629 {strides = array<i32>} : memref<1x2x16xf32, #tpu.memory_space<vmem>>, vector<1x2x16xf32>,
    return
  }
  func.func @transform_0(%arg0: i32) -> (i32, i32, i32) {
    %c0_i32 = arith.constant 0 : i32
    %c0_i32_0 = arith.constant 0 : i32
    %c0_i32_1 = arith.constant 0 : i32
    return %arg0, %c0_i32, %c0_i32_0 : i32, i32, i32
  }
  func.func @transform_1(%arg0: i32) -> (i32, i32) {
    %c0_i32 = arith.constant 0 : i32
    %c0_i32_0 = arith.constant 0 : i32
    %c0_i32_1 = arith.constant 0 : i32
    return %c0_i32, %c0_i32_0 : i32, i32
  }
  func.func @transform_2(%arg0: i32) -> (i32, i32, i32) {
    %c0_i32 = arith.constant 0 : i32
    %c0_i32_0 = arith.constant 0 : i32
    %c0_i32_1 = arith.constant 0 : i32
    return %arg0, %c0_i32, %c0_i32_0 : i32, i32, i32
  }
  func.func @transform_3(%arg0: i32) -> (i32, i32) {
    %c0_i32 = arith.constant 0 : i32
    %c0_i32_0 = arith.constant 0 : i32
    %c0_i32_1 = arith.constant 0 : i32
    return %c0_i32, %c0_i32_0 : i32, i32
  }
  func.func @transform_4(%arg0: i32) -> (i32, i32, i32) {
    %c0_i32 = arith.constant 0 : i32
    %c0_i32_0 = arith.constant 0 : i32
    %c0_i32_1 = arith.constant 0 : i32
    %c0_i32_2 = arith.constant 0 : i32
    return %c0_i32, %c0_i32_0, %c0_i32_1 : i32, i32, i32
  }
  func.func @transform_5(%arg0: i32) -> (i32, i32, i32) {
    %c0_i32 = arith.constant 0 : i32
    %c0_i32_0 = arith.constant 0 : i32
    %c0_i32_1 = arith.constant 0 : i32
    %c0_i32_2 = arith.constant 0 : i32
    return %c0_i32, %c0_i32_0, %c0_i32_1 : i32, i32, i32
  }
  func.func @transform_6(%arg0: i32) -> (i32, i32, i32) {
    %c0_i32 = arith.constant 0 : i32
    %c0_i32_0 = arith.constant 0 : i32
    %c0_i32_1 = arith.constant 0 : i32
    %c0_i32_2 = arith.constant 0 : i32
    return %c0_i32, %c0_i32_0, %c0_i32_1 : i32, i32, i32
  }
  func.func @transform_7(%arg0: i32) -> (i32, i32, i32) {
    %c0_i32 = arith.constant 0 : i32
    %c0_i32_0 = arith.constant 0 : i32
    %c0_i32_1 = arith.constant 0 : i32
    return %arg0, %c0_i32, %c0_i32_0 : i32, i32, i32
  }
}

</mosaic_0001>

<bundles_post_ra>
// kernel: fofe_cnn_forward.1
= control target key start
LH: loop header
LB: loop body
LE: loop exit
PB: predicated region body
PF: predicated region fallthrough
CT: control target
= control target key end

     0   :  { %12 = vsyncpa [#allocation4], 0  ;;  %s13718_s0 = inlined_call_operand.vmem [shape: f32[2,8,8], index: 0, kind: input, shape index: {}]   ;;  %s13719_s1 = inlined_call_operand.vmem [shape: f32[8,8], index: 1, kind: input, shape index: {}]   ;;  %s13720_s2 = inlined_call_operand.vmem [shape: f32[2,36,8], index: 2, kind: input, shape index: {}]   ;;  %s13721_s3 = inlined_call_operand.vmem [shape: f32[8,8], index: 3, kind: input, shape index: {}]   ;;  %s13722_s4 = inlined_call_operand.hbm [shape: f32[45,8,8], index: 4, kind: input, shape index: {}]   ;;  %s13723_s5 = inlined_call_operand.hbm [shape: f32[45,16,16], index: 5, kind: input, shape index: {}]   ;;  %s13724_s6 = inlined_call_operand.vmem [shape: f32[3,2,16], index: 6, kind: input, shape index: {}]   ;;  %s13725_s7 = inlined_call_operand.vmem [shape: f32[2,2,16], index: 7, kind: output, shape index: {}]  }
   0x1   :  { %13 = vsyncpa [#allocation6], 0  ;;  %s12393_s24 = smov 0  }
   0x2 LB: > { %s12399_s25 = sadd.s32 4294967295, %s12344_s24   ;;  %p10511_p0 = scmp.ge.s32.totalorder %s12344_s24, 1  ;;  %s12344_s24 = sphi %s12393_s24, %s19_s24  }
   0x3   : > { %p207_p1 = scmp.lt.s32.totalorder %s12344_s24, 3  ;;  %s12346_s26 = smov [#allocation3]  }
   0x4   : > { %s225_s27 = sshll.u32 %s12346_s26, 4  ;;  %p12253_p3 = scmp.eq.s32.totalorder %s12399_s25, 0  ;;  %s226_s27 = int_to_ptr.vmem [resolvable:$true] %s225_s27 }
   0x5   : > { %p12403_p2 = pnand %p10511_p0, %p207_p1  ;;  %s12347_s29 = smov [#allocation5]  }
   0x6   : > { %s238_s30 = sshll.u32 %s12347_s29, 4  ;;  %s12289_s9 = scalar_lea.vmem %s226_s27, 5760  ;;  %s239_s30 = int_to_ptr.vmem [resolvable:$true] %s238_s30 }
   0x7   : > { %p12246_p4 = pneg %p12403_p2  ;;  %p12290_p7 = scmp.ne.s32.totalorder %s226_s27, %s12289_s9 }
   0x8   : > { %p12297_p10 = scmp.lt.s32.totalorder %s226_s27, %s226_s27  ;;  %p12298_p11 = scmp.lt.s32.totalorder %s12289_s9, %s12289_s9 }
   0x9   : > { %p12412_p5 = pnand %p12253_p3, %p12246_p4 }
   0xa   : > { %p12299_p12 = por %p12298_p11, %p12297_p10 }
   0xb   : > { %p12280_p6 = pneg %p12412_p5 }
   0xd   : > { %p12292_p8 = pnand %p12290_p7, %p12280_p6 }
   0xf   : > { %p12293_p9 = pneg %p12292_p8 }
  0x11   : > { %p12300_p13 = pnand %p12299_p12, %p12293_p9 }
  0x13   : > { %12303 = shalt.err (!%p12300_p13)
}
  0x14   : > { %s12348_s10 = smov 128   ;;  %s12349_s11 = smov 8  }
  0x15   : > { %12249 = dma.hbm_to_vmem [thread:$0]  (!%p12412_p5), %s13722_s4, 5760, %s226_s27, [#allocation4], %s12348_s10, %s12348_s10, %s12349_s11  }
  0x16   : > { %s12315_s14 = scalar_lea.vmem %s239_s30, 11520  ;;  %p12323_p7 = scmp.lt.s32.totalorder %s239_s30, %s239_s30 }
  0x17   : > { %p12316_p0 = scmp.ne.s32.totalorder %s239_s30, %s12315_s14  ;;  %p12324_p8 = scmp.lt.s32.totalorder %s12315_s14, %s12315_s14 }
  0x19   : > { %p12318_p1 = pnand %p12316_p0, %p12280_p6  ;;  %p12325_p10 = por %p12324_p8, %p12323_p7 }
  0x1b   : > { %p12319_p4 = pneg %p12318_p1 }
  0x1d   : > { %p12326_p9 = pnand %p12325_p10, %p12319_p4 }
  0x1f   : > { %12329 = shalt.err (!%p12326_p9)
}
  0x20   : > { %12252 = dma.hbm_to_vmem [thread:$0]  (!%p12412_p5), %s13723_s5, 11520, %s239_s30, [#allocation6], %s12348_s10, %s12348_s10, %s12349_s11  }
  0x21   : > { %272 = sbr.rel (%p12403_p2) target bundleno = 1764 (0x6e4), region = 48 }
  0x26   : > { %12335 = dma.done.wait (%p12253_p3), [#allocation4], 5760  }
  0x27   : > { %12337 = vsyncadd (%p12253_p3), [#allocation4], 4294961536 }
  0x28   : > { %12339 = dma.done.wait (%p12253_p3), [#allocation6], 11520  }
  0x29   : > { %12341 = vsyncadd (%p12253_p3), [#allocation6], 4294955776  ;;  %p311_p6 = scmp.lt.s32.totalorder %s12399_s25, 1  ;;  %v13726_v0 = vmov 0.0   ;;  %vm12351_vm0 = vmmov 0   ;;  %v358_v1 = vld [vmem:[%s13721_s3] sm:$0xff] }
  0x2a   : > { %11401 = vmatprep.subr.mxu0 %v13726_v0  ;;  %11403 = vmatprep.mubr.msk.f32.mxu0 %vm12351_vm0, %v13726_v0  ;;  %v348_v3 = vld [vmem:[%s13719_s1] sm:$0xff]  ;;  %vm350_vm1 = vcmask 64512   ;;  %v454_v5 = vld [vmem:[#allocation3 + $0x8] sm:$0xff]  ;;  %v450_v8 = vld [vmem:[#allocation3] sm:$0xff]  ;;  %vm324_vm2 = vcmask 130048   ;;  %vm327_vm3 = vcmask 123904  }
  0x2b   : > { %s13893_s25 = smov (!%p311_p6, %s12399_s25), 1  ;;  %11402 = vmatpush3.msra.mxu0 %v358_v1  ;;  %11406 = vmatprep.subr.mxu1 %v454_v5  ;;  %v620_v10 = vld [vmem:[#allocation3 + $0x10] sm:$0xff]  ;;  %v794_v14 = vld [vmem:[#allocation3 + $0x20] sm:$0xff]  ;;  %v707_v27 = vld [vmem:[#allocation3 + $0x18] sm:$0xff]  ;;  %325 = vst.msk [vmem:[#allocation2] sm:$0xff] %vm324_vm2, %v13726_v0  ;;  %vm340_vm4 = vcmask 122880  }
  0x2c   : > { %s10518_s17 = sshll.u32 %s13893_s25, 3  ;;  %s12237_s18 = smul.u32 40, %s13893_s25  ;;  %11407 = vmatpush3.msra.mxu1 %v454_v5  ;;  %11411 = vmatprep.subr.mxu0 %v450_v8  ;;  %v968_v17 = vld [vmem:[#allocation3 + $0x30] sm:$0xff]  ;;  %v1142_v22 = vld [vmem:[#allocation3 + $0x40] sm:$0xff]  ;;  %v1237_v28 = vld [vmem:[#allocation3 + $0x48] sm:$0xff]  ;;  %326 = vst.msk [vmem:[#allocation2 + $0x8] sm:$0xff] %vm324_vm2, %v13726_v0 }
  0x2d   : > { %s314_s21 = scalar_lea.vmem %s13718_s0, %s10518_s17  ;;  %11416 = vmatprep.subr.mxu1 %v620_v10  ;;  %v881_v32 = vld [vmem:[#allocation3 + $0x28] sm:$0xff]  ;;  %v1494_v34 = vld [vmem:[#allocation3 + $0x60] sm:$0xff]  ;;  %v1055_v37 = vld [vmem:[#allocation3 + $0x38] sm:$0xff]  ;;  %329 = vst.msk [vmem:[#allocation2 + $0x18] sm:$0xff] %vm324_vm2, %v13726_v0  ;;  %s12352_s8 = smov 8   ;;  %vm441_vm5 = vcmask 130112  }
  0x2e   : > { %s12459_s26 = scalar_lea.vmem %s13720_s2, %s12237_s18  ;;  %v347_v2 = vld [vmem:[%s314_s21] sm:$0xff]  ;;  %v1668_v38 = vld [vmem:[#allocation3 + $0x70] sm:$0xff]  ;;  %v1842_v42 = vld [vmem:[#allocation3 + $0x80] sm:$0xff]  ;;  %330 = vst.msk [vmem:[#allocation2 + $0x20] sm:$0xff] %vm324_vm2, %v13726_v0  ;;  %s10520_s15 = sshll.u32 %s13893_s25, 1 }
  0x2f   : > { %v349_v4 = vmul.f32 %v348_v3, %v347_v2  ;;  %v12468_v6 = vld [vmem:[%s12459_s26 + $0x7] sm:$0xff]  ;;  %v12471_v7 = vld [vmem:[%s12459_s26 + $0xf] sm:$0xff]  ;;  %v1241_v41 = vld [vmem:[#allocation3 + $0x50] sm:$0xff]  ;;  %333 = vst.msk [vmem:[#allocation2 + $0x78] sm:$0xff] %vm324_vm2, %v13726_v0  ;;  %s323_s18 = scalar_lea.vmem %s13725_s7, %s10520_s15 }
  0x30   : > { %11408 = vmatprep.mubr.msk.f32.mxu1 %vm350_vm1, %v12468_v6  ;;  %v12477_v11 = vld [vmem:[%s12459_s26 + $0x8] sm:$0xff]  ;;  %v12484_v13 = vld [vmem:[%s12459_s26 + $0x10] sm:$0xff]  ;;  %v1407_v45 = vld [vmem:[#allocation3 + $0x58] sm:$0xff]  ;;  %334 = vst.msk [vmem:[#allocation2 + $0x80] sm:$0xff] %vm324_vm2, %v13726_v0 }
  0x31   : > { %v351_v9 = vsel %vm350_vm1, %v349_v4, 0.0  ;;  %11409 = vmatmul.mubr.msk.f32.vlgmr.msra.gmra.mxu1 %vm350_vm1, %v12471_v7  ;;  %v12487_v16 = vld [vmem:[%s12459_s26 + $0xa] sm:$0xff]  ;;  %v12494_v19 = vld [vmem:[%s12459_s26 + $0x12] sm:$0xff]  ;;  %v1755_v50 = vld [vmem:[#allocation3 + $0x78] sm:$0xff]  ;;  %336 = vst.msk [vmem:[#allocation2 + $0x90] sm:$0xff] %vm324_vm2, %v13726_v0 }
  0x32   : > { %v352_v12 = vrot.slane %v351_v9, 4  ;;  %11417 = vmatpush3.msra.mxu1 %v620_v10  ;;  %11418 = vmatprep.mubr.msk.f32.mxu1 %vm350_vm1, %v12477_v11  ;;  %v12497_v21 = vld [vmem:[%s12459_s26 + $0xc] sm:$0xff]  ;;  %v12504_v24 = vld [vmem:[%s12459_s26 + $0x14] sm:$0xff]  ;;  %v12530_v33 = vld [vmem:[%s12459_s26 + $0x3] sm:$0xff]  ;;  %337 = vst.msk [vmem:[#allocation2 + $0x98] sm:$0xff] %vm324_vm2, %v13726_v0 }
  0x33   : > { %11426 = vmatprep.subr.mxu1 %v794_v14  ;;  %v12507_v26 = vld [vmem:[%s12459_s26 + $0x6] sm:$0xff]  ;;  %v12515_v29 = vld [vmem:[%s12459_s26 + $0xe] sm:$0xff]  ;;  %v12518_v30 = vld [vmem:[%s12459_s26 + $0x16] sm:$0xff]  ;;  %328 = vst.msk [vmem:[#allocation2 + $0x10] sm:$0x3] %vm327_vm3, %v13726_v0 }
  0x34   : > { %v353_v15 = vadd.f32 %v352_v12, %v351_v9  ;;  %v12521_v31 = vld [vmem:[%s12459_s26 + $0x9] sm:$0xff]  ;;  %v12535_v35 = vld [vmem:[%s12459_s26 + $0x11] sm:$0xff]  ;;  %v2103_v55 = vld [vmem:[#allocation3 + $0x98] sm:$0xff]  ;;  %331 = vst.msk [vmem:[#allocation2 + $0x28] sm:$0x3] %vm327_vm3, %v13726_v0 }
  0x35   : > { %11419 = vmatmul.mubr.msk.f32.vlgmr.msra.gmra.mxu1 %vm350_vm1, %v12484_v13  ;;  %v12538_v36 = vld [vmem:[%s12459_s26 + $0xb] sm:$0xff]  ;;  %v12549_v39 = vld [vmem:[%s12459_s26 + $0x13] sm:$0xff]  ;;  %v2548_v56 = vld [vmem:[%s12459_s26 + $0x1] sm:$0xff]  ;;  %335 = vst.msk [vmem:[#allocation2 + $0x88] sm:$0x3] %vm327_vm3, %v13726_v0 }
  0x36   : > { %v354_v18 = vrot.slane %v353_v15, 2  ;;  %11427 = vmatpush3.msra.mxu1 %v794_v14  ;;  %11428 = vmatprep.mubr.msk.f32.mxu1 %vm350_vm1, %v12487_v16  ;;  %v12552_v40 = vld [vmem:[%s12459_s26 + $0xd] sm:$0xff]  ;;  %v12563_v43 = vld [vmem:[%s12459_s26 + $0x15] sm:$0xff]  ;;  %v12566_v44 = vld [vmem:[%s12459_s26 + $0x4] sm:$0xff]  ;;  %338 = vst.msk [vmem:[#allocation2 + $0xa0] sm:$0x3] %vm327_vm3, %v13726_v0 }
  0x37   : > { %11436 = vmatprep.subr.mxu1 %v968_v17  ;;  %v2016_v46 = vld [vmem:[#allocation3 + $0x90] sm:$0xff]  ;;  %v12577_v47 = vld [vmem:[%s12459_s26 + $0x5] sm:$0xff]  ;;  %v1581_v48 = vld [vmem:[#allocation3 + $0x68] sm:$0xff]  ;;  %341 = vst.msk [vmem:[#allocation2 + $0x30] sm:$0x1] %vm340_vm4, %v13726_v0 }
  0x38   : > { %v355_v20 = vadd.f32 %v354_v18, %v353_v15  ;;  %v2190_v49 = vld [vmem:[#allocation3 + $0xa0] sm:$0xff]  ;;  %v2364_v51 = vld [vmem:[#allocation3 + $0xb0] sm:$0xff]  ;;  %v1929_v52 = vld [vmem:[#allocation3 + $0x88] sm:$0xff]  ;;  %342 = vst.msk [vmem:[#allocation2 + $0x48] sm:$0x1] %vm340_vm4, %v13726_v0 }
  0x39   : > { %11429 = vmatmul.mubr.msk.f32.vlgmr.msra.gmra.mxu1 %vm350_vm1, %v12494_v19  ;;  %v2551_v53 = vld [vmem:[#allocation3 + $0xc8] sm:$0xff]  ;;  %v12604_v54 = vld [vmem:[%s12459_s26 + $0x18] sm:$0xff]  ;;  %v2714_v59 = vld [vmem:[%s12459_s26 + $0x2] sm:$0xff]  ;;  %343 = vst.msk [vmem:[#allocation2 + $0x60] sm:$0x1] %vm340_vm4, %v13726_v0 }
  0x3a   : > { %v356_v23 = vrot.slane %v355_v20, 1  ;;  %11437 = vmatpush3.msra.mxu1 %v968_v17  ;;  %11438 = vmatprep.mubr.msk.f32.mxu1 %vm350_vm1, %v12497_v21  ;;  %v2717_v57 = vld [vmem:[#allocation3 + $0xd0] sm:$0xff]  ;;  %v2277_v58 = vld [vmem:[#allocation3 + $0xa8] sm:$0xff]  ;;  %v2891_v60 = vld [vmem:[#allocation3 + $0xe0] sm:$0xff]  ;;  %344 = vst.msk [vmem:[#allocation2 + $0x41] sm:$0x1] %vm340_vm4, %v13726_v0 }
  0x3b   : > { %11446 = vmatprep.subr.mxu1 %v1142_v22  ;;  %v2451_v61 = vld [vmem:[#allocation3 + $0xb8] sm:$0xff]  ;;  %v3065_v62 = vld [vmem:[#allocation3 + $0xf0] sm:$0xff]  ;;  %v2547_v1 = vld [vmem:[#allocation3 + $0xc0] sm:$0xff]  ;;  %345 = vst.msk [vmem:[#allocation2 + $0x59] sm:$0x1] %vm340_vm4, %v13726_v0 }
  0x3c   : > { %v357_v25 = vadd.f32 %v356_v23, %v355_v20  ;;  %v12631_v63 = vld [vmem:[%s12459_s26 + $0x17] sm:$0xff]  ;;  %v3239_v2 = vld [vmem:[#allocation3 + $0x100] sm:$0xff]  ;;  %v2544_v4 = vld [vmem:[%s12459_s26] sm:$0xff]  ;;  %346 = vst.msk [vmem:[#allocation2 + $0x71] sm:$0x1] %vm340_vm4, %v13726_v0 }
  0x3d   : > { %11439 = vmatmul.mubr.msk.f32.vlgmr.msra.gmra.mxu1 %vm350_vm1, %v12504_v24  ;;  %v12642_v3 = vld [vmem:[%s12459_s26 + $0x19] sm:$0xff]  ;;  %v2978_v9 = vld [vmem:[#allocation3 + $0xe8] sm:$0xff]  ;;  %v3587_v10 = vld [vmem:[#allocation3 + $0x120] sm:$0xff] }
  0x3e   : > { %11404 = vmatmul.mubr.msk.f32.vlgmr.msra.gmra.mxu0 %vm350_vm1, %v357_v25  ;;  %11447 = vmatpush3.msra.mxu1 %v1142_v22  ;;  %v2804_v5 = vld [vmem:[#allocation3 + $0xd8] sm:$0xff]  ;;  %v3326_v14 = vld [vmem:[#allocation3 + $0x108] sm:$0xff]  ;;  %v3935_v15 = vld [vmem:[#allocation3 + $0x140] sm:$0xff] }
  0x3f   : > { %11412 = vmatpush3.msra.mxu0 %v450_v8  ;;  %11413 = vmatprep.mubr.msk.f32.mxu0 %vm350_vm1, %v12507_v26  ;;  %v3413_v8 = vld [vmem:[#allocation3 + $0x110] sm:$0xff]  ;;  %v3152_v12 = vld [vmem:[#allocation3 + $0xf8] sm:$0xff]  ;;  %v4283_v18 = vld [vmem:[#allocation3 + $0x160] sm:$0xff] }
  0x40   : > { %11421 = vmatprep.subr.mxu0 %v707_v27  ;;  %11448 = vmatprep.mubr.msk.f32.mxu1 %vm350_vm1, %v12515_v29  ;;  %v4109_v17 = vld [vmem:[#allocation3 + $0x150] sm:$0xff]  ;;  %v4022_v22 = vld [vmem:[#allocation3 + $0x148] sm:$0xff]  ;;  %v4391_v25 = vld [vmem:[#allocation5 + $0x10] sm:$0xff] }
  0x41   : > { %11456 = vmatprep.subr.mxu1 %v1237_v28  ;;  %11449 = vmatmul.mubr.msk.f32.vlgmr.msra.gmra.mxu1 %vm350_vm1, %v12518_v30  ;;  %v4107_v20 = vld [vmem:[%s12459_s26 + $0x1a] sm:$0xff] }
  0x42   : > { %11414 = vmatmul.mubr.msk.f32.vlgmr.msra.gmra.mxu0 %vm350_vm1, %v12515_v29  ;;  %11457 = vmatpush3.msra.mxu1 %v1237_v28  ;;  %v4194_v23 = vld [vmem:[%s12459_s26 + $0x1b] sm:$0xff] }
  0x43   : > { %11422 = vmatpush3.msra.mxu0 %v707_v27  ;;  %11423 = vmatprep.mubr.msk.f32.mxu0 %vm350_vm1, %v12521_v31 }
  0x44   : > { %11431 = vmatprep.subr.mxu0 %v881_v32  ;;  %11458 = vmatprep.mubr.msk.f32.mxu1 %vm350_vm1, %v12530_v33 }
  0x45   : > { %11466 = vmatprep.subr.mxu1 %v1494_v34  ;;  %11459 = vmatmul.mubr.msk.f32.vlgmr.msra.gmra.mxu1 %vm350_vm1, %v12538_v36 }
  0x46   : > { %11424 = vmatmul.mubr.msk.f32.vlgmr.msra.gmra.mxu0 %vm350_vm1, %v12535_v35  ;;  %11467 = vmatpush3.msra.mxu1 %v1494_v34 }
  0x47   : > { %11432 = vmatpush3.msra.mxu0 %v881_v32  ;;  %11433 = vmatprep.mubr.msk.f32.mxu0 %vm350_vm1, %v12538_v36  ;;  %v4385_v32 = vld [vmem:[#allocation2 + $0x9] sm:$0xff] }
  0x48   : > { %11441 = vmatprep.subr.mxu0 %v1055_v37  ;;  %11468 = vmatprep.mubr.msk.f32.mxu1 %vm350_vm1, %v12507_v26 }
  0x49   : > { %11476 = vmatprep.subr.mxu1 %v1668_v38  ;;  %11469 = vmatmul.mubr.msk.f32.vlgmr.msra.gmra.mxu1 %vm350_vm1, %v12515_v29 }
  0x4a   : > { %11434 = vmatmul.mubr.msk.f32.vlgmr.msra.gmra.mxu0 %vm350_vm1, %v12549_v39  ;;  %11477 = vmatpush3.msra.mxu1 %v1668_v38 }
  0x4b   : > { %11442 = vmatpush3.msra.mxu0 %v1055_v37  ;;  %11443 = vmatprep.mubr.msk.f32.mxu0 %vm350_vm1, %v12552_v40  ;;  %v12752_v37 = vld [vmem:[#allocation2 + $0x21] sm:$0xff] }
  0x4c   : > { %11451 = vmatprep.subr.mxu0 %v1241_v41  ;;  %11478 = vmatprep.mubr.msk.f32.mxu1 %vm350_vm1, %v12477_v11  ;;  %13786 = vst [vmem:[#allocation11_spill] sm:$0xff] %v12752_v37 }
  0x4d   : > { %11486 = vmatprep.subr.mxu1 %v1842_v42  ;;  %11479 = vmatmul.mubr.msk.f32.vlgmr.msra.gmra.mxu1 %vm350_vm1, %v12484_v13 }
  0x4e   : > { %11444 = vmatmul.mubr.msk.f32.vlgmr.msra.gmra.mxu0 %vm350_vm1, %v12563_v43  ;;  %11487 = vmatpush3.msra.mxu1 %v1842_v42 }
  0x4f   : > { %11452 = vmatpush3.msra.mxu0 %v1241_v41  ;;  %11453 = vmatprep.mubr.msk.f32.mxu0 %vm350_vm1, %v12566_v44 }
  0x50   : > { %11461 = vmatprep.subr.mxu0 %v1407_v45  ;;  %11488 = vmatprep.mubr.msk.f32.mxu1 %vm350_vm1, %v12487_v16 }
  0x51   : > { %11496 = vmatprep.subr.mxu1 %v2016_v46  ;;  %11489 = vmatmul.mubr.msk.f32.vlgmr.msra.gmra.mxu1 %vm350_vm1, %v12494_v19 }
  0x52   : > { %11454 = vmatmul.mubr.msk.f32.vlgmr.msra.gmra.mxu0 %vm350_vm1, %v12497_v21  ;;  %11497 = vmatpush3.msra.mxu1 %v2016_v46 }
  0x53   : > { %11462 = vmatpush3.msra.mxu0 %v1407_v45  ;;  %11463 = vmatprep.mubr.msk.f32.mxu0 %vm350_vm1, %v12577_v47 }
  0x54   : > { %11471 = vmatprep.subr.mxu0 %v1581_v48  ;;  %11498 = vmatprep.mubr.msk.f32.mxu1 %vm350_vm1, %v12497_v21 }
  0x55   : > { %11506 = vmatprep.subr.mxu1 %v2190_v49  ;;  %11499 = vmatmul.mubr.msk.f32.vlgmr.msra.gmra.mxu1 %vm350_vm1, %v12504_v24 }
  0x56   : > { %11464 = vmatmul.mubr.msk.f32.vlgmr.msra.gmra.mxu0 %vm350_vm1, %v12552_v40  ;;  %11507 = vmatpush3.msra.mxu1 %v2190_v49 }
  0x57   : > { %11472 = vmatpush3.msra.mxu0 %v1581_v48  ;;  %11473 = vmatprep.mubr.msk.f32.mxu0 %vm350_vm1, %v12468_v6 }
  0x58   : > { %11481 = vmatprep.subr.mxu0 %v1755_v50  ;;  %11508 = vmatprep.mubr.msk.f32.mxu1 %vm350_vm1, %v12515_v29 }
  0x59   : > { %11516 = vmatprep.subr.mxu1 %v2364_v51  ;;  %11509 = vmatmul.mubr.msk.f32.vlgmr.msra.gmra.mxu1 %vm350_vm1, %v12518_v30 }
  0x5a   : > { %11474 = vmatmul.mubr.msk.f32.vlgmr.msra.gmra.mxu0 %vm350_vm1, %v12471_v7  ;;  %11517 = vmatpush3.msra.mxu1 %v2364_v51  ;;  %v4626_v51 = vld [vmem:[#allocation5 + $0x20] sm:$0xff] }
  0x5b   : > { %11482 = vmatpush3.msra.mxu0 %v1755_v50  ;;  %11483 = vmatprep.mubr.msk.f32.mxu0 %vm350_vm1, %v12521_v31  ;;  %v4756_v50 = vld [vmem:[#allocation5 + $0x38] sm:$0xff] }
  0x5c   : > { %11491 = vmatprep.subr.mxu0 %v1929_v52  ;;  %11518 = vmatprep.mubr.msk.f32.mxu1 %vm350_vm1, %v12484_v13 }
  0x5d   : > { %11526 = vmatprep.subr.mxu1 %v2551_v53  ;;  %11519 = vmatmul.mubr.msk.f32.vlgmr.msra.gmra.mxu1 %vm350_vm1, %v12604_v54 }
  0x5e   : > { %11484 = vmatmul.mubr.msk.f32.vlgmr.msra.gmra.mxu0 %vm350_vm1, %v12535_v35  ;;  %11527 = vmatpush3.msra.mxu1 %v2551_v53 }
  0x5f   : > { %11492 = vmatpush3.msra.mxu0 %v1929_v52  ;;  %11493 = vmatprep.mubr.msk.f32.mxu0 %vm350_vm1, %v12538_v36  ;;  %v4755_v52 = vld [vmem:[#allocation5 + $0x30] sm:$0xff] }
  0x60   : > { %11501 = vmatprep.subr.mxu0 %v2103_v55  ;;  %11528 = vmatprep.mubr.msk.f32.mxu1 %vm350_vm1, %v2548_v56 }
  0x61   : > { %11536 = vmatprep.subr.mxu1 %v2717_v57  ;;  %11529 = vmatmul.mubr.msk.f32.vlgmr.msra.gmra.mxu1 %vm350_vm1, %v12521_v31 }
  0x62   : > { %11494 = vmatmul.mubr.msk.f32.vlgmr.msra.gmra.mxu0 %vm350_vm1, %v12549_v39  ;;  %11537 = vmatpush3.msra.mxu1 %v2717_v57 }
  0x63   : > { %11502 = vmatpush3.msra.mxu0 %v2103_v55  ;;  %11503 = vmatprep.mubr.msk.f32.mxu0 %vm350_vm1, %v12552_v40 }
  0x64   : > { %11511 = vmatprep.subr.mxu0 %v2277_v58  ;;  %11538 = vmatprep.mubr.msk.f32.mxu1 %vm350_vm1, %v2714_v59 }
  0x65   : > { %11546 = vmatprep.subr.mxu1 %v2891_v60  ;;  %11539 = vmatmul.mubr.msk.f32.vlgmr.msra.gmra.mxu1 %vm350_vm1, %v12487_v16 }
  0x66   : > { %11504 = vmatmul.mubr.msk.f32.vlgmr.msra.gmra.mxu0 %vm350_vm1, %v12563_v43  ;;  %11547 = vmatpush3.msra.mxu1 %v2891_v60  ;;  %v12780_v60 = vld [vmem:[#allocation5 + $0x48] sm:$0xff] }
  0x67   : > { %11512 = vmatpush3.msra.mxu0 %v2277_v58  ;;  %11513 = vmatprep.mubr.msk.f32.mxu0 %vm350_vm1, %v12471_v7  ;;  %13789 = vst [vmem:[#allocation14_spill] sm:$0xff] %v12780_v60 }
  0x68   : > { %11521 = vmatprep.subr.mxu0 %v2451_v61  ;;  %11548 = vmatprep.mubr.msk.f32.mxu1 %vm350_vm1, %v12566_v44 }
  0x69   : > { %11556 = vmatprep.subr.mxu1 %v3065_v62  ;;  %11549 = vmatmul.mubr.msk.f32.vlgmr.msra.gmra.mxu1 %vm350_vm1, %v12497_v21 }
  0x6a   : > { %11514 = vmatmul.mubr.msk.f32.vlgmr.msra.gmra.mxu0 %vm350_vm1, %v12631_v63  ;;  %11557 = vmatpush3.msra.mxu1 %v3065_v62 }
  0x6b   : > { %11522 = vmatpush3.msra.mxu0 %v2451_v61  ;;  %11523 = vmatprep.mubr.msk.f32.mxu0 %vm350_vm1, %v12535_v35 }
  0x6c   : > { %11531 = vmatprep.subr.mxu0 %v2547_v1  ;;  %11558 = vmatprep.mubr.msk.f32.mxu1 %vm350_vm1, %v12507_v26  ;;  %v4382_v26 = vld [vmem:[#allocation5] sm:$0xff] }
  0x6d   : > { %11566 = vmatprep.subr.mxu1 %v3239_v2  ;;  %11559 = vmatmul.mubr.msk.f32.vlgmr.msra.gmra.mxu1 %vm350_vm1, %v12515_v29 }
  0x6e   : > { %11524 = vmatmul.mubr.msk.f32.vlgmr.msra.gmra.mxu0 %vm350_vm1, %v12642_v3  ;;  %11567 = vmatpush3.msra.mxu1 %v3239_v2 }
  0x6f   : > { %11532 = vmatpush3.msra.mxu0 %v2547_v1  ;;  %11533 = vmatprep.mubr.msk.f32.mxu0 %vm350_vm1, %v2544_v4 }
  0x70   : > { %11541 = vmatprep.subr.mxu0 %v2804_v5  ;;  %11568 = vmatprep.mubr.msk.f32.mxu1 %vm350_vm1, %v12477_v11 }
  0x71   : > { %11576 = vmatprep.subr.mxu1 %v3413_v8  ;;  %11569 = vmatmul.mubr.msk.f32.vlgmr.msra.gmra.mxu1 %vm350_vm1, %v12484_v13 }
  0x72   : > { %11534 = vmatmul.mubr.msk.f32.vlgmr.msra.gmra.mxu0 %vm350_vm1, %v12477_v11  ;;  %11577 = vmatpush3.msra.mxu1 %v3413_v8  ;;  %v3761_v11 = vld [vmem:[#allocation3 + $0x130] sm:$0xff] }
  0x73   : > { %11542 = vmatpush3.msra.mxu0 %v2804_v5  ;;  %11543 = vmatprep.mubr.msk.f32.mxu0 %vm350_vm1, %v12530_v33  ;;  %v4377_v33 = vld [vmem:[#allocation2 + $0x8] sm:$0xff] }
  0x74   : > { %11551 = vmatprep.subr.mxu0 %v2978_v9  ;;  %11578 = vmatprep.mubr.msk.f32.mxu1 %vm350_vm1, %v12487_v16  ;;  %v3500_v16 = vld [vmem:[#allocation3 + $0x118] sm:$0xff] }
  0x75   : > { %11586 = vmatprep.subr.mxu1 %v3587_v10  ;;  %11579 = vmatmul.mubr.msk.f32.vlgmr.msra.gmra.mxu1 %vm350_vm1, %v12494_v19 }
  0x76   : > { %11544 = vmatmul.mubr.msk.f32.vlgmr.msra.gmra.mxu0 %vm350_vm1, %v12538_v36  ;;  %11587 = vmatpush3.msra.mxu1 %v3587_v10 }
  0x77   : > { %11552 = vmatpush3.msra.mxu0 %v2978_v9  ;;  %11553 = vmatprep.mubr.msk.f32.mxu0 %vm350_vm1, %v12577_v47 }
  0x78   : > { %11561 = vmatprep.subr.mxu0 %v3152_v12  ;;  %11588 = vmatprep.mubr.msk.f32.mxu1 %vm350_vm1, %v12497_v21  ;;  %v3848_v21 = vld [vmem:[#allocation3 + $0x138] sm:$0xff] }
  0x79   : > { %11596 = vmatprep.subr.mxu1 %v3761_v11  ;;  %11589 = vmatmul.mubr.msk.f32.vlgmr.msra.gmra.mxu1 %vm350_vm1, %v12504_v24 }
  0x7a   : > { %11554 = vmatmul.mubr.msk.f32.vlgmr.msra.gmra.mxu0 %vm350_vm1, %v12552_v40  ;;  %11597 = vmatpush3.msra.mxu1 %v3761_v11 }
  0x7b   : > { %11562 = vmatpush3.msra.mxu0 %v3152_v12  ;;  %11563 = vmatprep.mubr.msk.f32.mxu0 %vm350_vm1, %v12468_v6  ;;  %v3674_v6 = vld [vmem:[#allocation3 + $0x128] sm:$0xff]  ;;  %v12793_v12 = vld [vmem:[#allocation5 + $0x58] sm:$0xff] }
  0x7c   : > { %11571 = vmatprep.subr.mxu0 %v3326_v14  ;;  %11598 = vmatprep.mubr.msk.f32.mxu1 %vm350_vm1, %v12515_v29  ;;  %v4384_v29 = vld [vmem:[#allocation2 + $0x1] sm:$0xff]  ;;  %13790 = vst [vmem:[#allocation15_spill] sm:$0xff] %v12793_v12 }
  0x7d   : > { %11606 = vmatprep.subr.mxu1 %v3935_v15  ;;  %11599 = vmatmul.mubr.msk.f32.vlgmr.msra.gmra.mxu1 %vm350_vm1, %v12518_v30  ;;  %v4376_v30 = vld [vmem:[#allocation2] sm:$0xff] }
  0x7e   : > { %11564 = vmatmul.mubr.msk.f32.vlgmr.msra.gmra.mxu0 %vm350_vm1, %v12471_v7  ;;  %11607 = vmatpush3.msra.mxu1 %v3935_v15 }
  0x7f   : > { %11572 = vmatpush3.msra.mxu0 %v3326_v14  ;;  %11573 = vmatprep.mubr.msk.f32.mxu0 %vm350_vm1, %v12521_v31  ;;  %v433_v31 = vlaneseq }
  0x80   : > { %11581 = vmatprep.subr.mxu0 %v3500_v16  ;;  %11608 = vmatprep.mubr.msk.f32.mxu1 %vm350_vm1, %v12484_v13  ;;  %v4281_v13 = vld [vmem:[%s12459_s26 + $0x1c] sm:$0xff] }
  0x81   : > { %11616 = vmatprep.subr.mxu1 %v4109_v17  ;;  %11609 = vmatmul.mubr.msk.f32.vlgmr.msra.gmra.mxu1 %vm350_vm1, %v12604_v54  ;;  %v434_v41 = vshrl.u32 %v433_v31, 7 }
  0x82   : > { %11574 = vmatmul.mubr.msk.f32.vlgmr.msra.gmra.mxu0 %vm350_vm1, %v12535_v35  ;;  %11617 = vmatpush3.msra.mxu1 %v4109_v17 }
  0x83   : > { %11582 = vmatpush3.msra.mxu0 %v3500_v16  ;;  %11583 = vmatprep.mubr.msk.f32.mxu0 %vm350_vm1, %v12538_v36  ;;  %v12750_v36 = vld [vmem:[#allocation2 + $0x18] sm:$0xff]  ;;  %v435_v44 = vsub.s32 0, %v434_v41 }
  0x84   : > { %11591 = vmatprep.subr.mxu0 %v3674_v6  ;;  %11618 = vmatprep.mubr.msk.f32.mxu1 %vm350_vm1, %v12494_v19  ;;  %v4196_v19 = vld [vmem:[#allocation3 + $0x158] sm:$0xff]  ;;  %13785 = vst [vmem:[#allocation10_spill] sm:$0xff] %v12750_v36 }
  0x85   : > { %11626 = vmatprep.subr.mxu1 %v4283_v18  ;;  %11619 = vmatmul.mubr.msk.f32.vlgmr.msra.gmra.mxu1 %vm350_vm1, %v4107_v20 }
  0x86   : > { %11584 = vmatmul.mubr.msk.f32.vlgmr.msra.gmra.mxu0 %vm350_vm1, %v12549_v39  ;;  %11627 = vmatpush3.msra.mxu1 %v4283_v18 }
  0x87   : > { %11592 = vmatpush3.msra.mxu0 %v3674_v6  ;;  %11593 = vmatprep.mubr.msk.f32.mxu0 %vm350_vm1, %v12552_v40  ;;  %v4627_v40 = vld [vmem:[#allocation5 + $0x28] sm:$0xff] }
  0x88   : > { %11601 = vmatprep.subr.mxu0 %v3848_v21  ;;  %11628 = vmatprep.mubr.msk.f32.mxu1 %vm350_vm1, %v12504_v24  ;;  %v4383_v24 = vld [vmem:[#allocation5 + $0x8] sm:$0xff] }
  0x89   : > { %11629 = vmatmul.mubr.msk.f32.vlgmr.msra.gmra.mxu1 %vm350_vm1, %v4281_v13  ;;  %11644 = vmatprep.subr.mxu1 %v4383_v24 }
  0x8a   : > { %11594 = vmatmul.mubr.msk.f32.vlgmr.msra.gmra.mxu0 %vm350_vm1, %v12563_v43  ;;  %11645 = vmatpush3.msra.mxu1 %v4383_v24 }
  0x8b   : > { %11602 = vmatpush3.msra.mxu0 %v3848_v21  ;;  %11603 = vmatprep.mubr.msk.f32.mxu0 %vm350_vm1, %v12471_v7  ;;  %v4392_v7 = vld [vmem:[#allocation5 + $0x18] sm:$0xff] }
  0x8c   : > { %11611 = vmatprep.subr.mxu0 %v4022_v22  ;;  %11646 = vmatprep.subr.mxu1 %v4382_v26 }
  0x8d   : > { %11647 = vmatpush3.msra.mxu1 %v4382_v26  ;;  %11648 = vmatprep.mubr.msk.f32.mxu1 %vm324_vm2, %v4376_v30 }
  0x8e   : > { %11604 = vmatmul.mubr.msk.f32.vlgmr.msra.gmra.mxu0 %vm350_vm1, %v12631_v63  ;;  %11649 = vmatmul.mubr.msk.f32.vlgmr.msra.gmra.mxu1 %vm324_vm2, %v4377_v33 }
  0x8f   : > { %11612 = vmatpush3.msra.mxu0 %v4022_v22  ;;  %11613 = vmatprep.mubr.msk.f32.mxu0 %vm350_vm1, %v12535_v35  ;;  %v12748_v35 = vld [vmem:[#allocation2 + $0x19] sm:$0xff] }
  0x90   : > { %11621 = vmatprep.subr.mxu0 %v4196_v19  ;;  %13784 = vst [vmem:[#allocation9_spill] sm:$0xff] %v12748_v35  ;;  %11651 = vmatprep.mubr.msk.f32.mxu1 %vm324_vm2, %v12750_v36 }
  0x91   : > { %11670 = vmatprep.subr.mxu1 %v4756_v50 }
  0x92   : > { %11614 = vmatmul.mubr.msk.f32.vlgmr.msra.gmra.mxu0 %vm350_vm1, %v12642_v3  ;;  %11671 = vmatpush3.msra.mxu1 %v4756_v50 }
  0x93   : > { %11622 = vmatpush3.msra.mxu0 %v4196_v19  ;;  %11623 = vmatprep.mubr.msk.f32.mxu0 %vm350_vm1, %v12549_v39  ;;  %v12766_v39 = vld [vmem:[#allocation2 + $0x20] sm:$0xff] }
  0x94   : > { %11631 = vmatprep.subr.mxu0 %v4392_v7  ;;  %13787 = vst [vmem:[#allocation12_spill] sm:$0xff] %v12766_v39  ;;  %11652 = vmatmul.mubr.msk.f32.gmra.mxu1 %vm324_vm2, %v12766_v39 }
  0x95   : > { %11672 = vmatprep.subr.mxu1 %v4755_v52 }
  0x96   : > { %11624 = vmatmul.mubr.msk.f32.vlgmr.msra.gmra.mxu0 %vm350_vm1, %v4194_v23  ;;  %11673 = vmatpush3.msra.mxu1 %v4755_v52 }
  0x97   : > { %11632 = vmatpush3.msra.mxu0 %v4392_v7  ;;  %11635 = vmatprep.mubr.msk.f32.mxu0 %vm324_vm2, %v4384_v29 }
  0x98   : > { %11633 = vmatprep.subr.mxu0 %v4391_v25  ;;  %11696 = vmatprep.subr.mxu1 %v12793_v12 }
  0x99   : > { %11634 = vmatpush3.msra.mxu0 %v4391_v25 }
  0x9a   : > { %11636 = vmatmul.mubr.msk.f32.vlgmr.msra.gmra.mxu0 %vm324_vm2, %v4385_v32  ;;  %11657 = vmatprep.subr.mxu0 %v4627_v40 }
  0x9b   : > { %11638 = vmatprep.mubr.msk.f32.mxu0 %vm324_vm2, %v12748_v35  ;;  %11658 = vmatpush3.msra.mxu0 %v4627_v40 }
  0x9c   : > { %11659 = vmatprep.subr.mxu0 %v4626_v51 }
  0x9d   : > { %11660 = vmatpush3.msra.mxu0 %v4626_v51 }
  0x9e   : > { %11639 = vmatmul.mubr.msk.f32.gmra.mxu0 %vm324_vm2, %v12752_v37  ;;  %11683 = vmatprep.subr.mxu0 %v12780_v60 }
  0xf1   : > { %v11410_v27 = vpop.f32.mrf.mxu1 }
  0xf3   : > { %v12742_v28 = vpop.f32.mrf.mxu1 }
  0xf5   : > { %v11420_v34 = vpop.f32.mrf.mxu1 }
  0xf7   : > { %v12760_v38 = vpop.f32.mrf.mxu1 }
  0xf9   : > { %v11430_v42 = vpop.f32.mrf.mxu1 }
  0xfb   : > { %v12772_v43 = vpop.f32.mrf.mxu1 }
  0xfd   : > { %v11440_v46 = vpop.f32.mrf.mxu1 }
  0xfe   : > { %v428_v45 = vpop.f32.mrf.mxu0 }
  0xff   : > { %v432_v47 = vmax.f32 %v428_v45, 0.0  ;;  %v12774_v49 = vpop.f32.mrf.mxu1 }
 0x100   : > { %v11405_v48 = vpop.f32.mrf.mxu0 }
 0x101   : > { %v436_v53 = vrot.slane %v432_v47, %v435_v44  ;;  %v11450_v55 = vpop.f32.mrf.mxu1 }
 0x102   : > { %v11415_v54 = vpop.f32.mrf.mxu0 }
 0x103   : > { %438 = vrot.lane.b32.xlu0 %v436_v53, %s12352_s8  ;;  %v614_v56 = vadd.f32 %v11415_v54, %v11410_v27  ;;  %v12778_v58 = vpop.f32.mrf.mxu1 }
 0x104   : > { %v12776_v57 = vpop.f32.mrf.mxu0  ;;  %13788 = vst [vmem:[#allocation13_spill] sm:$0xff] %v12778_v58 }
 0x105   : > { %v703_v59 = vadd.f32 %v11420_v34, %v614_v56  ;;  %v12782_v62 = vpop.f32.mrf.mxu1 }
 0x106   : > { %v11425_v61 = vpop.f32.mrf.mxu0 }
 0x107   : > { %v790_v63 = vadd.f32 %v11425_v61, %v703_v59  ;;  %v1395_v2 = vpop.f32.mrf.mxu1 }
 0x108   : > { %v12785_v1 = vpop.f32.mrf.mxu0 }
 0x109   : > { %v877_v3 = vadd.f32 %v11430_v42, %v790_v63  ;;  %v12787_v5 = vpop.f32.mrf.mxu1 }
 0x10a   : > { %v11435_v4 = vpop.f32.mrf.mxu0 }
 0x10b   : > { %v964_v8 = vadd.f32 %v11435_v4, %v877_v3  ;;  %v12791_v10 = vpop.f32.mrf.mxu1 }
 0x10c   : > { %v12789_v9 = vpop.f32.mrf.mxu0 }
 0x10d   : > { %v1051_v11 = vadd.f32 %v11440_v46, %v964_v8  ;;  %v12796_v15 = vpop.f32.mrf.mxu1 }
 0x10e   : > { %v11445_v14 = vpop.f32.mrf.mxu0 }
 0x10f   : > { %v1138_v16 = vadd.f32 %v11445_v14, %v1051_v11  ;;  %v12800_v6 = vpop.f32.mrf.mxu1 }
 0x110   : > { %v12798_v17 = vpop.f32.mrf.mxu0 }
 0x111   : > { %v12802_v18 = vadd.f32 %v11450_v55, %v1138_v16  ;;  %v12804_v21 = vpop.f32.mrf.mxu1 }
 0x112   : > { %v11455_v20 = vpop.f32.mrf.mxu0 }
 0x113   : > { %13791 = vst [vmem:[#allocation16_spill] sm:$0xff] %v12802_v18  ;;  %v12806_v22 = vpop.f32.mrf.mxu1  ;;  %v1401_v60 = vadd.f32 %v12782_v62, %v11455_v20 }
 0x114   : > { %v1314_v13 = vpop.f32.mrf.mxu0 }
 0x115   : > { %v12808_v23 = vpop.f32.mrf.mxu1  ;;  %v1396_v39 = vadd.f32 %v1395_v2, %v1314_v13 }
 0x116   : > { %v11465_v19 = vpop.f32.mrf.mxu0 }
 0x117   : > { %v12810_v24 = vpop.f32.mrf.mxu1 }
 0x118   : > { %v1480_v7 = vpop.f32.mrf.mxu0 }
 0x119   : > { %v12814_v26 = vpop.f32.mrf.mxu1 }
 0x11a   : > { %v12812_v25 = vpop.f32.mrf.mxu0 }
 0x11b   : > { %v12818_v29 = vpop.f32.mrf.mxu1 }
 0x11c   : > { %v12816_v27 = vpop.f32.mrf.mxu0 }
 0x11d   : > { %v12822_v31 = vpop.f32.mrf.mxu1 }
 0x11e   : > { %v12820_v30 = vpop.f32.mrf.mxu0 }
 0x11f   : > { %v12826_v33 = vpop.f32.mrf.mxu1 }
 0x120   : > { %v12824_v32 = vpop.f32.mrf.mxu0 }
 0x121   : > { %v11530_v40 = vpop.f32.mrf.mxu1 }
 0x122   : > { %v12828_v34 = vpop.f32.mrf.mxu0 }
 0x123   : > { %v2624_v42 = vpop.f32.mrf.mxu1 }
 0x124   : > { %v12830_v41 = vpop.f32.mrf.mxu0 }
 0x125   : > { %v11540_v45 = vpop.f32.mrf.mxu1 }
 0x126   : > { %v12832_v44 = vpop.f32.mrf.mxu0 }
 0x127   : > { %v2790_v47 = vpop.f32.mrf.mxu1 }
 0x128   : > { %v12834_v46 = vpop.f32.mrf.mxu0 }
 0x129   : > { %v11550_v50 = vpop.f32.mrf.mxu1 }
 0x12a   : > { %v12836_v48 = vpop.f32.mrf.mxu0 }
 0x12b   : > { %v2964_v52 = vpop.f32.mrf.mxu1 }
 0x12c   : > { %v12838_v51 = vpop.f32.mrf.mxu0 }
 0x12d   : > { %v11560_v54 = vpop.f32.mrf.mxu1 }
 0x12e   : > { %v12840_v53 = vpop.f32.mrf.mxu0 }
 0x12f   : > { %13792 = vst [vmem:[#allocation17_spill] sm:$0xff] %v12840_v53  ;;  %v3138_v56 = vpop.f32.mrf.mxu1 }
 0x130   : > { %v12842_v55 = vpop.f32.mrf.mxu0 }
 0x131   : > { %13793 = vst [vmem:[#allocation18_spill] sm:$0xff] %v12842_v55  ;;  %v11570_v8 = vpop.f32.mrf.mxu1 }
 0x132   : > { %v11535_v59 = vpop.f32.mrf.mxu0 }
 0x133   : > { %v2711_v61 = vadd.f32 %v11535_v59, %v11530_v40  ;;  %v3312_v12 = vpop.f32.mrf.mxu1 }
 0x134   : > { %v2705_v63 = vpop.f32.mrf.mxu0 }
 0x135   : > { %v2706_v3 = vadd.f32 %v2705_v63, %v2624_v42  ;;  %v2800_v4 = vadd.f32 %v11540_v45, %v2711_v61  ;;  %v11580_v59 = vpop.f32.mrf.mxu1  ;;  %v1490_v42 = vadd.f32 %v11465_v19, %v1401_v60  ;;  %v1489_v45 = vadd.f32 %v1480_v7, %v1396_v39 }
 0x136   : > { %v11545_v11 = vpop.f32.mrf.mxu0 }
 0x137   : > { %v2799_v14 = vadd.f32 %v2790_v47, %v2706_v3  ;;  %v2887_v16 = vadd.f32 %v11545_v11, %v2800_v4  ;;  %v1577_v11 = vadd.f32 %v12787_v5, %v1490_v42  ;;  %v1576_v62 = vadd.f32 %v12791_v10, %v1489_v45 }
 0x138   : > { %v2877_v0 = vpop.f32.mrf.mxu0  ;;  %v609_v45 = vadd.f32 %v12776_v57, %v12742_v28 }
 0x139   : > { %v2886_v37 = vadd.f32 %v2877_v0, %v2799_v14  ;;  %v2974_v35 = vadd.f32 %v11550_v50, %v2887_v16  ;;  %v3486_v50 = vpop.f32.mrf.mxu1  ;;  %v1664_v39 = vadd.f32 %v12812_v25, %v1577_v11 }
 0x13a   : > { %v11555_v36 = vpop.f32.mrf.mxu0 }
 0x13b   : > { %v2973_v18 = vadd.f32 %v2964_v52, %v2886_v37  ;;  %v3061_v55 = vadd.f32 %v11555_v36, %v2974_v35  ;;  %v11590_v13 = vpop.f32.mrf.mxu1  ;;  %v1751_v5 = vadd.f32 %v12796_v15, %v1664_v39 }
 0x13c   : > { %v3051_v53 = vpop.f32.mrf.mxu0 }
 0x13d   : > { %v3060_v58 = vadd.f32 %v3051_v53, %v2973_v18  ;;  %v3148_v40 = vadd.f32 %v11560_v54, %v3061_v55  ;;  %v3660_v54 = vpop.f32.mrf.mxu1  ;;  %v1838_v16 = vadd.f32 %v12820_v30, %v1751_v5 }
 0x13e   : > { %v11565_v61 = vpop.f32.mrf.mxu0 }
 0x13f   : > { %v3147_v63 = vadd.f32 %v3138_v56, %v3060_v58  ;;  %v3235_v47 = vadd.f32 %v11565_v61, %v3148_v40  ;;  %v1663_v58 = vadd.f32 %v12816_v27, %v1576_v62  ;;  %v11600_v14 = vpop.f32.mrf.mxu1  ;;  %v1925_v15 = vadd.f32 %v12804_v21, %v1838_v16 }
 0x140   : > { %v3225_v3 = vpop.f32.mrf.mxu0 }
 0x141   : > { %v3322_v4 = vadd.f32 %v11570_v8, %v3235_v47  ;;  %v3234_v0 = vadd.f32 %v3225_v3, %v3147_v63  ;;  %v1750_v10 = vadd.f32 %v12800_v6, %v1663_v58  ;;  %v2012_v30 = vadd.f32 %v12828_v34, %v1925_v15 }
 0x142   : > { %v11575_v2 = vpop.f32.mrf.mxu0 }
 0x143   : > { %v3321_v37 = vadd.f32 %v3312_v12, %v3234_v0  ;;  %v3409_v35 = vadd.f32 %v11575_v2, %v3322_v4  ;;  %v1837_v25 = vadd.f32 %v12824_v32, %v1750_v10  ;;  %v702_v4 = vadd.f32 %v12760_v38, %v609_v45  ;;  %v13794_v10 = vld [vmem:[#allocation13_spill] sm:$0xff] }
 0x144   : > { %v3399_v36 = vpop.f32.mrf.mxu0  ;;  %v2099_v57 = vadd.f32 %v12808_v23, %v2012_v30  ;;  %v12915_v30 = vld [vmem:[#allocation2 + $0xa] sm:$0xff] }
 0x145   : > { %v3408_v18 = vadd.f32 %v3399_v36, %v3321_v37  ;;  %v3496_v20 = vadd.f32 %v11580_v59, %v3409_v35  ;;  %v3834_v59 = vpop.f32.mrf.mxu1  ;;  %v1924_v6 = vadd.f32 %v12806_v22, %v1837_v25  ;;  %v789_v28 = vadd.f32 %v12785_v1, %v702_v4  ;;  %v13799_v4 = vld [vmem:[#allocation10_spill] sm:$0xff] }
 0x146   : > { %v11585_v60 = vpop.f32.mrf.mxu0  ;;  %v2186_v34 = vadd.f32 %v12832_v44, %v2099_v57  ;;  %v13805_v57 = vld [vmem:[#allocation15_spill] sm:$0xff] }
 0x147   : > { %v3495_v19 = vadd.f32 %v3486_v50, %v3408_v18  ;;  %v3583_v7 = vadd.f32 %v11585_v60, %v3496_v20  ;;  %v11610_v3 = vpop.f32.mrf.mxu1  ;;  %v2011_v32 = vadd.f32 %v12830_v41, %v1924_v6  ;;  %v876_v38 = vadd.f32 %v12772_v43, %v789_v28  ;;  %v12893_v6 = vld [vmem:[#allocation2 + $0x2] sm:$0xff] }
 0x148   : > { %v3573_v52 = vpop.f32.mrf.mxu0  ;;  %v2273_v23 = vadd.f32 %v12814_v26, %v2186_v34  ;;  %13798 = vst [vmem:[#allocation13_spill] sm:$0xff] %v12893_v6  ;;  %v13804_v28 = vld [vmem:[#allocation14_spill] sm:$0xff]  ;;  %v13806_v34 = vld [vmem:[#allocation9_spill] sm:$0xff] }
 0x149   : > { %v3582_v53 = vadd.f32 %v3573_v52, %v3495_v19  ;;  %v3670_v55 = vadd.f32 %v11590_v13, %v3583_v7  ;;  %v4008_v11 = vpop.f32.mrf.mxu1  ;;  %v2098_v21 = vadd.f32 %v12810_v24, %v2011_v32  ;;  %v963_v1 = vadd.f32 %v12789_v9, %v876_v38  ;;  %v12917_v32 = vld [vmem:[#allocation2 + $0x1a] sm:$0xff] }
 0x14a   : > { %v11595_v12 = vpop.f32.mrf.mxu0  ;;  %v2360_v44 = vadd.f32 %v12836_v48, %v2273_v23  ;;  %v5524_v23 = vld [vmem:[#allocation5 + $0x98] sm:$0xff] }
 0x14b   : > { %v3669_v56 = vadd.f32 %v3660_v54, %v3582_v53  ;;  %v3757_v27 = vadd.f32 %v11595_v12, %v3670_v55  ;;  %v11620_v35 = vpop.f32.mrf.mxu1  ;;  %v2185_v41 = vadd.f32 %v12834_v46, %v2098_v21  ;;  %v1050_v43 = vadd.f32 %v12774_v49, %v963_v1  ;;  %v13795_v55 = vld [vmem:[#allocation17_spill] sm:$0xff]  ;;  %v13796_v49 = vld [vmem:[#allocation18_spill] sm:$0xff]  ;;  %v5140_v21 = vld [vmem:[#allocation5 + $0x68] sm:$0xff] }
 0x14c   : > { %v3747_v8 = vpop.f32.mrf.mxu0  ;;  %v2447_v9 = vadd.f32 %v12822_v31, %v2360_v44  ;;  %13800 = vst [vmem:[#allocation17_spill] sm:$0xff] %v12915_v30  ;;  %13801 = vst [vmem:[#allocation18_spill] sm:$0xff] %v12917_v32 }
 0x14d   : > { %v3756_v40 = vadd.f32 %v3747_v8, %v3669_v56  ;;  %v3844_v61 = vadd.f32 %v11600_v14, %v3757_v27  ;;  %v4182_v20 = vpop.f32.mrf.mxu1  ;;  %v2272_v24 = vadd.f32 %v12818_v29, %v2185_v41  ;;  %v1137_v54 = vadd.f32 %v12798_v17, %v1050_v43  ;;  %v13807_v41 = vld [vmem:[#allocation11_spill] sm:$0xff] }
 0x14e   : > { %v11605_v42 = vpop.f32.mrf.mxu0  ;;  %v2534_v56 = vadd.f32 %v13795_v55, %v2447_v9  ;;  %v13027_v9 = vld [vmem:[#allocation2 + $0x78] sm:$0xff]  ;;  %v5907_v55 = vld [vmem:[#allocation5 + $0xc0] sm:$0xff] }
 0x14f   : > { %v3843_v63 = vadd.f32 %v3834_v59, %v3756_v40  ;;  %v3931_v0 = vadd.f32 %v11605_v42, %v3844_v61  ;;  %v11630_v19 = vpop.f32.mrf.mxu1  ;;  %v2359_v46 = vadd.f32 %v12838_v51, %v2272_v24  ;;  %v1224_v12 = vadd.f32 %v13794_v10, %v1137_v54  ;;  %v13797_v51 = vld [vmem:[#allocation16_spill] sm:$0xff]  ;;  %v5779_v54 = vld [vmem:[#allocation5 + $0xb0] sm:$0xff]  ;;  %13808 = vst [vmem:[#allocation10_spill] sm:$0xff] %v13027_v9 }
 0x150   : > { %v3921_v47 = vpop.f32.mrf.mxu0  ;;  %v1229_v16 = vmul.f32 0.1, %v13797_v51  ;;  %v2538_v25 = vmul.f32 0.1, %v2534_v56  ;;  %vm1227_vm8 = vcmp.gt.f32.partialorder %v13797_v51, 0.0  ;;  %vm2536_vm10 = vcmp.gt.f32.partialorder %v2534_v56, 0.0 }
 0x151   : > { %v3930_v50 = vadd.f32 %v3921_v47, %v3843_v63  ;;  %v4018_v22 = vadd.f32 %v11610_v3, %v3931_v0  ;;  %v4356_v53 = vpop.f32.mrf.mxu1  ;;  %v2446_v26 = vadd.f32 %v12826_v33, %v2359_v46  ;;  %v1228_v17 = vmul.f32 0.1, %v1224_v12  ;;  %v13802_v0 = vld [vmem:[#allocation12_spill] sm:$0xff]  ;;  %v5780_v46 = vld [vmem:[#allocation5 + $0xb8] sm:$0xff]  ;;  %v13036_v10 = vld [vmem:[#allocation2 + $0x80] sm:$0xff] }
 0x152   : > { %v11615_v62 = vpop.f32.mrf.mxu0  ;;  %vm1226_vm9 = vcmp.gt.f32.partialorder %v1224_v12, 0.0  ;;  %v1231_v59 = vsel %vm1227_vm8, %v13797_v51, %v1229_v16  ;;  %v2540_v45 = vsel %vm2536_vm10, %v2534_v56, %v2538_v25  ;;  %13809 = vst [vmem:[#allocation12_spill] sm:$0xff] %v13036_v10  ;;  %v6035_v56 = vld [vmem:[#allocation5 + $0xd0] sm:$0xff]  ;;  %v6163_v16 = vld [vmem:[#allocation5 + $0xe0] sm:$0xff] }
 0x153   : > { %v4017_v2 = vadd.f32 %v4008_v11, %v3930_v50  ;;  %v4105_v36 = vadd.f32 %v11615_v62, %v4018_v22  ;;  %v2533_v8 = vadd.f32 %v13796_v49, %v2446_v26  ;;  %v1230_v42 = vsel %vm1226_vm9, %v1224_v12, %v1228_v17  ;;  %v4883_v50 = vld [vmem:[#allocation5 + $0x40] sm:$0xff]  ;;  %v5011_v11 = vld [vmem:[#allocation5 + $0x50] sm:$0xff] }
 0x154   : > { %v4095_v37 = vpop.f32.mrf.mxu0  ;;  %v12927_v62 = vld [vmem:[#allocation2 + $0x22] sm:$0xff]  ;;  %v13052_v49 = vld [vmem:[#allocation2 + $0x79] sm:$0xff]  ;;  %v13083_v17 = vld [vmem:[#allocation2 + $0x90] sm:$0xff] }
 0x155   : > { %v4104_v18 = vadd.f32 %v4095_v37, %v4017_v2  ;;  %v4192_v39 = vadd.f32 %v11620_v35, %v4105_v36  ;;  %v2537_v31 = vmul.f32 0.1, %v2533_v8  ;;  %vm2535_vm11 = vcmp.gt.f32.partialorder %v2533_v8, 0.0  ;;  %13803 = vst [vmem:[#allocation16_spill] sm:$0xff] %v12927_v62  ;;  %v5268_v37 = vld [vmem:[#allocation5 + $0x78] sm:$0xff]  ;;  %v5139_v36 = vld [vmem:[#allocation5 + $0x60] sm:$0xff] }
 0x156   : > { %v11625_v13 = vpop.f32.mrf.mxu0  ;;  %13810 = vst [vmem:[#allocation14_spill] sm:$0xff] %v13052_v49  ;;  %v13065_v51 = vld [vmem:[#allocation2 + $0x82] sm:$0xff]  ;;  %13814 = vst [vmem:[#allocation19_spill] sm:$0xff] %v13083_v17  ;;  %v13085_v25 = vld [vmem:[#allocation2 + $0x91] sm:$0xff] }
 0x157   : > { %v4191_v58 = vadd.f32 %v4182_v20, %v4104_v18  ;;  %v4279_v7 = vadd.f32 %v11625_v13, %v4192_v39  ;;  %v2539_v15 = vsel %vm2535_vm11, %v2533_v8, %v2537_v31  ;;  %v5267_v18 = vld [vmem:[#allocation5 + $0x70] sm:$0xff]  ;;  %v5396_v20 = vld [vmem:[#allocation5 + $0x88] sm:$0xff]  ;;  %13813 = vst [vmem:[#allocation11_spill] sm:$0xff] %v13065_v51  ;;  %13815 = vst [vmem:[#allocation20_spill] sm:$0xff] %v13085_v25 }
 0x158   : > { %v4269_v60 = vpop.f32.mrf.mxu0  ;;  %v13054_v8 = vld [vmem:[#allocation2 + $0x7a] sm:$0xff] }
 0x159   : > { %v4278_v52 = vadd.f32 %v4269_v60, %v4191_v58  ;;  %v4366_v29 = vadd.f32 %v11630_v19, %v4279_v7  ;;  %v5395_v58 = vld [vmem:[#allocation5 + $0x80] sm:$0xff]  ;;  %v5523_v60 = vld [vmem:[#allocation5 + $0x90] sm:$0xff]  ;;  %v5652_v19 = vld [vmem:[#allocation5 + $0xa8] sm:$0xff]  ;;  %13811 = vst [vmem:[#allocation15_spill] sm:$0xff] %v13054_v8 }
 0x15a   : > { %v13093_v31 = vld [vmem:[#allocation2 + $0x98] sm:$0xff] }
 0x15b   : > { %v4365_v5 = vadd.f32 %v4356_v53, %v4278_v52  ;;  %v4370_v48 = vmul.f32 0.1, %v4366_v29  ;;  %vm4368_vm6 = vcmp.gt.f32.partialorder %v4366_v29, 0.0  ;;  %v5651_v53 = vld [vmem:[#allocation5 + $0xa0] sm:$0xff]  ;;  %13816 = vst [vmem:[#allocation21_spill] sm:$0xff] %v13093_v31 }
 0x15d   : > { %v4369_v14 = vmul.f32 0.1, %v4365_v5  ;;  %vm4367_vm7 = vcmp.gt.f32.partialorder %v4365_v5, 0.0  ;;  %v4372_v33 = vsel %vm4368_vm6, %v4366_v29, %v4370_v48  ;;  %v5908_v29 = vld [vmem:[#allocation5 + $0xc8] sm:$0xff] }
 0x15e   : > { %v6164_v48 = vld [vmem:[#allocation5 + $0xe8] sm:$0xff] }
 0x15f   : > { %v4371_v27 = vsel %vm4367_vm7, %v4365_v5, %v4369_v14  ;;  %v6036_v5 = vld [vmem:[#allocation5 + $0xd8] sm:$0xff] }
 0x160   : > { %v13063_v14 = vld [vmem:[#allocation2 + $0x81] sm:$0xff] }
 0x161   : > { %13812 = vst [vmem:[#allocation9_spill] sm:$0xff] %v13063_v14 }
 0x175   : > { %v439_v40 = vpop.permute.xlu0 %438 }
 0x176   : > { %442 = vst.msk [vmem:[#allocation2 + $0x31] sm:$0xff] %vm441_vm5, %v439_v40  ;;  %443 = vst.msk [vmem:[#allocation2 + $0x39] sm:$0xff] %vm441_vm5, %v439_v40 }
 0x177   : > { %444 = vst.msk [vmem:[#allocation2 + $0x49] sm:$0xff] %vm441_vm5, %v439_v40  ;;  %445 = vst.msk [vmem:[#allocation2 + $0x51] sm:$0xff] %vm441_vm5, %v439_v40 }
 0x178   : > { %446 = vst.msk [vmem:[#allocation2 + $0x61] sm:$0xff] %vm441_vm5, %v439_v40  ;;  %447 = vst.msk [vmem:[#allocation2 + $0x69] sm:$0xff] %vm441_vm5, %v439_v40  ;;  %v13113_v40 = vld [vmem:[#allocation2 + $0x9a] sm:$0xff] }
 0x179   : > { %1232 = vst.msk [vmem:[#allocation2 + $0x31] sm:$0xff] %vm350_vm1, %v1230_v42  ;;  %1233 = vst.msk [vmem:[#allocation2 + $0x39] sm:$0xff] %vm350_vm1, %v1231_v59  ;;  %v6325_v59 = vld [vmem:[#allocation5 + $0x108] sm:$0xff]  ;;  %v6316_v42 = vld [vmem:[#allocation5 + $0xf8] sm:$0xff] }
 0x17a   : > { %2542 = vst.msk [vmem:[#allocation2 + $0x49] sm:$0xff] %vm350_vm1, %v2539_v15  ;;  %2543 = vst.msk [vmem:[#allocation2 + $0x51] sm:$0xff] %vm350_vm1, %v2540_v45  ;;  %v6324_v45 = vld [vmem:[#allocation5 + $0x100] sm:$0xff]  ;;  %v6315_v15 = vld [vmem:[#allocation5 + $0xf0] sm:$0xff] }
 0x17b   : > { %4375 = vst.msk [vmem:[#allocation2 + $0x69] sm:$0xff] %vm350_vm1, %v4372_v33  ;;  %4374 = vst.msk [vmem:[#allocation2 + $0x61] sm:$0xff] %vm350_vm1, %v4371_v27  ;;  %v13097_v33 = vld [vmem:[#allocation2 + $0x99] sm:$0xff] }
 0x17c   : > { %13817 = vst [vmem:[#allocation22_spill] sm:$0xff] %v13097_v33  ;;  %v13107_v27 = vld [vmem:[#allocation2 + $0x92] sm:$0xff]  ;;  %13819 = vst [vmem:[#allocation24_spill] sm:$0xff] %v13113_v40 }
 0x17d   : > { %13818 = vst [vmem:[#allocation23_spill] sm:$0xff] %v13107_v27 }
 0x180   : > { %v12895_v61 = vld [vmem:[#allocation2 + $0x31] sm:$0xff]  ;;  %v12899_v47 = vld [vmem:[#allocation2 + $0x39] sm:$0xff] }
 0x181   : > { %v12897_v63 = vld [vmem:[#allocation2 + $0x30] sm:$0xff]  ;;  %11641 = vmatprep.mubr.msk.f32.mxu0 %vm324_vm2, %v12895_v61  ;;  %v12905_v3 = vld [vmem:[#allocation2 + $0x38] sm:$0xff]  ;;  %v12937_v2 = vld [vmem:[#allocation2 + $0x48] sm:$0xff] }
 0x182   : > { %11654 = vmatprep.mubr.msk.f32.mxu1 %vm324_vm2, %v12897_v63  ;;  %11642 = vmatmul.mubr.msk.f32.gmra.mxu0 %vm324_vm2, %v12899_v47  ;;  %v12935_v22 = vld [vmem:[#allocation2 + $0x32] sm:$0xff]  ;;  %v12943_v35 = vld [vmem:[#allocation2 + $0x3a] sm:$0xff]  ;;  %v12967_v13 = vld [vmem:[#allocation2 + $0x49] sm:$0xff] }
 0x183   : > { %11655 = vmatmul.mubr.msk.f32.gmra.mxu1 %vm324_vm2, %v12905_v3  ;;  %11661 = vmatprep.mubr.msk.f32.mxu0 %vm324_vm2, %v12893_v6  ;;  %v12945_v38 = vld [vmem:[#allocation2 + $0x50] sm:$0xff]  ;;  %v12999_v43 = vld [vmem:[#allocation2 + $0x60] sm:$0xff]  ;;  %v13007_v7 = vld [vmem:[#allocation2 + $0x68] sm:$0xff] }
 0x184   : > { %11674 = vmatprep.mubr.msk.f32.mxu1 %vm324_vm2, %v13799_v4  ;;  %v12969_v1 = vld [vmem:[#allocation2 + $0x4a] sm:$0xff]  ;;  %v12977_v39 = vld [vmem:[#allocation2 + $0x52] sm:$0xff]  ;;  %v13001_v44 = vld [vmem:[#allocation2 + $0x61] sm:$0xff] }
 0x185   : > { %v12975_v24 = vld [vmem:[#allocation2 + $0x51] sm:$0xff]  ;;  %v13009_v52 = vld [vmem:[#allocation2 + $0x69] sm:$0xff]  ;;  %v13133_v4 = vld [vmem:[#allocation2 + $0x19] sm:$0xff] }
 0x186   : > { %11662 = vmatmul.mubr.msk.f32.vlgmr.msra.gmra.mxu0 %vm324_vm2, %v12915_v30  ;;  %v5392_v26 = vld [vmem:[#allocation2 + $0x62] sm:$0xff]  ;;  %v5393_v12 = vld [vmem:[#allocation2 + $0x6a] sm:$0xff]  ;;  %13824 = vst [vmem:[#allocation29_spill] sm:$0xff] %v13133_v4 }
 0x187   : > { %11675 = vmatmul.mubr.msk.f32.vlgmr.msra.gmra.mxu1 %vm324_vm2, %v13802_v0  ;;  %11664 = vmatprep.mubr.msk.f32.mxu0 %vm324_vm2, %v12917_v32  ;;  %v13135_v0 = vld [vmem:[#allocation2 + $0x18] sm:$0xff] }
 0x188   : > { %11677 = vmatprep.mubr.msk.f32.mxu1 %vm324_vm2, %v12897_v63  ;;  %11684 = vmatpush3.msra.mxu0 %v13804_v28  ;;  %13825 = vst [vmem:[#allocation30_spill] sm:$0xff] %v13135_v0  ;;  %v6560_v28 = vld [vmem:[#allocation5 + $0x118] sm:$0xff] }
 0x189   : > { %11697 = vmatpush3.msra.mxu1 %v13805_v57  ;;  %11685 = vmatprep.subr.mxu0 %v4883_v50  ;;  %v6688_v57 = vld [vmem:[#allocation5 + $0x128] sm:$0xff] }
 0x18a   : > { %11698 = vmatprep.subr.mxu1 %v5011_v11  ;;  %11665 = vmatmul.mubr.msk.f32.gmra.mxu0 %vm324_vm2, %v12927_v62 }
 0x18b   : > { %11678 = vmatmul.mubr.msk.f32.gmra.mxu1 %vm324_vm2, %v12905_v3  ;;  %11667 = vmatprep.mubr.msk.f32.mxu0 %vm324_vm2, %v12935_v22 }
 0x18c   : > { %11680 = vmatprep.mubr.msk.f32.mxu1 %vm324_vm2, %v12937_v2  ;;  %11686 = vmatpush3.msra.mxu0 %v4883_v50  ;;  %v13141_v50 = vld [vmem:[#allocation2 + $0x21] sm:$0xff] }
 0x18d   : > { %11699 = vmatpush3.msra.mxu1 %v5011_v11  ;;  %11709 = vmatprep.subr.mxu0 %v5140_v21  ;;  %13826 = vst [vmem:[#allocation31_spill] sm:$0xff] %v13141_v50  ;;  %v13143_v11 = vld [vmem:[#allocation2 + $0x20] sm:$0xff] }
 0x18e   : > { %11722 = vmatprep.subr.mxu1 %v5268_v37  ;;  %11668 = vmatmul.mubr.msk.f32.gmra.mxu0 %vm324_vm2, %v12943_v35  ;;  %13827 = vst [vmem:[#allocation32_spill] sm:$0xff] %v13143_v11 }
 0x18f   : > { %11681 = vmatmul.mubr.msk.f32.gmra.mxu1 %vm324_vm2, %v12945_v38  ;;  %11687 = vmatprep.mubr.msk.f32.mxu0 %vm324_vm2, %v13806_v34 }
 0x190   : > { %11700 = vmatprep.mubr.msk.f32.mxu1 %vm324_vm2, %v12917_v32 }
 0x192   : > { %11688 = vmatmul.mubr.msk.f32.vlgmr.msra.gmra.mxu0 %vm324_vm2, %v13807_v41 }
 0x193   : > { %11701 = vmatmul.mubr.msk.f32.vlgmr.msra.gmra.mxu1 %vm324_vm2, %v12927_v62  ;;  %11690 = vmatprep.mubr.msk.f32.mxu0 %vm324_vm2, %v12895_v61 }
 0x194   : > { %11703 = vmatprep.mubr.msk.f32.mxu1 %vm324_vm2, %v12935_v22  ;;  %11710 = vmatpush3.msra.mxu0 %v5140_v21  ;;  %v6559_v21 = vld [vmem:[#allocation5 + $0x110] sm:$0xff] }
 0x195   : > { %11723 = vmatpush3.msra.mxu1 %v5268_v37  ;;  %11711 = vmatprep.subr.mxu0 %v5139_v36  ;;  %v13152_v37 = vld [vmem:[#allocation5 + $0x148] sm:$0xff] }
 0x196   : > { %11724 = vmatprep.subr.mxu1 %v5267_v18  ;;  %11691 = vmatmul.mubr.msk.f32.gmra.mxu0 %vm324_vm2, %v12899_v47  ;;  %13829 = vst [vmem:[#allocation34_spill] sm:$0xff] %v13152_v37 }
 0x197   : > { %11704 = vmatmul.mubr.msk.f32.gmra.mxu1 %vm324_vm2, %v12943_v35  ;;  %11693 = vmatprep.mubr.msk.f32.mxu0 %vm324_vm2, %v12967_v13 }
 0x198   : > { %11706 = vmatprep.mubr.msk.f32.mxu1 %vm324_vm2, %v12969_v1  ;;  %11712 = vmatpush3.msra.mxu0 %v5139_v36 }
 0x199   : > { %11725 = vmatpush3.msra.mxu1 %v5267_v18  ;;  %11735 = vmatprep.subr.mxu0 %v5396_v20 }
 0x19a   : > { %11748 = vmatprep.subr.mxu1 %v5524_v23  ;;  %11694 = vmatmul.mubr.msk.f32.gmra.mxu0 %vm324_vm2, %v12975_v24 }
 0x19b   : > { %11707 = vmatmul.mubr.msk.f32.gmra.mxu1 %vm324_vm2, %v12977_v39  ;;  %11713 = vmatprep.mubr.msk.f32.mxu0 %vm324_vm2, %v12897_v63  ;;  %v13119_v63 = vld [vmem:[#allocation2] sm:$0xff] }
 0x19c   : > { %11726 = vmatprep.mubr.msk.f32.mxu1 %vm324_vm2, %v12895_v61  ;;  %v13117_v61 = vld [vmem:[#allocation2 + $0x1] sm:$0xff]  ;;  %13821 = vst [vmem:[#allocation26_spill] sm:$0xff] %v13119_v63 }
 0x19d   : > { %13820 = vst [vmem:[#allocation25_spill] sm:$0xff] %v13117_v61 }
 0x19e   : > { %11714 = vmatmul.mubr.msk.f32.vlgmr.msra.gmra.mxu0 %vm324_vm2, %v12905_v3  ;;  %v13125_v3 = vld [vmem:[#allocation2 + $0x8] sm:$0xff] }
 0x19f   : > { %11727 = vmatmul.mubr.msk.f32.vlgmr.msra.gmra.mxu1 %vm324_vm2, %v12899_v47  ;;  %11716 = vmatprep.mubr.msk.f32.mxu0 %vm324_vm2, %v12937_v2  ;;  %v13123_v47 = vld [vmem:[#allocation2 + $0x9] sm:$0xff]  ;;  %13823 = vst [vmem:[#allocation28_spill] sm:$0xff] %v13125_v3 }
 0x1a0   : > { %11729 = vmatprep.mubr.msk.f32.mxu1 %vm324_vm2, %v12967_v13  ;;  %11736 = vmatpush3.msra.mxu0 %v5396_v20  ;;  %13822 = vst [vmem:[#allocation27_spill] sm:$0xff] %v13123_v47 }
 0x1a1   : > { %11749 = vmatpush3.msra.mxu1 %v5524_v23  ;;  %11737 = vmatprep.subr.mxu0 %v5395_v58 }
 0x1a2   : > { %11750 = vmatprep.subr.mxu1 %v5523_v60  ;;  %11717 = vmatmul.mubr.msk.f32.gmra.mxu0 %vm324_vm2, %v12945_v38 }
 0x1a3   : > { %11730 = vmatmul.mubr.msk.f32.gmra.mxu1 %vm324_vm2, %v12975_v24  ;;  %11719 = vmatprep.mubr.msk.f32.mxu0 %vm324_vm2, %v12999_v43 }
 0x1a4   : > { %11732 = vmatprep.mubr.msk.f32.mxu1 %vm324_vm2, %v13001_v44  ;;  %11738 = vmatpush3.msra.mxu0 %v5395_v58 }
 0x1a5   : > { %11751 = vmatpush3.msra.mxu1 %v5523_v60  ;;  %11761 = vmatprep.subr.mxu0 %v5652_v19 }
 0x1a6   : > { %11774 = vmatprep.subr.mxu1 %v5780_v46  ;;  %11720 = vmatmul.mubr.msk.f32.gmra.mxu0 %vm324_vm2, %v13007_v7 }
 0x1a7   : > { %11733 = vmatmul.mubr.msk.f32.gmra.mxu1 %vm324_vm2, %v13009_v52  ;;  %11739 = vmatprep.mubr.msk.f32.mxu0 %vm324_vm2, %v12935_v22  ;;  %v6687_v22 = vld [vmem:[#allocation5 + $0x120] sm:$0xff] }
 0x1a8   : > { %11752 = vmatprep.mubr.msk.f32.mxu1 %vm324_vm2, %v12937_v2  ;;  %v13149_v2 = vld [vmem:[#allocation5 + $0x138] sm:$0xff] }
 0x1a9   : > { %13828 = vst [vmem:[#allocation33_spill] sm:$0xff] %v13149_v2 }
 0x1aa   : > { %11740 = vmatmul.mubr.msk.f32.vlgmr.msra.gmra.mxu0 %vm324_vm2, %v12943_v35  ;;  %v11637_v35 = vpop.f32.mrf.mxu0 }
 0x1ab   : > { %11753 = vmatmul.mubr.msk.f32.vlgmr.msra.gmra.mxu1 %vm324_vm2, %v12945_v38  ;;  %11742 = vmatprep.mubr.msk.f32.mxu0 %vm324_vm2, %v12969_v1  ;;  %v11650_v38 = vpop.f32.mrf.mxu1 }
 0x1ac   : > { %11755 = vmatprep.mubr.msk.f32.mxu1 %vm324_vm2, %v12999_v43  ;;  %11762 = vmatpush3.msra.mxu0 %v5652_v19  ;;  %v4477_v34 = vpop.f32.mrf.mxu0 }
 0x1ad   : > { %11775 = vmatpush3.msra.mxu1 %v5780_v46  ;;  %11763 = vmatprep.subr.mxu0 %v5651_v53  ;;  %v4590_v41 = vpop.f32.mrf.mxu1 }
 0x1ae   : > { %11776 = vmatprep.subr.mxu1 %v5779_v54  ;;  %11743 = vmatmul.mubr.msk.f32.gmra.mxu0 %vm324_vm2, %v12977_v39  ;;  %v11640_v36 = vpop.f32.mrf.mxu0 }
 0x1af   : > { %11756 = vmatmul.mubr.msk.f32.gmra.mxu1 %vm324_vm2, %v13007_v7  ;;  %11745 = vmatprep.mubr.msk.f32.mxu0 %vm324_vm2, %v5392_v26  ;;  %v11653_v18 = vpop.f32.mrf.mxu1 }
 0x1b0   : > { %11758 = vmatprep.mubr.msk.f32.mxu1 %vm324_vm2, %v13027_v9  ;;  %11764 = vmatpush3.msra.mxu0 %v5651_v53  ;;  %v4487_v20 = vpop.f32.mrf.mxu0 }
 0x1b1   : > { %11777 = vmatpush3.msra.mxu1 %v5779_v54  ;;  %11787 = vmatprep.subr.mxu0 %v5908_v29 }
 0x1b2   : > { %11800 = vmatprep.subr.mxu1 %v6036_v5  ;;  %11746 = vmatmul.mubr.msk.f32.gmra.mxu0 %vm324_vm2, %v5393_v12 }
 0x1b3   : > { %11759 = vmatmul.mubr.msk.f32.gmra.mxu1 %vm324_vm2, %v13036_v10  ;;  %11765 = vmatprep.mubr.msk.f32.mxu0 %vm324_vm2, %v12967_v13  ;;  %v4600_v13 = vpop.f32.mrf.mxu1 }
 0x1b4   : > { %11778 = vmatprep.mubr.msk.f32.mxu1 %vm324_vm2, %v12969_v1 }
 0x1b6   : > { %11766 = vmatmul.mubr.msk.f32.vlgmr.msra.gmra.mxu0 %vm324_vm2, %v12975_v24 }
 0x1b7   : > { %11779 = vmatmul.mubr.msk.f32.vlgmr.msra.gmra.mxu1 %vm324_vm2, %v12977_v39  ;;  %11768 = vmatprep.mubr.msk.f32.mxu0 %vm324_vm2, %v13001_v44 }
 0x1b8   : > { %11781 = vmatprep.mubr.msk.f32.mxu1 %vm324_vm2, %v5392_v26  ;;  %11788 = vmatpush3.msra.mxu0 %v5908_v29 }
 0x1b9   : > { %11801 = vmatpush3.msra.mxu1 %v6036_v5  ;;  %11789 = vmatprep.subr.mxu0 %v5907_v55 }
 0x1ba   : > { %11802 = vmatprep.subr.mxu1 %v6035_v56  ;;  %11769 = vmatmul.mubr.msk.f32.gmra.mxu0 %vm324_vm2, %v13009_v52 }
 0x1bb   : > { %11782 = vmatmul.mubr.msk.f32.gmra.mxu1 %vm324_vm2, %v5393_v12  ;;  %11771 = vmatprep.mubr.msk.f32.mxu0 %vm324_vm2, %v13052_v49 }
 0x1bc   : > { %11784 = vmatprep.mubr.msk.f32.mxu1 %vm324_vm2, %v13054_v8  ;;  %11790 = vmatpush3.msra.mxu0 %v5907_v55 }
 0x1bd   : > { %11803 = vmatpush3.msra.mxu1 %v6035_v56  ;;  %11813 = vmatprep.subr.mxu0 %v6164_v48 }
 0x1be   : > { %11772 = vmatmul.mubr.msk.f32.gmra.mxu0 %vm324_vm2, %v13063_v14  ;;  %11826 = vmatprep.subr.mxu1 %v6325_v59 }
 0x1bf   : > { %11785 = vmatmul.mubr.msk.f32.gmra.mxu1 %vm324_vm2, %v13065_v51  ;;  %11791 = vmatprep.mubr.msk.f32.mxu0 %vm324_vm2, %v12999_v43 }
 0x1c0   : > { %11804 = vmatprep.mubr.msk.f32.mxu1 %vm324_vm2, %v13001_v44 }
 0x1c2   : > { %11792 = vmatmul.mubr.msk.f32.vlgmr.msra.gmra.mxu0 %vm324_vm2, %v13007_v7 }
 0x1c3   : > { %11805 = vmatmul.mubr.msk.f32.vlgmr.msra.gmra.mxu1 %vm324_vm2, %v13009_v52  ;;  %11794 = vmatprep.mubr.msk.f32.mxu0 %vm324_vm2, %v13027_v9 }
 0x1c4   : > { %11814 = vmatpush3.msra.mxu0 %v6164_v48  ;;  %11807 = vmatprep.mubr.msk.f32.mxu1 %vm324_vm2, %v13052_v49  ;;  %v4591_v49 = vadd.f32 %v4590_v41, %v4477_v34 }
 0x1c5   : > { %11815 = vmatprep.subr.mxu0 %v6163_v16  ;;  %11827 = vmatpush3.msra.mxu1 %v6325_v59 }
 0x1c6   : > { %11816 = vmatpush3.msra.mxu0 %v6163_v16  ;;  %11828 = vmatprep.subr.mxu1 %v6324_v45 }
 0x1c7   : > { %11795 = vmatmul.mubr.msk.f32.gmra.mxu0 %vm324_vm2, %v13036_v10  ;;  %11808 = vmatmul.mubr.msk.f32.gmra.mxu1 %vm324_vm2, %v13063_v14 }
 0x1c8   : > { %11797 = vmatprep.mubr.msk.f32.mxu0 %vm324_vm2, %v13083_v17  ;;  %11810 = vmatprep.mubr.msk.f32.mxu1 %vm324_vm2, %v13085_v25 }
 0x1c9   : > { %11839 = vmatprep.subr.mxu0 %v6316_v42  ;;  %11829 = vmatpush3.msra.mxu1 %v6324_v45 }
 0x1ca   : > { %11852 = vmatprep.subr.mxu1 %v6560_v28 }
 0x1cb   : > { %11798 = vmatmul.mubr.msk.f32.gmra.mxu0 %vm324_vm2, %v13093_v31  ;;  %11811 = vmatmul.mubr.msk.f32.gmra.mxu1 %vm324_vm2, %v13097_v33 }
 0x1cc   : > { %11817 = vmatprep.mubr.msk.f32.mxu0 %vm324_vm2, %v5392_v26  ;;  %11830 = vmatprep.mubr.msk.f32.mxu1 %vm324_vm2, %v13117_v61 }
 0x1cf   : > { %11818 = vmatmul.mubr.msk.f32.vlgmr.msra.gmra.mxu0 %vm324_vm2, %v5393_v12  ;;  %11831 = vmatmul.mubr.msk.f32.vlgmr.msra.gmra.mxu1 %vm324_vm2, %v13123_v47 }
 0x1d0   : > { %11820 = vmatprep.mubr.msk.f32.mxu0 %vm324_vm2, %v13054_v8  ;;  %11840 = vmatpush3.msra.mxu0 %v6316_v42 }
 0x1d1   : > { %11841 = vmatprep.subr.mxu0 %v6315_v15  ;;  %11833 = vmatprep.mubr.msk.f32.mxu1 %vm324_vm2, %v13133_v4  ;;  %v4606_v4 = vadd.f32 %v11653_v18, %v11640_v36 }
 0x1d2   : > { %11842 = vmatpush3.msra.mxu0 %v6315_v15  ;;  %11853 = vmatpush3.msra.mxu1 %v6560_v28 }
 0x1d3   : > { %11821 = vmatmul.mubr.msk.f32.gmra.mxu0 %vm324_vm2, %v13065_v51  ;;  %11834 = vmatmul.mubr.msk.f32.gmra.mxu1 %vm324_vm2, %v13141_v50  ;;  %v4596_v51 = vadd.f32 %v11650_v38, %v11637_v35 }
 0x1d4   : > { %11823 = vmatprep.mubr.msk.f32.mxu0 %vm324_vm2, %v13107_v27  ;;  %11865 = vmatprep.subr.mxu0 %v6688_v57 }
 0x1d5   : > { %11854 = vmatprep.subr.mxu1 %v6559_v21 }
 0x1d6   : > { %11855 = vmatpush3.msra.mxu1 %v6559_v21 }
 0x1d7   : > { %11824 = vmatmul.mubr.msk.f32.gmra.mxu0 %vm324_vm2, %v13113_v40  ;;  %11878 = vmatprep.subr.mxu1 %v13149_v2 }
 0x1d8   : > { %11843 = vmatprep.mubr.msk.f32.mxu0 %vm324_vm2, %v13119_v63 }
 0x1db   : > { %11844 = vmatmul.mubr.msk.f32.vlgmr.msra.gmra.mxu0 %vm324_vm2, %v13125_v3 }
 0x1dc   : > { %11846 = vmatprep.mubr.msk.f32.mxu0 %vm324_vm2, %v13135_v0  ;;  %11866 = vmatpush3.msra.mxu0 %v6688_v57 }
 0x1dd   : > { %11867 = vmatprep.subr.mxu0 %v6687_v22 }
 0x1de   : > { %11868 = vmatpush3.msra.mxu0 %v6687_v22 }
 0x1df   : > { %11847 = vmatmul.mubr.msk.f32.gmra.mxu0 %vm324_vm2, %v13143_v11  ;;  %11891 = vmatprep.subr.mxu0 %v13152_v37  ;;  %v4601_v37 = vadd.f32 %v4600_v13, %v4487_v20 }
 0x242   : > { %v11643_v1 = vpop.f32.mrf.mxu0 }
 0x243   : > { %v11656_v23 = vpop.f32.mrf.mxu1 }
 0x244   : > { %v4497_v24 = vpop.f32.mrf.mxu0  ;;  %v4616_v0 = vadd.f32 %v11656_v23, %v11643_v1 }
 0x245   : > { %v4610_v39 = vpop.f32.mrf.mxu1 }
 0x246   : > { %v11663_v58 = vpop.f32.mrf.mxu0  ;;  %v4611_v34 = vadd.f32 %v4610_v39, %v4497_v24 }
 0x247   : > { %v11676_v60 = vpop.f32.mrf.mxu1  ;;  %v4742_v10 = vadd.f32 %v11663_v58, %v4596_v51 }
 0x248   : > { %v4712_v19 = vpop.f32.mrf.mxu0 }
 0x249   : > { %v4841_v43 = vpop.f32.mrf.mxu1  ;;  %v4741_v62 = vadd.f32 %v4712_v19, %v4591_v49  ;;  %v4871_v11 = vadd.f32 %v11676_v60, %v4742_v10 }
 0x24a   : > { %v11666_v44 = vpop.f32.mrf.mxu0 }
 0x24b   : > { %v11679_v46 = vpop.f32.mrf.mxu1  ;;  %v4744_v30 = vadd.f32 %v11666_v44, %v4606_v4  ;;  %v4870_v38 = vadd.f32 %v4841_v43, %v4741_v62 }
 0x24c   : > { %v4722_v7 = vpop.f32.mrf.mxu0 }
 0x24d   : > { %v4851_v52 = vpop.f32.mrf.mxu1  ;;  %v4743_v6 = vadd.f32 %v4722_v7, %v4601_v37  ;;  %v4873_v36 = vadd.f32 %v11679_v46, %v4744_v30 }
 0x24e   : > { %v11669_v53 = vpop.f32.mrf.mxu0 }
 0x24f   : > { %v11682_v54 = vpop.f32.mrf.mxu1  ;;  %v4746_v51 = vadd.f32 %v11669_v53, %v4616_v0  ;;  %v4872_v18 = vadd.f32 %v4851_v52, %v4743_v6 }
 0x250   : > { %v4732_v26 = vpop.f32.mrf.mxu0 }
 0x251   : > { %v13155_v29 = vpop.f32.mrf.mxu1  ;;  %v4745_v20 = vadd.f32 %v4732_v26, %v4611_v34  ;;  %v4875_v1 = vadd.f32 %v11682_v54, %v4746_v51 }
 0x252   : > { %v11689_v5 = vpop.f32.mrf.mxu0 }
 0x253   : > { %v11702_v12 = vpop.f32.mrf.mxu1 }
 0x254   : > { %v4969_v55 = vpop.f32.mrf.mxu0 }
 0x255   : > { %v5097_v56 = vpop.f32.mrf.mxu1  ;;  %v4998_v49 = vadd.f32 %v4969_v55, %v4870_v38 }
 0x256   : > { %v11692_v48 = vpop.f32.mrf.mxu0 }
 0x257   : > { %v11705_v16 = vpop.f32.mrf.mxu1  ;;  %v5001_v4 = vadd.f32 %v11692_v48, %v4873_v36  ;;  %v5126_v44 = vadd.f32 %v5097_v56, %v4998_v49 }
 0x258   : > { %v4979_v59 = vpop.f32.mrf.mxu0 }
 0x259   : > { %v5107_v42 = vpop.f32.mrf.mxu1  ;;  %v5000_v37 = vadd.f32 %v4979_v59, %v4872_v18  ;;  %v5129_v43 = vadd.f32 %v11705_v16, %v5001_v4 }
 0x25a   : > { %v11695_v45 = vpop.f32.mrf.mxu0 }
 0x25b   : > { %v13157_v15 = vpop.f32.mrf.mxu1  ;;  %v5003_v0 = vadd.f32 %v11695_v45, %v4875_v1  ;;  %v5128_v46 = vadd.f32 %v5107_v42, %v5000_v37 }
 0x25c   : > { %v4989_v28 = vpop.f32.mrf.mxu0 }
 0x25d   : > { %v13159_v57 = vpop.f32.mrf.mxu1  ;;  %v5131_v54 = vadd.f32 %v13157_v15, %v5003_v0 }
 0x25e   : > { %v11715_v21 = vpop.f32.mrf.mxu0 }
 0x25f   : > { %v11728_v22 = vpop.f32.mrf.mxu1 }
 0x260   : > { %v5225_v3 = vpop.f32.mrf.mxu0 }
 0x261   : > { %v13161_v47 = vpop.f32.mrf.mxu1  ;;  %v5254_v30 = vadd.f32 %v5225_v3, %v5126_v44 }
 0x262   : > { %v11718_v63 = vpop.f32.mrf.mxu0 }
 0x263   : > { %v13163_v40 = vpop.f32.mrf.mxu1  ;;  %v5382_v55 = vadd.f32 %v13161_v47, %v5254_v30 }
 0x264   : > { %v5235_v27 = vpop.f32.mrf.mxu0 }
 0x265   : > { %v13165_v61 = vpop.f32.mrf.mxu1  ;;  %v5256_v26 = vadd.f32 %v5235_v27, %v5128_v46 }
 0x266   : > { %v11721_v33 = vpop.f32.mrf.mxu0 }
 0x267   : > { %v13167_v31 = vpop.f32.mrf.mxu1  ;;  %v5259_v48 = vadd.f32 %v11721_v33, %v5131_v54  ;;  %v5384_v45 = vadd.f32 %v13165_v61, %v5256_v26 }
 0x268   : > { %13830 = vst [vmem:[#allocation35_spill] sm:$0xff] %v13167_v31  ;;  %v13169_v25 = vpop.f32.mrf.mxu0  ;;  %v4999_v31 = vadd.f32 %v11689_v5, %v4871_v11  ;;  %v4874_v11 = vadd.f32 %v13155_v29, %v4745_v20 }
 0x269   : > { %v13171_v17 = vpop.f32.mrf.mxu1 }
 0x26a   : > { %13831 = vst [vmem:[#allocation36_spill] sm:$0xff] %v13171_v17  ;;  %v11741_v14 = vpop.f32.mrf.mxu0  ;;  %v5127_v10 = vadd.f32 %v11702_v12, %v4999_v31  ;;  %v5002_v6 = vadd.f32 %v4989_v28, %v4874_v11  ;;  %v5257_v31 = vadd.f32 %v11718_v63, %v5129_v43 }
 0x26b   : > { %v13173_v8 = vpop.f32.mrf.mxu1 }
 0x26c   : > { %v5481_v9 = vpop.f32.mrf.mxu0  ;;  %v5255_v62 = vadd.f32 %v11715_v21, %v5127_v10  ;;  %v5130_v29 = vadd.f32 %v13159_v57, %v5002_v6  ;;  %v5385_v3 = vadd.f32 %v13163_v40, %v5257_v31 }
 0x26d   : > { %v13175_v50 = vpop.f32.mrf.mxu1  ;;  %v5510_v42 = vadd.f32 %v5481_v9, %v5382_v55 }
 0x26e   : > { %v11744_v2 = vpop.f32.mrf.mxu0  ;;  %v5383_v53 = vadd.f32 %v11728_v22, %v5255_v62  ;;  %v5258_v63 = vadd.f32 %v13169_v25, %v5130_v29 }
 0x26f   : > { %v13177_v32 = vpop.f32.mrf.mxu1  ;;  %v5513_v21 = vadd.f32 %v11744_v2, %v5385_v3  ;;  %v13832_v22 = vld [vmem:[#allocation35_spill] sm:$0xff]  ;;  %v5638_v33 = vadd.f32 %v13175_v50, %v5510_v42 }
 0x270   : > { %v5491_v17 = vpop.f32.mrf.mxu0  ;;  %v5511_v56 = vadd.f32 %v11741_v14, %v5383_v53  ;;  %v5387_v47 = vadd.f32 %v13832_v22, %v5259_v48 }
 0x271   : > { %v13179_v35 = vpop.f32.mrf.mxu1  ;;  %v5512_v14 = vadd.f32 %v5491_v17, %v5384_v45  ;;  %v13833_v51 = vld [vmem:[#allocation36_spill] sm:$0xff]  ;;  %v5641_v61 = vadd.f32 %v13177_v32, %v5513_v21 }
 0x272   : > { %v11747_v41 = vpop.f32.mrf.mxu0  ;;  %v5639_v27 = vadd.f32 %v13173_v8, %v5511_v56  ;;  %v5386_v40 = vadd.f32 %v13833_v51, %v5258_v63 }
 0x273   : > { %v13181_v58 = vpop.f32.mrf.mxu1  ;;  %v5515_v9 = vadd.f32 %v11747_v41, %v5387_v47  ;;  %v5640_v18 = vadd.f32 %v13179_v35, %v5512_v14 }
 0x274   : > { %v5501_v13 = vpop.f32.mrf.mxu0 }
 0x275   : > { %v5629_v19 = vpop.f32.mrf.mxu1  ;;  %v5514_v8 = vadd.f32 %v5501_v13, %v5386_v40  ;;  %v5643_v4 = vadd.f32 %v13181_v58, %v5515_v9 }
 0x276   : > { %v11767_v23 = vpop.f32.mrf.mxu0 }
 0x277   : > { %v11780_v60 = vpop.f32.mrf.mxu1  ;;  %v5767_v34 = vadd.f32 %v11767_v23, %v5639_v27  ;;  %v5642_v44 = vadd.f32 %v5629_v19, %v5514_v8  ;;  %v13837_v8 = vld [vmem:[#allocation32_spill] sm:$0xff] }
 0x278   : > { %v5737_v24 = vpop.f32.mrf.mxu0 }
 0x279   : > { %v5865_v39 = vpop.f32.mrf.mxu1  ;;  %v5766_v25 = vadd.f32 %v5737_v24, %v5638_v33  ;;  %v5895_v20 = vadd.f32 %v11780_v60, %v5767_v34 }
 0x27a   : > { %v11770_v7 = vpop.f32.mrf.mxu0 }
 0x27b   : > { %v11783_v52 = vpop.f32.mrf.mxu1  ;;  %v5769_v10 = vadd.f32 %v11770_v7, %v5641_v61  ;;  %v5894_v37 = vadd.f32 %v5865_v39, %v5766_v25  ;;  %v13834_v25 = vld [vmem:[#allocation13_spill] sm:$0xff] }
 0x27c   : > { %v5747_v5 = vpop.f32.mrf.mxu0 }
 0x27d   : > { %v5875_v12 = vpop.f32.mrf.mxu1  ;;  %v5768_v1 = vadd.f32 %v5747_v5, %v5640_v18  ;;  %v5897_v11 = vadd.f32 %v11783_v52, %v5769_v10  ;;  %v13836_v18 = vld [vmem:[#allocation17_spill] sm:$0xff]  ;;  %v13838_v10 = vld [vmem:[#allocation18_spill] sm:$0xff] }
 0x27e   : > { %v11773_v59 = vpop.f32.mrf.mxu0 }
 0x27f   : > { %v11786_v16 = vpop.f32.mrf.mxu1  ;;  %v5771_v41 = vadd.f32 %v11773_v59, %v5643_v4  ;;  %v5896_v24 = vadd.f32 %v5875_v12, %v5768_v1  ;;  %v13840_v4 = vld [vmem:[#allocation34_spill] sm:$0xff] }
 0x280   : > { %v5757_v28 = vpop.f32.mrf.mxu0  ;;  %v7072_v1 = vld [vmem:[#allocation5 + $0x158] sm:$0xff] }
 0x281   : > { %v5885_v15 = vpop.f32.mrf.mxu1  ;;  %v5770_v43 = vadd.f32 %v5757_v28, %v5642_v44  ;;  %v5899_v60 = vadd.f32 %v11786_v16, %v5771_v41  ;;  %v7200_v44 = vld [vmem:[#allocation5 + $0x168] sm:$0xff] }
 0x282   : > { %v11793_v38 = vpop.f32.mrf.mxu0  ;;  %v13245_v41 = vld [vmem:[#allocation2 + $0x1a] sm:$0xff] }
 0x283   : > { %v11806_v57 = vpop.f32.mrf.mxu1  ;;  %v6023_v23 = vadd.f32 %v11793_v38, %v5895_v20  ;;  %v5898_v31 = vadd.f32 %v5885_v15, %v5770_v43  ;;  %v6943_v20 = vld [vmem:[#allocation5 + $0x140] sm:$0xff]  ;;  %13842 = vst [vmem:[#allocation35_spill] sm:$0xff] %v13245_v41  ;;  %v7071_v43 = vld [vmem:[#allocation5 + $0x150] sm:$0xff] }
 0x284   : > { %v5993_v36 = vpop.f32.mrf.mxu0 }
 0x285   : > { %v6121_v49 = vpop.f32.mrf.mxu1  ;;  %v6022_v32 = vadd.f32 %v5993_v36, %v5894_v37  ;;  %v6151_v13 = vadd.f32 %v11806_v57, %v6023_v23 }
 0x287   : > { %v11796_v2 = vpop.f32.mrf.mxu0  ;;  %v11809_v17 = vpop.f32.mrf.mxu1  ;;  %v6150_v7 = vadd.f32 %v6121_v49, %v6022_v32  ;;  %v13835_v49 = vld [vmem:[#allocation30_spill] sm:$0xff]  ;;  %v13843_v32 = vld [vmem:[#allocation29_spill] sm:$0xff] }
 0x288   : > { %v6025_v30 = vadd.f32 %v11796_v2, %v5897_v11  ;;  %v6815_v2 = vld [vmem:[#allocation5 + $0x130] sm:$0xff] }
 0x289   : > { %v6003_v50 = vpop.f32.mrf.mxu0  ;;  %v6131_v0 = vpop.f32.mrf.mxu1 }
 0x28a   : > { %v6024_v46 = vadd.f32 %v6003_v50, %v5896_v24  ;;  %v6153_v19 = vadd.f32 %v11809_v17, %v6025_v30  ;;  %v13839_v17 = vld [vmem:[#allocation33_spill] sm:$0xff]  ;;  %v13841_v50 = vld [vmem:[#allocation16_spill] sm:$0xff]  ;;  %v13845_v24 = vld [vmem:[#allocation31_spill] sm:$0xff] }
 0x28b   : > { %v11799_v62 = vpop.f32.mrf.mxu0  ;;  %v11812_v58 = vpop.f32.mrf.mxu1 }
 0x28c   : > { %v6027_v39 = vadd.f32 %v11799_v62, %v5899_v60  ;;  %v6152_v5 = vadd.f32 %v6131_v0, %v6024_v46  ;;  %v13259_v0 = vld [vmem:[#allocation2 + $0x22] sm:$0xff]  ;;  %v7456_v46 = vld [vmem:[#allocation5 + $0x188] sm:$0xff] }
 0x28d   : > { %v6013_v35 = vpop.f32.mrf.mxu0  ;;  %v6141_v56 = vpop.f32.mrf.mxu1  ;;  %13844 = vst [vmem:[#allocation36_spill] sm:$0xff] %v13259_v0 }
 0x28e   : > { %v6026_v55 = vadd.f32 %v6013_v35, %v5898_v31  ;;  %v6155_v16 = vadd.f32 %v11812_v58, %v6027_v39  ;;  %v7199_v35 = vld [vmem:[#allocation5 + $0x160] sm:$0xff]  ;;  %v7327_v58 = vld [vmem:[#allocation5 + $0x170] sm:$0xff]  ;;  %v7584_v31 = vld [vmem:[#allocation5 + $0x198] sm:$0xff] }
 0x28f   : > { %v11819_v6 = vpop.f32.mrf.mxu0 }
 0x290   : > { %v6279_v53 = vadd.f32 %v11819_v6, %v6151_v13  ;;  %v6154_v28 = vadd.f32 %v6141_v56, %v6026_v55  ;;  %v7328_v13 = vld [vmem:[#allocation5 + $0x178] sm:$0xff]  ;;  %v7711_v55 = vld [vmem:[#allocation5 + $0x1a0] sm:$0xff] }
 0x291   : > { %v6249_v54 = vpop.f32.mrf.mxu0  ;;  %v7840_v56 = vld [vmem:[#allocation5 + $0x1b8] sm:$0xff] }
 0x292   : > { %vm6285_vm12 = vcmp.gt.f32.partialorder %v6279_v53, 0.0  ;;  %v6291_v26 = vmul.f32 0.1, %v6279_v53  ;;  %v6278_v52 = vadd.f32 %v6249_v54, %v6150_v7 }
 0x293   : > { %v11822_v12 = vpop.f32.mrf.mxu0 }
 0x294   : > { %v6297_v29 = vsel %vm6285_vm12, %v6279_v53, %v6291_v26  ;;  %vm6284_vm13 = vcmp.gt.f32.partialorder %v6278_v52, 0.0  ;;  %v6290_v48 = vmul.f32 0.1, %v6278_v52  ;;  %v6281_v59 = vadd.f32 %v11822_v12, %v6153_v19  ;;  %v7455_v53 = vld [vmem:[#allocation5 + $0x180] sm:$0xff]  ;;  %v7712_v19 = vld [vmem:[#allocation5 + $0x1a8] sm:$0xff] }
 0x295   : > { %6303 = vst.msk [vmem:[#allocation2 + $0x39] sm:$0xff] %vm324_vm2, %v6297_v29  ;;  %v6259_v3 = vpop.f32.mrf.mxu0  ;;  %v7968_v29 = vld [vmem:[#allocation5 + $0x1c8] sm:$0xff] }
 0x296   : > { %v6296_v42 = vsel %vm6284_vm13, %v6278_v52, %v6290_v48  ;;  %vm6287_vm14 = vcmp.gt.f32.partialorder %v6281_v59, 0.0  ;;  %v6293_v45 = vmul.f32 0.1, %v6281_v59  ;;  %v6280_v63 = vadd.f32 %v6259_v3, %v6152_v5  ;;  %v7583_v5 = vld [vmem:[#allocation5 + $0x190] sm:$0xff]  ;;  %v13846_v48 = vld [vmem:[#allocation10_spill] sm:$0xff] }
 0x297   : > { %6302 = vst.msk [vmem:[#allocation2 + $0x31] sm:$0xff] %vm324_vm2, %v6296_v42  ;;  %v11825_v15 = vpop.f32.mrf.mxu0  ;;  %v7839_v3 = vld [vmem:[#allocation5 + $0x1b0] sm:$0xff]  ;;  %v7967_v42 = vld [vmem:[#allocation5 + $0x1c0] sm:$0xff] }
 0x298   : > { %v6299_v27 = vsel %vm6287_vm14, %v6281_v59, %v6293_v45  ;;  %vm6286_vm15 = vcmp.gt.f32.partialorder %v6280_v63, 0.0  ;;  %v6292_v21 = vmul.f32 0.1, %v6280_v63  ;;  %v6283_v22 = vadd.f32 %v11825_v15, %v6155_v16  ;;  %v13847_v16 = vld [vmem:[#allocation12_spill] sm:$0xff]  ;;  %v8096_v45 = vld [vmem:[#allocation5 + $0x1d8] sm:$0xff]  ;;  %v13850_v15 = vld [vmem:[#allocation9_spill] sm:$0xff] }
 0x299   : > { %6305 = vst.msk [vmem:[#allocation2 + $0x51] sm:$0xff] %vm324_vm2, %v6299_v27  ;;  %v6269_v47 = vpop.f32.mrf.mxu0  ;;  %v13851_v27 = vld [vmem:[#allocation11_spill] sm:$0xff] }
 0x29a   : > { %v6298_v14 = vsel %vm6286_vm15, %v6280_v63, %v6292_v21  ;;  %vm6289_vm1 = vcmp.gt.f32.partialorder %v6283_v22, 0.0  ;;  %v6295_v38 = vmul.f32 0.1, %v6283_v22  ;;  %v6282_v57 = vadd.f32 %v6269_v47, %v6154_v28  ;;  %v13848_v63 = vld [vmem:[#allocation14_spill] sm:$0xff]  ;;  %v13849_v28 = vld [vmem:[#allocation15_spill] sm:$0xff]  ;;  %v13341_v21 = vld [vmem:[#allocation2 + $0x78] sm:$0xff] }
 0x29b   : > { %6304 = vst.msk [vmem:[#allocation2 + $0x49] sm:$0xff] %vm324_vm2, %v6298_v14  ;;  %13852 = vst [vmem:[#allocation13_spill] sm:$0xff] %v13341_v21  ;;  %v13347_v47 = vld [vmem:[#allocation2 + $0x80] sm:$0xff]  ;;  %v13854_v14 = vld [vmem:[#allocation19_spill] sm:$0xff] }
 0x29c   : > { %v6301_v33 = vsel %vm6289_vm1, %v6283_v22, %v6295_v38  ;;  %vm6288_vm4 = vcmp.gt.f32.partialorder %v6282_v57, 0.0  ;;  %v6294_v34 = vmul.f32 0.1, %v6282_v57  ;;  %v13213_v61 = vld [vmem:[#allocation2 + $0x39] sm:$0xff]  ;;  %13853 = vst [vmem:[#allocation30_spill] sm:$0xff] %v13347_v47 }
 0x29d   : > { %6307 = vst.msk [vmem:[#allocation2 + $0x69] sm:$0xff] %vm324_vm2, %v6301_v33  ;;  %v13247_v62 = vld [vmem:[#allocation2 + $0x3a] sm:$0xff]  ;;  %v13857_v33 = vld [vmem:[#allocation22_spill] sm:$0xff] }
 0x29e   : > { %v6300_v51 = vsel %vm6288_vm4, %v6282_v57, %v6294_v34  ;;  %v13202_v40 = vld [vmem:[#allocation2 + $0x31] sm:$0xff]  ;;  %v8095_v22 = vld [vmem:[#allocation5 + $0x1d0] sm:$0xff] }
 0x29f   : > { %v13204_v9 = vld [vmem:[#allocation2 + $0x30] sm:$0xff]  ;;  %v13206_v36 = vld [vmem:[#allocation2 + $0x38] sm:$0xff]  ;;  %6306 = vst.msk [vmem:[#allocation2 + $0x61] sm:$0xff] %vm324_vm2, %v6300_v51  ;;  %11836 = vmatprep.mubr.msk.f32.mxu1 %vm324_vm2, %v13202_v40  ;;  %v13856_v57 = vld [vmem:[#allocation21_spill] sm:$0xff] }
 0x2a0   : > { %11849 = vmatprep.mubr.msk.f32.mxu0 %vm324_vm2, %v13204_v9  ;;  %11837 = vmatmul.mubr.msk.f32.gmra.mxu1 %vm324_vm2, %v13213_v61  ;;  %v13237_v37 = vld [vmem:[#allocation2 + $0x32] sm:$0xff]  ;;  %v13858_v34 = vld [vmem:[#allocation25_spill] sm:$0xff] }
 0x2a1   : > { %11850 = vmatmul.mubr.msk.f32.gmra.mxu0 %vm324_vm2, %v13206_v36  ;;  %11856 = vmatprep.mubr.msk.f32.mxu1 %vm324_vm2, %v13834_v25  ;;  %v6813_v6 = vld [vmem:[#allocation2 + $0x51] sm:$0xff]  ;;  %v13366_v51 = vld [vmem:[#allocation2 + $0x7a] sm:$0xff]  ;;  %v8257_v25 = vld [vmem:[#allocation5 + $0x1f8] sm:$0xff] }
 0x2a2   : > { %11869 = vmatprep.mubr.msk.f32.mxu0 %vm324_vm2, %v13835_v49  ;;  %v13239_v23 = vld [vmem:[#allocation2 + $0x48] sm:$0xff]  ;;  %v13249_v11 = vld [vmem:[#allocation2 + $0x50] sm:$0xff]  ;;  %v13855_v38 = vld [vmem:[#allocation20_spill] sm:$0xff]  ;;  %13859 = vst [vmem:[#allocation17_spill] sm:$0xff] %v13366_v51 }
 0x2a3   : > { %v13273_v30 = vld [vmem:[#allocation2 + $0x49] sm:$0xff]  ;;  %v6941_v7 = vld [vmem:[#allocation2 + $0x52] sm:$0xff] }
 0x2a4   : > { %11857 = vmatmul.mubr.msk.f32.vlgmr.msra.gmra.mxu1 %vm324_vm2, %v13836_v18  ;;  %v13275_v60 = vld [vmem:[#allocation2 + $0x4a] sm:$0xff]  ;;  %v8248_v18 = vld [vmem:[#allocation5 + $0x1e8] sm:$0xff] }
 0x2a5   : > { %11870 = vmatmul.mubr.msk.f32.vlgmr.msra.gmra.mxu0 %vm324_vm2, %v13837_v8  ;;  %11859 = vmatprep.mubr.msk.f32.mxu1 %vm324_vm2, %v13838_v10  ;;  %v7197_v52 = vld [vmem:[#allocation2 + $0x69] sm:$0xff] }
 0x2a6   : > { %11872 = vmatprep.mubr.msk.f32.mxu0 %vm324_vm2, %v13204_v9  ;;  %11879 = vmatpush3.msra.mxu1 %v13839_v17  ;;  %v7068_v39 = vld [vmem:[#allocation2 + $0x60] sm:$0xff]  ;;  %v7069_v26 = vld [vmem:[#allocation2 + $0x68] sm:$0xff]  ;;  %v13864_v10 = vld [vmem:[#allocation27_spill] sm:$0xff] }
 0x2a7   : > { %11892 = vmatpush3.msra.mxu0 %v13840_v4  ;;  %11880 = vmatprep.subr.mxu1 %v6815_v2  ;;  %v7196_v54 = vld [vmem:[#allocation2 + $0x61] sm:$0xff]  ;;  %v7325_v59 = vld [vmem:[#allocation2 + $0x6a] sm:$0xff]  ;;  %v13865_v17 = vld [vmem:[#allocation28_spill] sm:$0xff] }
 0x2a8   : > { %11893 = vmatprep.subr.mxu0 %v6943_v20  ;;  %11860 = vmatmul.mubr.msk.f32.gmra.mxu1 %vm324_vm2, %v13841_v50  ;;  %v7324_v12 = vld [vmem:[#allocation2 + $0x62] sm:$0xff]  ;;  %v8492_v4 = vld [vmem:[#allocation5 + $0x208] sm:$0xff]  ;;  %v8491_v50 = vld [vmem:[#allocation5 + $0x200] sm:$0xff] }
 0x2a9   : > { %11873 = vmatmul.mubr.msk.f32.gmra.mxu0 %vm324_vm2, %v13206_v36  ;;  %11862 = vmatprep.mubr.msk.f32.mxu1 %vm324_vm2, %v13237_v37 }
 0x2aa   : > { %11875 = vmatprep.mubr.msk.f32.mxu0 %vm324_vm2, %v13239_v23  ;;  %11881 = vmatpush3.msra.mxu1 %v6815_v2  ;;  %v8256_v2 = vld [vmem:[#allocation5 + $0x1f0] sm:$0xff] }
 0x2ab   : > { %11894 = vmatpush3.msra.mxu0 %v6943_v20  ;;  %11904 = vmatprep.subr.mxu1 %v7072_v1  ;;  %v8247_v20 = vld [vmem:[#allocation5 + $0x1e0] sm:$0xff] }
 0x2ac   : > { %11917 = vmatprep.subr.mxu0 %v7200_v44  ;;  %11863 = vmatmul.mubr.msk.f32.gmra.mxu1 %vm324_vm2, %v13247_v62 }
 0x2ad   : > { %11876 = vmatmul.mubr.msk.f32.gmra.mxu0 %vm324_vm2, %v13249_v11  ;;  %11882 = vmatprep.mubr.msk.f32.mxu1 %vm324_vm2, %v13843_v32 }
 0x2ae   : > { %11895 = vmatprep.mubr.msk.f32.mxu0 %vm324_vm2, %v13245_v41 }
 0x2b0   : > { %11883 = vmatmul.mubr.msk.f32.vlgmr.msra.gmra.mxu1 %vm324_vm2, %v13845_v24 }
 0x2b1   : > { %11896 = vmatmul.mubr.msk.f32.vlgmr.msra.gmra.mxu0 %vm324_vm2, %v13259_v0  ;;  %11885 = vmatprep.mubr.msk.f32.mxu1 %vm324_vm2, %v13202_v40 }
 0x2b2   : > { %11898 = vmatprep.mubr.msk.f32.mxu0 %vm324_vm2, %v13237_v37  ;;  %11905 = vmatpush3.msra.mxu1 %v7072_v1  ;;  %v8620_v1 = vld [vmem:[#allocation5 + $0x218] sm:$0xff] }
 0x2b3   : > { %11918 = vmatpush3.msra.mxu0 %v7200_v44  ;;  %11906 = vmatprep.subr.mxu1 %v7071_v43  ;;  %v11845_v44 = vpop.f32.mrf.mxu0 }
 0x2b4   : > { %11919 = vmatprep.subr.mxu0 %v7199_v35  ;;  %11886 = vmatmul.mubr.msk.f32.gmra.mxu1 %vm324_vm2, %v13213_v61 }
 0x2b5   : > { %11899 = vmatmul.mubr.msk.f32.gmra.mxu0 %vm324_vm2, %v13247_v62  ;;  %11888 = vmatprep.mubr.msk.f32.mxu1 %vm324_vm2, %v13273_v30 }
 0x2b6   : > { %11901 = vmatprep.mubr.msk.f32.mxu0 %vm324_vm2, %v13275_v60  ;;  %11907 = vmatpush3.msra.mxu1 %v7071_v43 }
 0x2b7   : > { %11920 = vmatpush3.msra.mxu0 %v7199_v35  ;;  %11930 = vmatprep.subr.mxu1 %v7328_v13 }
 0x2b8   : > { %11943 = vmatprep.subr.mxu0 %v7456_v46  ;;  %11889 = vmatmul.mubr.msk.f32.gmra.mxu1 %vm324_vm2, %v6813_v6 }
 0x2b9   : > { %11902 = vmatmul.mubr.msk.f32.gmra.mxu0 %vm324_vm2, %v6941_v7  ;;  %11908 = vmatprep.mubr.msk.f32.mxu1 %vm324_vm2, %v13204_v9  ;;  %v13861_v9 = vld [vmem:[#allocation23_spill] sm:$0xff] }
 0x2ba   : > { %11921 = vmatprep.mubr.msk.f32.mxu0 %vm324_vm2, %v13202_v40  ;;  %v13371_v40 = vld [vmem:[#allocation2 + $0x82] sm:$0xff] }
 0x2bb   : > { %13860 = vst [vmem:[#allocation32_spill] sm:$0xff] %v13371_v40 }
 0x2bc   : > { %11909 = vmatmul.mubr.msk.f32.vlgmr.msra.gmra.mxu1 %vm324_vm2, %v13206_v36  ;;  %v13862_v36 = vld [vmem:[#allocation24_spill] sm:$0xff] }
 0x2bd   : > { %11922 = vmatmul.mubr.msk.f32.vlgmr.msra.gmra.mxu0 %vm324_vm2, %v13213_v61  ;;  %11911 = vmatprep.mubr.msk.f32.mxu1 %vm324_vm2, %v13239_v23  ;;  %v13863_v61 = vld [vmem:[#allocation26_spill] sm:$0xff] }
 0x2be   : > { %11924 = vmatprep.mubr.msk.f32.mxu0 %vm324_vm2, %v13273_v30  ;;  %11931 = vmatpush3.msra.mxu1 %v7328_v13 }
 0x2bf   : > { %11944 = vmatpush3.msra.mxu0 %v7456_v46  ;;  %11932 = vmatprep.subr.mxu1 %v7327_v58 }
 0x2c0   : > { %11945 = vmatprep.subr.mxu0 %v7455_v53  ;;  %11912 = vmatmul.mubr.msk.f32.gmra.mxu1 %vm324_vm2, %v13249_v11 }
 0x2c1   : > { %11925 = vmatmul.mubr.msk.f32.gmra.mxu0 %vm324_vm2, %v6813_v6  ;;  %11914 = vmatprep.mubr.msk.f32.mxu1 %vm324_vm2, %v7068_v39 }
 0x2c2   : > { %11927 = vmatprep.mubr.msk.f32.mxu0 %vm324_vm2, %v7196_v54  ;;  %11933 = vmatpush3.msra.mxu1 %v7327_v58 }
 0x2c3   : > { %11946 = vmatpush3.msra.mxu0 %v7455_v53  ;;  %11956 = vmatprep.subr.mxu1 %v7584_v31 }
 0x2c4   : > { %11969 = vmatprep.subr.mxu0 %v7712_v19  ;;  %11915 = vmatmul.mubr.msk.f32.gmra.mxu1 %vm324_vm2, %v7069_v26 }
 0x2c5   : > { %11928 = vmatmul.mubr.msk.f32.gmra.mxu0 %vm324_vm2, %v7197_v52  ;;  %11934 = vmatprep.mubr.msk.f32.mxu1 %vm324_vm2, %v13237_v37  ;;  %v8619_v37 = vld [vmem:[#allocation5 + $0x210] sm:$0xff] }
 0x2c6   : > { %11947 = vmatprep.mubr.msk.f32.mxu0 %vm324_vm2, %v13239_v23  ;;  %v13393_v23 = vld [vmem:[#allocation5 + $0x228] sm:$0xff] }
 0x2c7   : > { %13866 = vst [vmem:[#allocation18_spill] sm:$0xff] %v13393_v23 }
 0x2c8   : > { %11935 = vmatmul.mubr.msk.f32.vlgmr.msra.gmra.mxu1 %vm324_vm2, %v13247_v62 }
 0x2c9   : > { %11948 = vmatmul.mubr.msk.f32.vlgmr.msra.gmra.mxu0 %vm324_vm2, %v13249_v11  ;;  %11937 = vmatprep.mubr.msk.f32.mxu1 %vm324_vm2, %v13275_v60  ;;  %v6523_v11 = vpop.f32.mrf.mxu0 }
 0x2ca   : > { %11950 = vmatprep.mubr.msk.f32.mxu0 %vm324_vm2, %v7068_v39  ;;  %11957 = vmatpush3.msra.mxu1 %v7584_v31 }
 0x2cb   : > { %11970 = vmatpush3.msra.mxu0 %v7712_v19  ;;  %11958 = vmatprep.subr.mxu1 %v7583_v5 }
 0x2cc   : > { %11971 = vmatprep.subr.mxu0 %v7711_v55  ;;  %11938 = vmatmul.mubr.msk.f32.gmra.mxu1 %vm324_vm2, %v6941_v7 }
 0x2cd   : > { %11951 = vmatmul.mubr.msk.f32.gmra.mxu0 %vm324_vm2, %v7069_v26  ;;  %11940 = vmatprep.mubr.msk.f32.mxu1 %vm324_vm2, %v7324_v12 }
 0x2ce   : > { %11953 = vmatprep.mubr.msk.f32.mxu0 %vm324_vm2, %v13846_v48  ;;  %11959 = vmatpush3.msra.mxu1 %v7583_v5 }
 0x2cf   : > { %11972 = vmatpush3.msra.mxu0 %v7711_v55  ;;  %11982 = vmatprep.subr.mxu1 %v7840_v56 }
 0x2d0   : > { %11995 = vmatprep.subr.mxu0 %v7968_v29  ;;  %11941 = vmatmul.mubr.msk.f32.gmra.mxu1 %vm324_vm2, %v7325_v59 }
 0x2d1   : > { %11954 = vmatmul.mubr.msk.f32.gmra.mxu0 %vm324_vm2, %v13847_v16  ;;  %11960 = vmatprep.mubr.msk.f32.mxu1 %vm324_vm2, %v13273_v30 }
 0x2d2   : > { %11973 = vmatprep.mubr.msk.f32.mxu0 %vm324_vm2, %v13275_v60 }
 0x2d4   : > { %11961 = vmatmul.mubr.msk.f32.vlgmr.msra.gmra.mxu1 %vm324_vm2, %v6813_v6 }
 0x2d5   : > { %11974 = vmatmul.mubr.msk.f32.vlgmr.msra.gmra.mxu0 %vm324_vm2, %v6941_v7  ;;  %11963 = vmatprep.mubr.msk.f32.mxu1 %vm324_vm2, %v7196_v54 }
 0x2d6   : > { %11976 = vmatprep.mubr.msk.f32.mxu0 %vm324_vm2, %v7324_v12  ;;  %11983 = vmatpush3.msra.mxu1 %v7840_v56 }
 0x2d7   : > { %11996 = vmatpush3.msra.mxu0 %v7968_v29  ;;  %11984 = vmatprep.subr.mxu1 %v7839_v3 }
 0x2d8   : > { %11997 = vmatprep.subr.mxu0 %v7967_v42  ;;  %11964 = vmatmul.mubr.msk.f32.gmra.mxu1 %vm324_vm2, %v7197_v52 }
 0x2d9   : > { %11977 = vmatmul.mubr.msk.f32.gmra.mxu0 %vm324_vm2, %v7325_v59  ;;  %11966 = vmatprep.mubr.msk.f32.mxu1 %vm324_vm2, %v13848_v63 }
 0x2da   : > { %11979 = vmatprep.mubr.msk.f32.mxu0 %vm324_vm2, %v13849_v28  ;;  %11985 = vmatpush3.msra.mxu1 %v7839_v3 }
 0x2db   : > { %11998 = vmatpush3.msra.mxu0 %v7967_v42  ;;  %12008 = vmatprep.subr.mxu1 %v8096_v45 }
 0x2dc   : > { %11967 = vmatmul.mubr.msk.f32.gmra.mxu1 %vm324_vm2, %v13850_v15  ;;  %12021 = vmatprep.subr.mxu0 %v8257_v25 }
 0x2dd   : > { %11980 = vmatmul.mubr.msk.f32.gmra.mxu0 %vm324_vm2, %v13851_v27  ;;  %11986 = vmatprep.mubr.msk.f32.mxu1 %vm324_vm2, %v7068_v39 }
 0x2de   : > { %11999 = vmatprep.mubr.msk.f32.mxu0 %vm324_vm2, %v7196_v54 }
 0x2e0   : > { %11987 = vmatmul.mubr.msk.f32.vlgmr.msra.gmra.mxu1 %vm324_vm2, %v7069_v26 }
 0x2e1   : > { %12000 = vmatmul.mubr.msk.f32.vlgmr.msra.gmra.mxu0 %vm324_vm2, %v7197_v52  ;;  %11989 = vmatprep.mubr.msk.f32.mxu1 %vm324_vm2, %v13341_v21 }
 0x2e2   : > { %12009 = vmatpush3.msra.mxu1 %v8096_v45  ;;  %12002 = vmatprep.mubr.msk.f32.mxu0 %vm324_vm2, %v13848_v63 }
 0x2e3   : > { %12010 = vmatprep.subr.mxu1 %v8095_v22  ;;  %12022 = vmatpush3.msra.mxu0 %v8257_v25 }
 0x2e4   : > { %12011 = vmatpush3.msra.mxu1 %v8095_v22  ;;  %12023 = vmatprep.subr.mxu0 %v8256_v2 }
 0x2e5   : > { %11990 = vmatmul.mubr.msk.f32.gmra.mxu1 %vm324_vm2, %v13347_v47  ;;  %12003 = vmatmul.mubr.msk.f32.gmra.mxu0 %vm324_vm2, %v13850_v15 }
 0x2e6   : > { %11992 = vmatprep.mubr.msk.f32.mxu1 %vm324_vm2, %v13854_v14  ;;  %12005 = vmatprep.mubr.msk.f32.mxu0 %vm324_vm2, %v13855_v38 }
 0x2e7   : > { %12034 = vmatprep.subr.mxu1 %v8248_v18  ;;  %12024 = vmatpush3.msra.mxu0 %v8256_v2 }
 0x2e8   : > { %12047 = vmatprep.subr.mxu0 %v8492_v4 }
 0x2e9   : > { %11993 = vmatmul.mubr.msk.f32.gmra.mxu1 %vm324_vm2, %v13856_v57  ;;  %12006 = vmatmul.mubr.msk.f32.gmra.mxu0 %vm324_vm2, %v13857_v33 }
 0x2ea   : > { %12012 = vmatprep.mubr.msk.f32.mxu1 %vm324_vm2, %v7324_v12  ;;  %12025 = vmatprep.mubr.msk.f32.mxu0 %vm324_vm2, %v13858_v34 }
 0x2ed   : > { %12013 = vmatmul.mubr.msk.f32.vlgmr.msra.gmra.mxu1 %vm324_vm2, %v7325_v59  ;;  %12026 = vmatmul.mubr.msk.f32.vlgmr.msra.gmra.mxu0 %vm324_vm2, %v13864_v10 }
 0x2ee   : > { %12015 = vmatprep.mubr.msk.f32.mxu1 %vm324_vm2, %v13366_v51  ;;  %12035 = vmatpush3.msra.mxu1 %v8248_v18 }
 0x2ef   : > { %12036 = vmatprep.subr.mxu1 %v8247_v20  ;;  %12028 = vmatprep.mubr.msk.f32.mxu0 %vm324_vm2, %v13843_v32 }
 0x2f0   : > { %12037 = vmatpush3.msra.mxu1 %v8247_v20  ;;  %12048 = vmatpush3.msra.mxu0 %v8492_v4 }
 0x2f1   : > { %12016 = vmatmul.mubr.msk.f32.gmra.mxu1 %vm324_vm2, %v13371_v40  ;;  %12029 = vmatmul.mubr.msk.f32.gmra.mxu0 %vm324_vm2, %v13845_v24  ;;  %v11848_v24 = vpop.f32.mrf.mxu0 }
 0x2f2   : > { %12018 = vmatprep.mubr.msk.f32.mxu1 %vm324_vm2, %v13861_v9  ;;  %12060 = vmatprep.subr.mxu1 %v8620_v1 }
 0x2f3   : > { %12049 = vmatprep.subr.mxu0 %v8491_v50  ;;  %v6533_v35 = vpop.f32.mrf.mxu0 }
 0x2f4   : > { %12050 = vmatpush3.msra.mxu0 %v8491_v50 }
 0x2f5   : > { %12019 = vmatmul.mubr.msk.f32.gmra.mxu1 %vm324_vm2, %v13862_v36  ;;  %12073 = vmatprep.subr.mxu0 %v13393_v23 }
 0x2f6   : > { %12038 = vmatprep.mubr.msk.f32.mxu1 %vm324_vm2, %v13863_v61 }
 0x2f9   : > { %12039 = vmatmul.mubr.msk.f32.vlgmr.msra.gmra.mxu1 %vm324_vm2, %v13865_v17 }
 0x2fa   : > { %12041 = vmatprep.mubr.msk.f32.mxu1 %vm324_vm2, %v13835_v49  ;;  %12061 = vmatpush3.msra.mxu1 %v8620_v1  ;;  %v13396_v49 = vld [vmem:[#allocation5 + $0x238] sm:$0xff] }
 0x2fb   : > { %12062 = vmatprep.subr.mxu1 %v8619_v37  ;;  %13867 = vst [vmem:[#allocation33_spill] sm:$0xff] %v13396_v49 }
 0x2fc   : > { %12063 = vmatpush3.msra.mxu1 %v8619_v37 }
 0x2fd   : > { %12042 = vmatmul.mubr.msk.f32.gmra.mxu1 %vm324_vm2, %v13837_v8  ;;  %12086 = vmatprep.subr.mxu1 %v13396_v49  ;;  %v11832_v8 = vpop.f32.mrf.mxu1 }
 0x2fe   : > { %v6529_v2 = vadd.f32 %v11845_v44, %v11832_v8 }
 0x2ff   : > { %v6410_v62 = vpop.f32.mrf.mxu1 }
 0x300   : > { %v6524_v17 = vadd.f32 %v6523_v11, %v6410_v62 }
 0x301   : > { %v11835_v32 = vpop.f32.mrf.mxu1 }
 0x302   : > { %v6539_v37 = vadd.f32 %v11848_v24, %v11835_v32 }
 0x303   : > { %v6420_v43 = vpop.f32.mrf.mxu1 }
 0x304   : > { %v6534_v51 = vadd.f32 %v6533_v35, %v6420_v43 }
 0x360   : > { %v11838_v13 = vpop.f32.mrf.mxu1 }
 0x361   : > { %v11851_v30 = vpop.f32.mrf.mxu0 }
 0x362   : > { %v6430_v60 = vpop.f32.mrf.mxu1  ;;  %v6549_v23 = vadd.f32 %v11851_v30, %v11838_v13 }
 0x363   : > { %v6543_v46 = vpop.f32.mrf.mxu0 }
 0x364   : > { %v11858_v6 = vpop.f32.mrf.mxu1  ;;  %v6544_v62 = vadd.f32 %v6543_v46, %v6430_v60 }
 0x365   : > { %v11871_v7 = vpop.f32.mrf.mxu0  ;;  %v6675_v4 = vadd.f32 %v11858_v6, %v6529_v2 }
 0x366   : > { %v6645_v58 = vpop.f32.mrf.mxu1 }
 0x367   : > { %v6773_v53 = vpop.f32.mrf.mxu0  ;;  %v6674_v40 = vadd.f32 %v6645_v58, %v6524_v17  ;;  %v6803_v0 = vadd.f32 %v11871_v7, %v6675_v4 }
 0x368   : > { %v11861_v31 = vpop.f32.mrf.mxu1 }
 0x369   : > { %v11874_v39 = vpop.f32.mrf.mxu0  ;;  %v6677_v49 = vadd.f32 %v11861_v31, %v6539_v37  ;;  %v6802_v44 = vadd.f32 %v6773_v53, %v6674_v40 }
 0x36a   : > { %v6655_v54 = vpop.f32.mrf.mxu1 }
 0x36b   : > { %v6783_v19 = vpop.f32.mrf.mxu0  ;;  %v6676_v41 = vadd.f32 %v6655_v54, %v6534_v51  ;;  %v6805_v32 = vadd.f32 %v11874_v39, %v6677_v49 }
 0x36c   : > { %v11864_v26 = vpop.f32.mrf.mxu1 }
 0x36d   : > { %v11877_v52 = vpop.f32.mrf.mxu0  ;;  %v6679_v11 = vadd.f32 %v11864_v26, %v6549_v23  ;;  %v6804_v43 = vadd.f32 %v6783_v19, %v6676_v41 }
 0x36e   : > { %v6665_v5 = vpop.f32.mrf.mxu1 }
 0x36f   : > { %v13399_v55 = vpop.f32.mrf.mxu0  ;;  %v6678_v35 = vadd.f32 %v6665_v5, %v6544_v62  ;;  %v6807_v13 = vadd.f32 %v11877_v52, %v6679_v11 }
 0x370   : > { %v11884_v12 = vpop.f32.mrf.mxu1 }
 0x371   : > { %v11897_v56 = vpop.f32.mrf.mxu0 }
 0x372   : > { %v6901_v29 = vpop.f32.mrf.mxu1 }
 0x373   : > { %v7029_v48 = vpop.f32.mrf.mxu0  ;;  %v6930_v24 = vadd.f32 %v6901_v29, %v6802_v44 }
 0x374   : > { %v11887_v59 = vpop.f32.mrf.mxu1 }
 0x375   : > { %v11900_v16 = vpop.f32.mrf.mxu0  ;;  %v6933_v31 = vadd.f32 %v11887_v59, %v6805_v32  ;;  %v7058_v4 = vadd.f32 %v7029_v48, %v6930_v24 }
 0x376   : > { %v6911_v3 = vpop.f32.mrf.mxu1 }
 0x377   : > { %v7039_v42 = vpop.f32.mrf.mxu0  ;;  %v6932_v51 = vadd.f32 %v6911_v3, %v6804_v43  ;;  %v7061_v53 = vadd.f32 %v11900_v16, %v6933_v31 }
 0x378   : > { %v11890_v45 = vpop.f32.mrf.mxu1 }
 0x379   : > { %v13401_v63 = vpop.f32.mrf.mxu0  ;;  %v6935_v23 = vadd.f32 %v11890_v45, %v6807_v13  ;;  %v7060_v39 = vadd.f32 %v7039_v42, %v6932_v51 }
 0x37a   : > { %v6921_v28 = vpop.f32.mrf.mxu1 }
 0x37b   : > { %v13403_v15 = vpop.f32.mrf.mxu0  ;;  %v7063_v52 = vadd.f32 %v13401_v63, %v6935_v23 }
 0x37c   : > { %v11910_v27 = vpop.f32.mrf.mxu1 }
 0x37d   : > { %v11923_v22 = vpop.f32.mrf.mxu0 }
 0x37e   : > { %v7157_v14 = vpop.f32.mrf.mxu1 }
 0x37f   : > { %v13405_v38 = vpop.f32.mrf.mxu0  ;;  %v7186_v49 = vadd.f32 %v7157_v14, %v7058_v4 }
 0x380   : > { %v11913_v57 = vpop.f32.mrf.mxu1 }
 0x381   : > { %v13407_v33 = vpop.f32.mrf.mxu0  ;;  %v7314_v48 = vadd.f32 %v13405_v38, %v7186_v49 }
 0x382   : > { %v7167_v34 = vpop.f32.mrf.mxu1 }
 0x383   : > { %v13409_v9 = vpop.f32.mrf.mxu0 }
 0x384   : > { %v11916_v36 = vpop.f32.mrf.mxu1 }
 0x385   : > { %v13411_v61 = vpop.f32.mrf.mxu0  ;;  %v7191_v45 = vadd.f32 %v11916_v36, %v7063_v52 }
 0x386   : > { %13868 = vst [vmem:[#allocation34_spill] sm:$0xff] %v13411_v61  ;;  %v13413_v25 = vpop.f32.mrf.mxu1  ;;  %v6931_v61 = vadd.f32 %v11884_v12, %v6803_v0  ;;  %v6806_v0 = vadd.f32 %v13399_v55, %v6678_v35  ;;  %v7189_v12 = vadd.f32 %v11913_v57, %v7061_v53 }
 0x387   : > { %v13415_v18 = vpop.f32.mrf.mxu0 }
 0x388   : > { %13869 = vst [vmem:[#allocation16_spill] sm:$0xff] %v13415_v18  ;;  %v11936_v20 = vpop.f32.mrf.mxu1  ;;  %v7059_v7 = vadd.f32 %v11897_v56, %v6931_v61  ;;  %v6934_v41 = vadd.f32 %v6921_v28, %v6806_v0  ;;  %v7188_v56 = vadd.f32 %v7167_v34, %v7060_v39  ;;  %v7317_v42 = vadd.f32 %v13407_v33, %v7189_v12 }
 0x389   : > { %v13417_v10 = vpop.f32.mrf.mxu0 }
 0x38a   : > { %v7413_v1 = vpop.f32.mrf.mxu1  ;;  %v7187_v40 = vadd.f32 %v11910_v27, %v7059_v7  ;;  %v7062_v55 = vadd.f32 %v13403_v15, %v6934_v41  ;;  %v7316_v14 = vadd.f32 %v13409_v9, %v7188_v56 }
 0x38b   : > { %v13419_v50 = vpop.f32.mrf.mxu0  ;;  %v7442_v28 = vadd.f32 %v7413_v1, %v7314_v48 }
 0x38c   : > { %v11939_v47 = vpop.f32.mrf.mxu1  ;;  %v7315_v5 = vadd.f32 %v11923_v22, %v7187_v40  ;;  %v7190_v22 = vadd.f32 %v13413_v25, %v7062_v55 }
 0x38d   : > { %v13421_v21 = vpop.f32.mrf.mxu0  ;;  %v7445_v61 = vadd.f32 %v11939_v47, %v7317_v42  ;;  %v13870_v37 = vld [vmem:[#allocation34_spill] sm:$0xff]  ;;  %v7570_v36 = vadd.f32 %v13419_v50, %v7442_v28 }
 0x38e   : > { %v7423_v18 = vpop.f32.mrf.mxu1  ;;  %v7443_v3 = vadd.f32 %v11936_v20, %v7315_v5  ;;  %v7319_v38 = vadd.f32 %v13870_v37, %v7191_v45 }
 0x38f   : > { %v13423_v8 = vpop.f32.mrf.mxu0  ;;  %v7444_v20 = vadd.f32 %v7423_v18, %v7316_v14  ;;  %v13871_v11 = vld [vmem:[#allocation16_spill] sm:$0xff]  ;;  %v7573_v9 = vadd.f32 %v13421_v21, %v7445_v61 }
 0x390   : > { %v11942_v6 = vpop.f32.mrf.mxu1  ;;  %v7571_v34 = vadd.f32 %v13417_v10, %v7443_v3  ;;  %v7318_v33 = vadd.f32 %v13871_v11, %v7190_v22  ;;  %v8484_v11 = vld [vmem:[#allocation2 + $0x2] sm:$0xff] }
 0x391   : > { %v13425_v2 = vpop.f32.mrf.mxu0  ;;  %v7447_v1 = vadd.f32 %v11942_v6, %v7319_v38  ;;  %v7572_v43 = vadd.f32 %v13423_v8, %v7444_v20 }
 0x392   : > { %v7433_v58 = vpop.f32.mrf.mxu1 }
 0x393   : > { %v7561_v17 = vpop.f32.mrf.mxu0  ;;  %v7446_v10 = vadd.f32 %v7433_v58, %v7318_v33  ;;  %v7575_v31 = vadd.f32 %v13425_v2, %v7447_v1 }
 0x394   : > { %v11962_v30 = vpop.f32.mrf.mxu1 }
 0x395   : > { %v11975_v54 = vpop.f32.mrf.mxu0  ;;  %v7699_v62 = vadd.f32 %v11962_v30, %v7571_v34  ;;  %v7574_v4 = vadd.f32 %v7561_v17, %v7446_v10  ;;  %v12277_v10 = vld [vmem:[#allocation2 + $0x20] sm:$0xff] }
 0x396   : > { %v7669_v60 = vpop.f32.mrf.mxu1 }
 0x397   : > { %v7797_v46 = vpop.f32.mrf.mxu0  ;;  %v7698_v25 = vadd.f32 %v7669_v60, %v7570_v36  ;;  %v7827_v35 = vadd.f32 %v11975_v54, %v7699_v62 }
 0x398   : > { %v11965_v19 = vpop.f32.mrf.mxu1 }
 0x399   : > { %v11978_v26 = vpop.f32.mrf.mxu0  ;;  %v7701_v7 = vadd.f32 %v11965_v19, %v7573_v9  ;;  %v7826_v51 = vadd.f32 %v7797_v46, %v7698_v25 }
 0x39a   : > { %v7679_v29 = vpop.f32.mrf.mxu1 }
 0x39b   : > { %v7807_v59 = vpop.f32.mrf.mxu0  ;;  %v7700_v13 = vadd.f32 %v7679_v29, %v7572_v43  ;;  %v7829_v0 = vadd.f32 %v11978_v26, %v7701_v7  ;;  %v8485_v43 = vld [vmem:[#allocation2 + $0xa] sm:$0xff] }
 0x39c   : > { %v11968_v27 = vpop.f32.mrf.mxu1  ;;  %v13872_v7 = vld [vmem:[#allocation35_spill] sm:$0xff] }
 0x39d   : > { %v11981_v16 = vpop.f32.mrf.mxu0  ;;  %v7703_v6 = vadd.f32 %v11968_v27, %v7575_v31  ;;  %v7828_v60 = vadd.f32 %v7807_v59, %v7700_v13  ;;  %v13874_v31 = vld [vmem:[#allocation33_spill] sm:$0xff]  ;;  %v9004_v13 = vld [vmem:[#allocation5 + $0x248] sm:$0xff] }
 0x39e   : > { %v7689_v57 = vpop.f32.mrf.mxu1 }
 0x39f   : > { %v7817_v63 = vpop.f32.mrf.mxu0  ;;  %v7702_v53 = vadd.f32 %v7689_v57, %v7574_v4  ;;  %v7831_v54 = vadd.f32 %v11981_v16, %v7703_v6  ;;  %v9132_v4 = vld [vmem:[#allocation5 + $0x258] sm:$0xff]  ;;  %v8740_v6 = vld [vmem:[#allocation2 + $0x19] sm:$0xff] }
 0x3a0   : > { %v11988_v44 = vpop.f32.mrf.mxu1 }
 0x3a1   : > { %v12001_v15 = vpop.f32.mrf.mxu0  ;;  %v7955_v30 = vadd.f32 %v11988_v44, %v7827_v35  ;;  %v7830_v12 = vadd.f32 %v7817_v63, %v7702_v53  ;;  %v8875_v35 = vld [vmem:[#allocation5 + $0x230] sm:$0xff]  ;;  %v9260_v53 = vld [vmem:[#allocation5 + $0x268] sm:$0xff] }
 0x3a2   : > { %v7925_v32 = vpop.f32.mrf.mxu1 }
 0x3a3   : > { %v8053_v24 = vpop.f32.mrf.mxu0  ;;  %v7954_v21 = vadd.f32 %v7925_v32, %v7826_v51  ;;  %v8083_v58 = vadd.f32 %v12001_v15, %v7955_v30 }
 0x3a5   : > { %v11991_v47 = vpop.f32.mrf.mxu1  ;;  %v12004_v18 = vpop.f32.mrf.mxu0  ;;  %v8082_v19 = vadd.f32 %v8053_v24, %v7954_v21  ;;  %v12276_v24 = vld [vmem:[#allocation2 + $0x18] sm:$0xff]  ;;  %v8741_v21 = vld [vmem:[#allocation2 + $0x21] sm:$0xff] }
 0x3a6   : > { %v7957_v49 = vadd.f32 %v11991_v47, %v7829_v0  ;;  %v8747_v47 = vld [vmem:[#allocation5 + $0x220] sm:$0xff] }
 0x3a7   : > { %v7935_v50 = vpop.f32.mrf.mxu1  ;;  %v8063_v23 = vpop.f32.mrf.mxu0 }
 0x3a8   : > { %v7956_v39 = vadd.f32 %v7935_v50, %v7828_v60  ;;  %v8085_v17 = vadd.f32 %v12004_v18, %v7957_v49  ;;  %v13873_v18 = vld [vmem:[#allocation18_spill] sm:$0xff]  ;;  %v13875_v50 = vld [vmem:[#allocation36_spill] sm:$0xff]  ;;  %v9131_v60 = vld [vmem:[#allocation5 + $0x250] sm:$0xff] }
 0x3a9   : > { %v11994_v40 = vpop.f32.mrf.mxu1  ;;  %v12007_v2 = vpop.f32.mrf.mxu0  ;;  %v9388_v49 = vld [vmem:[#allocation5 + $0x278] sm:$0xff] }
 0x3aa   : > { %v7959_v46 = vadd.f32 %v11994_v40, %v7831_v54  ;;  %v8084_v29 = vadd.f32 %v8063_v23, %v7956_v39  ;;  %v9003_v23 = vld [vmem:[#allocation5 + $0x240] sm:$0xff] }
 0x3ab   : > { %v7945_v8 = vpop.f32.mrf.mxu1  ;;  %v8073_v3 = vpop.f32.mrf.mxu0 }
 0x3ac   : > { %v7958_v48 = vadd.f32 %v7945_v8, %v7830_v12  ;;  %v8087_v16 = vadd.f32 %v12007_v2, %v7959_v46  ;;  %v9516_v2 = vld [vmem:[#allocation5 + $0x288] sm:$0xff]  ;;  %v9644_v46 = vld [vmem:[#allocation5 + $0x298] sm:$0xff] }
 0x3ad   : > { %v12014_v41 = vpop.f32.mrf.mxu1 }
 0x3ae   : > { %v8211_v5 = vadd.f32 %v12014_v41, %v8083_v58  ;;  %v8086_v57 = vadd.f32 %v8073_v3, %v7958_v48  ;;  %v9259_v41 = vld [vmem:[#allocation5 + $0x260] sm:$0xff]  ;;  %v9772_v48 = vld [vmem:[#allocation5 + $0x2a8] sm:$0xff]  ;;  %v13876_v3 = vld [vmem:[#allocation13_spill] sm:$0xff] }
 0x3af   : > { %v8181_v52 = vpop.f32.mrf.mxu1 }
 0x3b0   : > { %vm8217_vm5 = vcmp.gt.f32.partialorder %v8211_v5, 0.0  ;;  %v8223_v56 = vmul.f32 0.1, %v8211_v5  ;;  %v8210_v26 = vadd.f32 %v8181_v52, %v8082_v19  ;;  %v9387_v19 = vld [vmem:[#allocation5 + $0x270] sm:$0xff] }
 0x3b1   : > { %v12017_v59 = vpop.f32.mrf.mxu1 }
 0x3b2   : > { %v8229_v55 = vsel %vm8217_vm5, %v8211_v5, %v8223_v56  ;;  %vm8216_vm6 = vcmp.gt.f32.partialorder %v8210_v26, 0.0  ;;  %v8222_v45 = vmul.f32 0.1, %v8210_v26  ;;  %v8213_v27 = vadd.f32 %v12017_v59, %v8085_v17  ;;  %v9515_v56 = vld [vmem:[#allocation5 + $0x280] sm:$0xff]  ;;  %v9900_v59 = vld [vmem:[#allocation5 + $0x2b8] sm:$0xff] }
 0x3b3   : > { %8235 = vst.msk [vmem:[#allocation2 + $0x39] sm:$0xff] %vm324_vm2, %v8229_v55  ;;  %v8191_v42 = vpop.f32.mrf.mxu1 }
 0x3b4   : > { %v8228_v28 = vsel %vm8216_vm6, %v8210_v26, %v8222_v45  ;;  %vm8219_vm7 = vcmp.gt.f32.partialorder %v8213_v27, 0.0  ;;  %v8225_v14 = vmul.f32 0.1, %v8213_v27  ;;  %v8212_v22 = vadd.f32 %v8191_v42, %v8084_v29  ;;  %v9643_v26 = vld [vmem:[#allocation5 + $0x290] sm:$0xff]  ;;  %v13877_v45 = vld [vmem:[#allocation30_spill] sm:$0xff] }
 0x3b5   : > { %8234 = vst.msk [vmem:[#allocation2 + $0x31] sm:$0xff] %vm324_vm2, %v8228_v28  ;;  %v12020_v63 = vpop.f32.mrf.mxu1  ;;  %v9512_v42 = vld [vmem:[#allocation2 + $0x79] sm:$0xff] }
 0x3b6   : > { %v8231_v34 = vsel %vm8219_vm7, %v8213_v27, %v8225_v14  ;;  %vm8218_vm8 = vcmp.gt.f32.partialorder %v8212_v22, 0.0  ;;  %v8224_v61 = vmul.f32 0.1, %v8212_v22  ;;  %v8215_v37 = vadd.f32 %v12020_v63, %v8087_v16  ;;  %v9771_v27 = vld [vmem:[#allocation5 + $0x2a0] sm:$0xff]  ;;  %v9899_v16 = vld [vmem:[#allocation5 + $0x2b0] sm:$0xff]  ;;  %v10028_v28 = vld [vmem:[#allocation5 + $0x2c8] sm:$0xff] }
 0x3b7   : > { %8237 = vst.msk [vmem:[#allocation2 + $0x51] sm:$0xff] %vm324_vm2, %v8231_v34  ;;  %v8201_v38 = vpop.f32.mrf.mxu1  ;;  %v13878_v14 = vld [vmem:[#allocation17_spill] sm:$0xff]  ;;  %v13880_v63 = vld [vmem:[#allocation32_spill] sm:$0xff]  ;;  %v10027_v34 = vld [vmem:[#allocation5 + $0x2c0] sm:$0xff] }
 0x3b8   : > { %v8230_v20 = vsel %vm8218_vm8, %v8212_v22, %v8224_v61  ;;  %vm8221_vm9 = vcmp.gt.f32.partialorder %v8215_v37, 0.0  ;;  %v8227_v44 = vmul.f32 0.1, %v8215_v37  ;;  %v8214_v15 = vadd.f32 %v8201_v38, %v8086_v57  ;;  %v9513_v22 = vld [vmem:[#allocation2 + $0x81] sm:$0xff]  ;;  %v9768_v61 = vld [vmem:[#allocation2 + $0x90] sm:$0xff]  ;;  %v9769_v38 = vld [vmem:[#allocation2 + $0x98] sm:$0xff] }
 0x3b9   : > { %8236 = vst.msk [vmem:[#allocation2 + $0x49] sm:$0xff] %vm324_vm2, %v8230_v20  ;;  %v13879_v57 = vmov 0.0   ;;  %v9897_v20 = vld [vmem:[#allocation2 + $0x99] sm:$0xff] }
 0x3ba   : > { %v8233_v36 = vsel %vm8221_vm9, %v8215_v37, %v8227_v44  ;;  %vm8220_vm10 = vcmp.gt.f32.partialorder %v8214_v15, 0.0  ;;  %v8226_v62 = vmul.f32 0.1, %v8214_v15  ;;  %v13457_v25 = vld [vmem:[#allocation2 + $0x39] sm:$0xff]  ;;  %v9896_v37 = vld [vmem:[#allocation2 + $0x91] sm:$0xff] }
 0x3bb   : > { %8239 = vst.msk [vmem:[#allocation2 + $0x69] sm:$0xff] %vm324_vm2, %v8233_v36  ;;  %v13485_v40 = vld [vmem:[#allocation2 + $0x3a] sm:$0xff]  ;;  %v10024_v44 = vld [vmem:[#allocation2 + $0x92] sm:$0xff]  ;;  %v12027_v36 = vpop.f32.mrf.mxu0 }
 0x3bc   : > { %v8232_v33 = vsel %vm8220_vm10, %v8214_v15, %v8226_v62  ;;  %v13446_v1 = vld [vmem:[#allocation2 + $0x31] sm:$0xff]  ;;  %v10025_v15 = vld [vmem:[#allocation2 + $0x9a] sm:$0xff]  ;;  %v12040_v62 = vpop.f32.mrf.mxu1 }
 0x3bd   : > { %v13448_v32 = vld [vmem:[#allocation2 + $0x30] sm:$0xff]  ;;  %v13450_v9 = vld [vmem:[#allocation2 + $0x38] sm:$0xff]  ;;  %8238 = vst.msk [vmem:[#allocation2 + $0x61] sm:$0xff] %vm324_vm2, %v8232_v33  ;;  %12031 = vmatprep.mubr.msk.f32.mxu0 %vm324_vm2, %v13446_v1 }
 0x3be   : > { %12044 = vmatprep.mubr.msk.f32.mxu1 %vm324_vm2, %v13448_v32  ;;  %12032 = vmatmul.mubr.msk.f32.gmra.mxu0 %vm324_vm2, %v13457_v25  ;;  %v13477_v51 = vld [vmem:[#allocation2 + $0x32] sm:$0xff]  ;;  %v13611_v33 = vpop.f32.mrf.mxu1 }
 0x3bf   : > { %12045 = vmatmul.mubr.msk.f32.gmra.mxu1 %vm324_vm2, %v13450_v9  ;;  %12051 = vmatprep.mubr.msk.f32.mxu0 %vm324_vm2, %v8484_v11  ;;  %v8745_v54 = vld [vmem:[#allocation2 + $0x51] sm:$0xff]  ;;  %v13609_v11 = vpop.f32.mrf.mxu0 }
 0x3c0   : > { %12064 = vmatprep.mubr.msk.f32.mxu1 %vm324_vm2, %v12276_v24  ;;  %v13479_v30 = vld [vmem:[#allocation2 + $0x48] sm:$0xff]  ;;  %v13487_v0 = vld [vmem:[#allocation2 + $0x50] sm:$0xff] }
 0x3c1   : > { %v13507_v8 = vld [vmem:[#allocation2 + $0x49] sm:$0xff]  ;;  %v8873_v39 = vld [vmem:[#allocation2 + $0x52] sm:$0xff] }
 0x3c2   : > { %12052 = vmatmul.mubr.msk.f32.vlgmr.msra.gmra.mxu0 %vm324_vm2, %v8485_v43  ;;  %v13509_v58 = vld [vmem:[#allocation2 + $0x4a] sm:$0xff] }
 0x3c3   : > { %12065 = vmatmul.mubr.msk.f32.vlgmr.msra.gmra.mxu1 %vm324_vm2, %v12277_v10  ;;  %12054 = vmatprep.mubr.msk.f32.mxu0 %vm324_vm2, %v13872_v7  ;;  %v9129_v17 = vld [vmem:[#allocation2 + $0x69] sm:$0xff] }
 0x3c4   : > { %12067 = vmatprep.mubr.msk.f32.mxu1 %vm324_vm2, %v13448_v32  ;;  %12074 = vmatpush3.msra.mxu0 %v13873_v18  ;;  %v13532_v5 = vld [vmem:[#allocation2 + $0x60] sm:$0xff]  ;;  %v9001_v52 = vld [vmem:[#allocation2 + $0x68] sm:$0xff] }
 0x3c5   : > { %12087 = vmatpush3.msra.mxu1 %v13874_v31  ;;  %12075 = vmatprep.subr.mxu0 %v8747_v47  ;;  %v13534_v12 = vld [vmem:[#allocation2 + $0x61] sm:$0xff]  ;;  %v9257_v55 = vld [vmem:[#allocation2 + $0x6a] sm:$0xff] }
 0x3c6   : > { %12088 = vmatprep.subr.mxu1 %v8875_v35  ;;  %12055 = vmatmul.mubr.msk.f32.gmra.mxu0 %vm324_vm2, %v13875_v50  ;;  %v9256_v29 = vld [vmem:[#allocation2 + $0x62] sm:$0xff] }
 0x3c7   : > { %12068 = vmatmul.mubr.msk.f32.gmra.mxu1 %vm324_vm2, %v13450_v9  ;;  %12057 = vmatprep.mubr.msk.f32.mxu0 %vm324_vm2, %v13477_v51 }
 0x3c8   : > { %12070 = vmatprep.mubr.msk.f32.mxu1 %vm324_vm2, %v13479_v30  ;;  %12076 = vmatpush3.msra.mxu0 %v8747_v47 }
 0x3c9   : > { %12089 = vmatpush3.msra.mxu1 %v8875_v35  ;;  %12099 = vmatprep.subr.mxu0 %v9004_v13 }
 0x3ca   : > { %12112 = vmatprep.subr.mxu1 %v9132_v4  ;;  %12058 = vmatmul.mubr.msk.f32.gmra.mxu0 %vm324_vm2, %v13485_v40 }
 0x3cb   : > { %12071 = vmatmul.mubr.msk.f32.gmra.mxu1 %vm324_vm2, %v13487_v0  ;;  %12077 = vmatprep.mubr.msk.f32.mxu0 %vm324_vm2, %v8740_v6 }
 0x3cc   : > { %12090 = vmatprep.mubr.msk.f32.mxu1 %vm324_vm2, %v13872_v7 }
 0x3ce   : > { %12078 = vmatmul.mubr.msk.f32.vlgmr.msra.gmra.mxu0 %vm324_vm2, %v8741_v21 }
 0x3cf   : > { %12091 = vmatmul.mubr.msk.f32.vlgmr.msra.gmra.mxu1 %vm324_vm2, %v13875_v50  ;;  %12080 = vmatprep.mubr.msk.f32.mxu0 %vm324_vm2, %v13446_v1 }
 0x3d0   : > { %12093 = vmatprep.mubr.msk.f32.mxu1 %vm324_vm2, %v13477_v51  ;;  %12100 = vmatpush3.msra.mxu0 %v9004_v13 }
 0x3d1   : > { %12113 = vmatpush3.msra.mxu1 %v9132_v4  ;;  %12101 = vmatprep.subr.mxu0 %v9003_v23 }
 0x3d2   : > { %12114 = vmatprep.subr.mxu1 %v9131_v60  ;;  %12081 = vmatmul.mubr.msk.f32.gmra.mxu0 %vm324_vm2, %v13457_v25 }
 0x3d3   : > { %12094 = vmatmul.mubr.msk.f32.gmra.mxu1 %vm324_vm2, %v13485_v40  ;;  %12083 = vmatprep.mubr.msk.f32.mxu0 %vm324_vm2, %v13507_v8 }
 0x3d4   : > { %12096 = vmatprep.mubr.msk.f32.mxu1 %vm324_vm2, %v13509_v58  ;;  %12102 = vmatpush3.msra.mxu0 %v9003_v23 }
 0x3d5   : > { %12115 = vmatpush3.msra.mxu1 %v9131_v60  ;;  %12125 = vmatprep.subr.mxu0 %v9260_v53 }
 0x3d6   : > { %12138 = vmatprep.subr.mxu1 %v9388_v49  ;;  %12084 = vmatmul.mubr.msk.f32.gmra.mxu0 %vm324_vm2, %v8745_v54 }
 0x3d7   : > { %12097 = vmatmul.mubr.msk.f32.gmra.mxu1 %vm324_vm2, %v8873_v39  ;;  %12103 = vmatprep.mubr.msk.f32.mxu0 %vm324_vm2, %v13448_v32  ;;  %v12043_v32 = vpop.f32.mrf.mxu1 }
 0x3d8   : > { %12116 = vmatprep.mubr.msk.f32.mxu1 %vm324_vm2, %v13446_v1  ;;  %v12030_v1 = vpop.f32.mrf.mxu0 }
 0x3da   : > { %12104 = vmatmul.mubr.msk.f32.vlgmr.msra.gmra.mxu0 %vm324_vm2, %v13450_v9  ;;  %v8352_v9 = vpop.f32.mrf.mxu0 }
 0x3db   : > { %12117 = vmatmul.mubr.msk.f32.vlgmr.msra.gmra.mxu1 %vm324_vm2, %v13457_v25  ;;  %12106 = vmatprep.mubr.msk.f32.mxu0 %vm324_vm2, %v13479_v30  ;;  %v8465_v25 = vpop.f32.mrf.mxu1 }
 0x3dc   : > { %12119 = vmatprep.mubr.msk.f32.mxu1 %vm324_vm2, %v13507_v8  ;;  %12126 = vmatpush3.msra.mxu0 %v9260_v53 }
 0x3dd   : > { %12139 = vmatpush3.msra.mxu1 %v9388_v49  ;;  %12127 = vmatprep.subr.mxu0 %v9259_v41 }
 0x3de   : > { %12140 = vmatprep.subr.mxu1 %v9387_v19  ;;  %12107 = vmatmul.mubr.msk.f32.gmra.mxu0 %vm324_vm2, %v13487_v0 }
 0x3df   : > { %12120 = vmatmul.mubr.msk.f32.gmra.mxu1 %vm324_vm2, %v8745_v54  ;;  %12109 = vmatprep.mubr.msk.f32.mxu0 %vm324_vm2, %v13532_v5 }
 0x3e0   : > { %12122 = vmatprep.mubr.msk.f32.mxu1 %vm324_vm2, %v13534_v12  ;;  %12128 = vmatpush3.msra.mxu0 %v9259_v41 }
 0x3e1   : > { %12141 = vmatpush3.msra.mxu1 %v9387_v19  ;;  %12151 = vmatprep.subr.mxu0 %v9516_v2 }
 0x3e2   : > { %12164 = vmatprep.subr.mxu1 %v9644_v46  ;;  %12110 = vmatmul.mubr.msk.f32.gmra.mxu0 %vm324_vm2, %v9001_v52 }
 0x3e3   : > { %12123 = vmatmul.mubr.msk.f32.gmra.mxu1 %vm324_vm2, %v9129_v17  ;;  %12129 = vmatprep.mubr.msk.f32.mxu0 %vm324_vm2, %v13477_v51 }
 0x3e4   : > { %12142 = vmatprep.mubr.msk.f32.mxu1 %vm324_vm2, %v13479_v30 }
 0x3e6   : > { %12130 = vmatmul.mubr.msk.f32.vlgmr.msra.gmra.mxu0 %vm324_vm2, %v13485_v40 }
 0x3e7   : > { %12143 = vmatmul.mubr.msk.f32.vlgmr.msra.gmra.mxu1 %vm324_vm2, %v13487_v0  ;;  %12132 = vmatprep.mubr.msk.f32.mxu0 %vm324_vm2, %v13509_v58 }
 0x3e8   : > { %12145 = vmatprep.mubr.msk.f32.mxu1 %vm324_vm2, %v13532_v5  ;;  %12152 = vmatpush3.msra.mxu0 %v9516_v2 }
 0x3e9   : > { %12165 = vmatpush3.msra.mxu1 %v9644_v46  ;;  %12153 = vmatprep.subr.mxu0 %v9515_v56 }
 0x3ea   : > { %12166 = vmatprep.subr.mxu1 %v9643_v26  ;;  %12133 = vmatmul.mubr.msk.f32.gmra.mxu0 %vm324_vm2, %v8873_v39 }
 0x3eb   : > { %12146 = vmatmul.mubr.msk.f32.gmra.mxu1 %vm324_vm2, %v9001_v52  ;;  %12135 = vmatprep.mubr.msk.f32.mxu0 %vm324_vm2, %v9256_v29 }
 0x3ec   : > { %12148 = vmatprep.mubr.msk.f32.mxu1 %vm324_vm2, %v13876_v3  ;;  %12154 = vmatpush3.msra.mxu0 %v9515_v56 }
 0x3ed   : > { %12167 = vmatpush3.msra.mxu1 %v9643_v26  ;;  %12177 = vmatprep.subr.mxu0 %v9772_v48 }
 0x3ee   : > { %12190 = vmatprep.subr.mxu1 %v9900_v59  ;;  %12136 = vmatmul.mubr.msk.f32.gmra.mxu0 %vm324_vm2, %v9257_v55 }
 0x3ef   : > { %12149 = vmatmul.mubr.msk.f32.gmra.mxu1 %vm324_vm2, %v13877_v45  ;;  %12155 = vmatprep.mubr.msk.f32.mxu0 %vm324_vm2, %v13507_v8 }
 0x3f0   : > { %12168 = vmatprep.mubr.msk.f32.mxu1 %vm324_vm2, %v13509_v58 }
 0x3f2   : > { %12156 = vmatmul.mubr.msk.f32.vlgmr.msra.gmra.mxu0 %vm324_vm2, %v8745_v54 }
 0x3f3   : > { %12169 = vmatmul.mubr.msk.f32.vlgmr.msra.gmra.mxu1 %vm324_vm2, %v8873_v39  ;;  %12158 = vmatprep.mubr.msk.f32.mxu0 %vm324_vm2, %v13534_v12 }
 0x3f4   : > { %12171 = vmatprep.mubr.msk.f32.mxu1 %vm324_vm2, %v9256_v29  ;;  %12178 = vmatpush3.msra.mxu0 %v9772_v48 }
 0x3f5   : > { %12191 = vmatpush3.msra.mxu1 %v9900_v59  ;;  %12179 = vmatprep.subr.mxu0 %v9771_v27 }
 0x3f6   : > { %12192 = vmatprep.subr.mxu1 %v9899_v16  ;;  %12159 = vmatmul.mubr.msk.f32.gmra.mxu0 %vm324_vm2, %v9129_v17 }
 0x3f7   : > { %12172 = vmatmul.mubr.msk.f32.gmra.mxu1 %vm324_vm2, %v9257_v55  ;;  %12161 = vmatprep.mubr.msk.f32.mxu0 %vm324_vm2, %v9512_v42 }
 0x3f8   : > { %12174 = vmatprep.mubr.msk.f32.mxu1 %vm324_vm2, %v13878_v14  ;;  %12180 = vmatpush3.msra.mxu0 %v9771_v27 }
 0x3f9   : > { %12193 = vmatpush3.msra.mxu1 %v9899_v16  ;;  %12203 = vmatprep.subr.mxu0 %v10028_v28 }
 0x3fa   : > { %12216 = vmatprep.subr.mxu1 %v13879_v57  ;;  %12162 = vmatmul.mubr.msk.f32.gmra.mxu0 %vm324_vm2, %v9513_v22 }
 0x3fb   : > { %12175 = vmatmul.mubr.msk.f32.gmra.mxu1 %vm324_vm2, %v13880_v63  ;;  %12181 = vmatprep.mubr.msk.f32.mxu0 %vm324_vm2, %v13532_v5 }
 0x3fc   : > { %12194 = vmatprep.mubr.msk.f32.mxu1 %vm324_vm2, %v13534_v12 }
 0x3fe   : > { %12182 = vmatmul.mubr.msk.f32.vlgmr.msra.gmra.mxu0 %vm324_vm2, %v9001_v52 }
 0x3ff   : > { %12195 = vmatmul.mubr.msk.f32.vlgmr.msra.gmra.mxu1 %vm324_vm2, %v9129_v17  ;;  %12184 = vmatprep.mubr.msk.f32.mxu0 %vm324_vm2, %v13876_v3 }
 0x400   : > { %12204 = vmatpush3.msra.mxu0 %v10028_v28  ;;  %12197 = vmatprep.mubr.msk.f32.mxu1 %vm324_vm2, %v9512_v42  ;;  %v8471_v28 = vadd.f32 %v12043_v32, %v12030_v1  ;;  %v8456_v1 = vadd.f32 %v13611_v33, %v13609_v11 }
 0x401   : > { %12205 = vmatprep.subr.mxu0 %v10027_v34 }
 0x402   : > { %12206 = vmatpush3.msra.mxu0 %v10027_v34 }
 0x403   : > { %12185 = vmatmul.mubr.msk.f32.gmra.mxu0 %vm324_vm2, %v13877_v45  ;;  %12198 = vmatmul.mubr.msk.f32.gmra.mxu1 %vm324_vm2, %v9513_v22 }
 0x404   : > { %12187 = vmatprep.mubr.msk.f32.mxu0 %vm324_vm2, %v9768_v61  ;;  %12200 = vmatprep.mubr.msk.f32.mxu1 %vm324_vm2, %v9896_v37  ;;  %v8461_v61 = vadd.f32 %v12040_v62, %v12027_v36 }
 0x405   : > { %12230 = vmatprep.subr.mxu0 %v13879_v57 }
 0x407   : > { %12188 = vmatmul.mubr.msk.f32.gmra.mxu0 %vm324_vm2, %v9769_v38  ;;  %12201 = vmatmul.mubr.msk.f32.gmra.mxu1 %vm324_vm2, %v9897_v20 }
 0x408   : > { %12207 = vmatprep.mubr.msk.f32.mxu0 %vm324_vm2, %v9256_v29  ;;  %12220 = vmatprep.mubr.msk.f32.mxu1 %vm12351_vm0, %v13879_v57 }
 0x40b   : > { %12208 = vmatmul.mubr.msk.f32.vlgmr.msra.gmra.mxu0 %vm324_vm2, %v9257_v55 }
 0x40c   : > { %12210 = vmatprep.mubr.msk.f32.mxu0 %vm324_vm2, %v13878_v14 }
 0x40f   : > { %12211 = vmatmul.mubr.msk.f32.gmra.mxu0 %vm324_vm2, %v13880_v63  ;;  %v8466_v63 = vadd.f32 %v8465_v25, %v8352_v9 }
 0x410   : > { %12213 = vmatprep.mubr.msk.f32.mxu0 %vm324_vm2, %v10024_v44 }
 0x413   : > { %12214 = vmatmul.mubr.msk.f32.gmra.mxu0 %vm324_vm2, %v10025_v15 }
 0x414   : > { %12234 = vmatprep.mubr.msk.f32.mxu0 %vm12351_vm0, %v13879_v57 }
 0x47e   : > { %v12033_v24 = vpop.f32.mrf.mxu0 }
 0x47f   : > { %v12046_v43 = vpop.f32.mrf.mxu1 }
 0x480   : > { %v8362_v10 = vpop.f32.mrf.mxu0  ;;  %v8481_v20 = vadd.f32 %v12046_v43, %v12033_v24 }
 0x481   : > { %v8475_v47 = vpop.f32.mrf.mxu1 }
 0x482   : > { %v12053_v35 = vpop.f32.mrf.mxu0 }
 0x483   : > { %v12066_v7 = vpop.f32.mrf.mxu1  ;;  %v8607_v15 = vadd.f32 %v12053_v35, %v8461_v61 }
 0x484   : > { %v8577_v18 = vpop.f32.mrf.mxu0 }
 0x485   : > { %v13613_v31 = vpop.f32.mrf.mxu1  ;;  %v8735_v25 = vadd.f32 %v12066_v7, %v8607_v15 }
 0x486   : > { %v12056_v13 = vpop.f32.mrf.mxu0 }
 0x487   : > { %v12069_v50 = vpop.f32.mrf.mxu1  ;;  %v8609_v34 = vadd.f32 %v12056_v13, %v8471_v28  ;;  %v8606_v13 = vadd.f32 %v8577_v18, %v8456_v1 }
 0x488   : > { %v8587_v51 = vpop.f32.mrf.mxu0 }
 0x489   : > { %v8715_v30 = vpop.f32.mrf.mxu1  ;;  %v8608_v44 = vadd.f32 %v8587_v51, %v8466_v63 }
 0x48a   : > { %v12059_v4 = vpop.f32.mrf.mxu0 }
 0x48b   : > { %v12072_v6 = vpop.f32.mrf.mxu1  ;;  %v8736_v9 = vadd.f32 %v8715_v30, %v8608_v44 }
 0x48c   : > { %v8597_v40 = vpop.f32.mrf.mxu0 }
 0x48d   : > { %v8725_v0 = vpop.f32.mrf.mxu1 }
 0x48e   : > { %v12079_v21 = vpop.f32.mrf.mxu0 }
 0x48f   : > { %v13615_v23 = vpop.f32.mrf.mxu1  ;;  %v8863_v28 = vadd.f32 %v12079_v21, %v8735_v25 }
 0x490   : > { %v13617_v60 = vpop.f32.mrf.mxu0 }
 0x491   : > { %v13619_v53 = vpop.f32.mrf.mxu1 }
 0x492   : > { %v12082_v8 = vpop.f32.mrf.mxu0 }
 0x493   : > { %v12095_v58 = vpop.f32.mrf.mxu1 }
 0x494   : > { %v8843_v49 = vpop.f32.mrf.mxu0 }
 0x495   : > { %v8971_v54 = vpop.f32.mrf.mxu1  ;;  %v8864_v51 = vadd.f32 %v8843_v49, %v8736_v9 }
 0x496   : > { %v12085_v39 = vpop.f32.mrf.mxu0 }
 0x497   : > { %v13621_v41 = vpop.f32.mrf.mxu1 }
 0x498   : > { %v8853_v19 = vpop.f32.mrf.mxu0 }
 0x499   : > { %v13623_v2 = vpop.f32.mrf.mxu1 }
 0x49a   : > { %v12105_v5 = vpop.f32.mrf.mxu0 }
 0x49b   : > { %v13625_v12 = vpop.f32.mrf.mxu1 }
 0x49c   : > { %v13627_v46 = vpop.f32.mrf.mxu0 }
 0x49d   : > { %v13629_v52 = vpop.f32.mrf.mxu1 }
 0x49e   : > { %13881 = vst [vmem:[#allocation29_spill] sm:$0xff] %v13629_v52  ;;  %v12108_v17 = vpop.f32.mrf.mxu0 }
 0x49f   : > { %v12121_v56 = vpop.f32.mrf.mxu1 }
 0x4a0   : > { %v9099_v26 = vpop.f32.mrf.mxu0 }
 0x4a1   : > { %v13631_v29 = vpop.f32.mrf.mxu1 }
 0x4a2   : > { %v12111_v48 = vpop.f32.mrf.mxu0 }
 0x4a3   : > { %v13633_v59 = vpop.f32.mrf.mxu1 }
 0x4a4   : > { %v9109_v3 = vpop.f32.mrf.mxu0 }
 0x4a5   : > { %v13635_v55 = vpop.f32.mrf.mxu1 }
 0x4a6   : > { %13882 = vst [vmem:[#allocation31_spill] sm:$0xff] %v13635_v55  ;;  %v13637_v45 = vpop.f32.mrf.mxu0  ;;  %v8611_v55 = vadd.f32 %v12059_v4, %v8481_v20  ;;  %v8734_v4 = vadd.f32 %v13613_v31, %v8606_v13 }
 0x4a7   : > { %v13639_v27 = vpop.f32.mrf.mxu1 }
 0x4a8   : > { %13883 = vst [vmem:[#allocation10_spill] sm:$0xff] %v13639_v27  ;;  %v13641_v16 = vpop.f32.mrf.mxu0  ;;  %v8476_v27 = vadd.f32 %v8475_v47, %v8362_v10  ;;  %v8739_v35 = vadd.f32 %v12072_v6, %v8611_v55  ;;  %v8862_v6 = vadd.f32 %v13617_v60, %v8734_v4 }
 0x4a9   : > { %13884 = vst [vmem:[#allocation12_spill] sm:$0xff] %v13641_v16  ;;  %v13643_v42 = vpop.f32.mrf.mxu1  ;;  %v8737_v16 = vadd.f32 %v12069_v50, %v8609_v34 }
 0x4aa   : > { %13885 = vst [vmem:[#allocation14_spill] sm:$0xff] %v13643_v42  ;;  %v12134_v14 = vpop.f32.mrf.mxu0  ;;  %v8610_v36 = vadd.f32 %v8597_v40, %v8476_v27  ;;  %v8867_v33 = vadd.f32 %v12085_v39, %v8739_v35  ;;  %v8991_v27 = vadd.f32 %v13615_v23, %v8863_v28 }
 0x4ab   : > { %v13645_v22 = vpop.f32.mrf.mxu1  ;;  %v8865_v62 = vadd.f32 %v12082_v8, %v8737_v16  ;;  %v8992_v8 = vadd.f32 %v8971_v54, %v8864_v51  ;;  %v8990_v54 = vadd.f32 %v13619_v53, %v8862_v6 }
 0x4ac   : > { %v9355_v37 = vpop.f32.mrf.mxu0  ;;  %v8738_v50 = vadd.f32 %v8725_v0, %v8610_v36  ;;  %v8995_v55 = vadd.f32 %v13621_v41, %v8867_v33  ;;  %v9119_v63 = vadd.f32 %v12105_v5, %v8991_v27 }
 0x4ad   : > { %v13647_v38 = vpop.f32.mrf.mxu1  ;;  %v8993_v11 = vadd.f32 %v12095_v58, %v8865_v62  ;;  %v9120_v16 = vadd.f32 %v9099_v26, %v8992_v8  ;;  %v9118_v41 = vadd.f32 %v13627_v46, %v8990_v54 }
 0x4ae   : > { %v12137_v57 = vpop.f32.mrf.mxu0  ;;  %v8866_v7 = vadd.f32 %v8853_v19, %v8738_v50  ;;  %v9123_v34 = vadd.f32 %v12111_v48, %v8995_v55  ;;  %v9247_v20 = vadd.f32 %v13625_v12, %v9119_v63  ;;  %v13886_v48 = vld [vmem:[#allocation31_spill] sm:$0xff] }
 0x4af   : > { %v13649_v52 = vpop.f32.mrf.mxu1  ;;  %v9121_v18 = vadd.f32 %v12108_v17, %v8993_v11  ;;  %v9248_v23 = vadd.f32 %v13631_v29, %v9120_v16  ;;  %v13887_v29 = vld [vmem:[#allocation29_spill] sm:$0xff]  ;;  %v13888_v25 = vld [vmem:[#allocation10_spill] sm:$0xff] }
 0x4b0   : > { %v9365_v32 = vpop.f32.mrf.mxu0  ;;  %v8994_v39 = vadd.f32 %v13623_v2, %v8866_v7  ;;  %v9251_v44 = vadd.f32 %v13633_v59, %v9123_v34  ;;  %v9375_v2 = vadd.f32 %v13637_v45, %v9247_v20  ;;  %v13889_v59 = vld [vmem:[#allocation12_spill] sm:$0xff] }
 0x4b1   : > { %v13653_v42 = vpop.f32.mrf.mxu1  ;;  %v9249_v31 = vadd.f32 %v12121_v56, %v9121_v18  ;;  %v9376_v15 = vadd.f32 %v9355_v37, %v9248_v23  ;;  %v13890_v4 = vld [vmem:[#allocation14_spill] sm:$0xff] }
 0x4b2   : > { %v12157_v24 = vpop.f32.mrf.mxu0  ;;  %v9122_v61 = vadd.f32 %v9109_v3, %v8994_v39  ;;  %v9379_v9 = vadd.f32 %v12137_v57, %v9251_v44  ;;  %v9246_v3 = vadd.f32 %v13887_v29, %v9118_v41  ;;  %v9503_v13 = vadd.f32 %v13888_v25, %v9375_v2 }
 0x4b3   : > { %v13655_v43 = vpop.f32.mrf.mxu1  ;;  %v9377_v60 = vadd.f32 %v12134_v14, %v9249_v31  ;;  %v9504_v12 = vadd.f32 %v13647_v38, %v9376_v15 }
 0x4b4   : > { %v13657_v10 = vpop.f32.mrf.mxu0  ;;  %v9250_v53 = vadd.f32 %v13886_v48, %v9122_v61  ;;  %v9374_v37 = vadd.f32 %v13889_v59, %v9246_v3  ;;  %v9507_v51 = vadd.f32 %v13649_v52, %v9379_v9  ;;  %v9631_v50 = vadd.f32 %v12157_v24, %v9503_v13  ;;  %v10166_v13 = vld [vmem:[%s13724_s6] sm:$0x3] }
 0x4b5   : > { %v13659_v47 = vpop.f32.mrf.mxu1  ;;  %v9505_v1 = vadd.f32 %v13645_v22, %v9377_v60  ;;  %v13891_v48 = vmov 0.0  }
 0x4b6   : > { %v12160_v30 = vpop.f32.mrf.mxu0  ;;  %v9378_v46 = vadd.f32 %v9365_v32, %v9250_v53  ;;  %v9502_v8 = vadd.f32 %v13890_v4, %v9374_v37  ;;  %v9759_v27 = vadd.f32 %v13655_v43, %v9631_v50 }
 0x4b7   : > { %v12173_v40 = vpop.f32.mrf.mxu1  ;;  %v9633_v62 = vadd.f32 %v12160_v30, %v9505_v1 }
 0x4b8   : > { %v9611_v49 = vpop.f32.mrf.mxu0  ;;  %v9506_v57 = vadd.f32 %v13653_v42, %v9378_v46  ;;  %v9630_v6 = vadd.f32 %v13657_v10, %v9502_v8 }
 0x4b9   : > { %v9739_v21 = vpop.f32.mrf.mxu1  ;;  %v9632_v28 = vadd.f32 %v9611_v49, %v9504_v12  ;;  %v9761_v11 = vadd.f32 %v12173_v40, %v9633_v62  ;;  %v10889_v62 = vld [vmem:[%s13724_s6 + $0x4] sm:$0x3] }
 0x4ba   : > { %v12163_v0 = vpop.f32.mrf.mxu0  ;;  %v9758_v39 = vadd.f32 %v13659_v47, %v9630_v6 }
 0x4bb   : > { %v12176_v58 = vpop.f32.mrf.mxu1  ;;  %v9635_v33 = vadd.f32 %v12163_v0, %v9507_v51  ;;  %v9760_v30 = vadd.f32 %v9739_v21, %v9632_v28 }
 0x4bc   : > { %v9621_v19 = vpop.f32.mrf.mxu0 }
 0x4bd   : > { %v9749_v17 = vpop.f32.mrf.mxu1  ;;  %v9634_v7 = vadd.f32 %v9621_v19, %v9506_v57  ;;  %v9763_v52 = vadd.f32 %v12176_v58, %v9635_v33 }
 0x4be   : > { %v12183_v26 = vpop.f32.mrf.mxu0 }
 0x4bf   : > { %v12196_v5 = vpop.f32.mrf.mxu1  ;;  %v9887_v24 = vadd.f32 %v12183_v26, %v9759_v27  ;;  %v9762_v42 = vadd.f32 %v9749_v17, %v9634_v7 }
 0x4c0   : > { %v9857_v56 = vpop.f32.mrf.mxu0 }
 0x4c1   : > { %v9985_v14 = vpop.f32.mrf.mxu1  ;;  %v10015_v19 = vadd.f32 %v12196_v5, %v9887_v24  ;;  %v9886_v23 = vadd.f32 %v9857_v56, %v9758_v39 }
 0x4c3   : > { %v12186_v36 = vpop.f32.mrf.mxu0  ;;  %v12199_v45 = vpop.f32.mrf.mxu1  ;;  %v10014_v2 = vadd.f32 %v9985_v14, %v9886_v23  ;;  %v10882_v14 = vld [vmem:[%s13724_s6 + $0x2] sm:$0x3] }
 0x4c4   : > { %v9889_v18 = vadd.f32 %v12186_v36, %v9761_v11 }
 0x4c5   : > { %v9867_v35 = vpop.f32.mrf.mxu0  ;;  %v9995_v38 = vpop.f32.mrf.mxu1 }
 0x4c6   : > { %v9888_v49 = vadd.f32 %v9867_v35, %v9760_v30  ;;  %v10017_v40 = vadd.f32 %v12199_v45, %v9889_v18 }
 0x4c7   : > { %v12189_v22 = vpop.f32.mrf.mxu0  ;;  %v12202_v16 = vpop.f32.mrf.mxu1 }
 0x4c8   : > { %v9891_v0 = vadd.f32 %v12189_v22, %v9763_v52  ;;  %v10016_v34 = vadd.f32 %v9995_v38, %v9888_v49 }
 0x4c9   : > { %v9877_v32 = vpop.f32.mrf.mxu0  ;;  %v10005_v43 = vpop.f32.mrf.mxu1 }
 0x4ca   : > { %v9890_v21 = vadd.f32 %v9877_v32, %v9762_v42  ;;  %v10019_v10 = vadd.f32 %v12202_v16, %v9891_v0 }
 0x4cb   : > { %v12209_v55 = vpop.f32.mrf.mxu0 }
 0x4cc   : > { %v10143_v20 = vadd.f32 %v12209_v55, %v10015_v19  ;;  %v10018_v26 = vadd.f32 %v10005_v43, %v9890_v21 }
 0x4cd   : > { %v10113_v63 = vpop.f32.mrf.mxu0 }
 0x4ce   : > { %v10155_v53 = vmul.f32 0.1, %v10143_v20  ;;  %v10142_v1 = vadd.f32 %v10113_v63, %v10014_v2  ;;  %vm10149_vm14 = vcmp.gt.f32.partialorder %v10143_v20, 0.0 }
 0x4cf   : > { %v12212_v31 = vpop.f32.mrf.mxu0 }
 0x4d0   : > { %v10145_v54 = vadd.f32 %v12212_v31, %v10017_v40  ;;  %v10161_v36 = vsel %vm10149_vm14, %v10143_v20, %v10155_v53  ;;  %v10154_v12 = vmul.f32 0.1, %v10142_v1  ;;  %vm10148_vm1 = vcmp.gt.f32.partialorder %v10142_v1, 0.0 }
 0x4d1   : > { %v10123_v61 = vpop.f32.mrf.mxu0 }
 0x4d2   : > { %vm10151_vm11 = vcmp.gt.f32.partialorder %v10145_v54, 0.0  ;;  %v10157_v58 = vmul.f32 0.1, %v10145_v54  ;;  %v10144_v60 = vadd.f32 %v10123_v61, %v10016_v34  ;;  %v10160_v25 = vsel %vm10148_vm1, %v10142_v1, %v10154_v12 }
 0x4d3   : > { %v12215_v41 = vpop.f32.mrf.mxu0 }
 0x4d4   : > { %v10163_v17 = vsel %vm10151_vm11, %v10145_v54, %v10157_v58  ;;  %v10156_v44 = vmul.f32 0.1, %v10144_v60  ;;  %v10147_v15 = vadd.f32 %v12215_v41, %v10019_v10  ;;  %vm10150_vm12 = vcmp.gt.f32.partialorder %v10144_v60, 0.0 }
 0x4d5   : > { %v10133_v47 = vpop.f32.mrf.mxu0  ;;  %12217 = vmatpush3.xpose.msk.msra.mxu1 %vm324_vm2, %v10163_v17 }
 0x4d6   : > { %vm10153_vm13 = vcmp.gt.f32.partialorder %v10147_v15, 0.0  ;;  %v10159_v5 = vmul.f32 0.1, %v10147_v15  ;;  %v10146_v56 = vadd.f32 %v10133_v47, %v10018_v26  ;;  %12218 = vmatprep.subr.mxu1 %v13891_v48  ;;  %v10162_v9 = vsel %vm10150_vm12, %v10144_v60, %v10156_v44 }
 0x4d8   : > { %v10165_v29 = vsel %vm10153_vm13, %v10147_v15, %v10159_v5  ;;  %v10158_v3 = vmul.f32 0.1, %v10146_v56  ;;  %vm10152_vm15 = vcmp.gt.f32.partialorder %v10146_v56, 0.0 }
 0x4d9   : > { %12219 = vmatpush3.xpose.msk.msra.mxu1 %vm324_vm2, %v10162_v9  ;;  %12231 = vmatpush3.xpose.msk.msra.mxu0 %vm324_vm2, %v10165_v29 }
 0x4da   : > { %12223 = vmatprep.subr.mxu1 %v13891_v48  ;;  %12232 = vmatprep.subr.mxu0 %v13891_v48  ;;  %v10164_v46 = vsel %vm10152_vm15, %v10146_v56, %v10158_v3 }
 0x4dc   : > { %12221 = vmatmul.mubr.msk.f32.vlgmr.msra.gmra.mxu1 %vm324_vm2, %v10882_v14 }
 0x4dd   : > { %12224 = vmatpush3.xpose.msk.msra.mxu1 %vm324_vm2, %v10161_v36  ;;  %12233 = vmatpush3.xpose.msk.msra.mxu0 %vm324_vm2, %v10164_v46 }
 0x4de   : > { %12225 = vmatprep.subr.mxu1 %v13891_v48  ;;  %12227 = vmatprep.mubr.msk.f32.mxu1 %vm12351_vm0, %v13891_v48 }
 0x4e0   : > { %12235 = vmatmul.mubr.msk.f32.vlgmr.msra.gmra.mxu0 %vm324_vm2, %v10889_v62 }
 0x4e1   : > { %12226 = vmatpush3.xpose.msk.msra.mxu1 %vm324_vm2, %v10160_v25 }
 0x4e4   : > { %12228 = vmatmul.mubr.msk.f32.vlgmr.msra.gmra.mxu1 %vm324_vm2, %v10166_v13 }
 0x59c   : > { %v10244_v59 = vpop.f32.mrf.mxu1 }
 0x59e   : > { %v12222_v37 = vpop.f32.mrf.mxu1 }
 0x5a0   : > { %v10404_v35 = vpop.f32.mrf.mxu0 }
 0x5a2   : > { %v12236_v45 = vpop.f32.mrf.mxu0 }
 0x5a4   : > { %v10323_v51 = vpop.f32.mrf.mxu1 }
 0x5a5   : > { %v10324_v28 = vadd.f32 %v10323_v51, %v10244_v59 }
 0x5a6   : > { %v12229_v50 = vpop.f32.mrf.mxu1 }
 0x5a7   : > { %v10408_v22 = vadd.f32 %v10404_v35, %v10324_v28 }
 0x5a9   : > { %v10409_v57 = vsel %vm327_vm3, %v10408_v22, -inf }
 0x5aa   : > { %10410 = vmax.xlane.f32.xlu0 %v10409_v57 }
 0x633   : > { %v10411_v11 = vpop.xlane.xlu0 %10410 }
 0x634   : > { %v10412_v33 = vsub.f32 %v10408_v22, %v10411_v11 }
 0x636   : > { %v10413_v4 = vmul.f32 1.442695, %v10412_v33 }
 0x638   : > { %12272 = vpow2.f32 %v10413_v4 }
 0x645   : > { %v12273_v8 = vpop.eup %12272 }
 0x646   : > { %v10415_v38 = vsel %vm327_vm3, %v12273_v8, 0.0 }
 0x647   : > { %10416 = vadd.xlane.f32.xlu1 %v10415_v38 }
 0x6d0   : > { %v10417_v32 = vpop.xlane.xlu1 %10416 }
 0x6d1   : > { %12274 = vlog2.f32 %v10417_v32 }
 0x6de   : > { %v12275_v30 = vpop.eup %12274 }
 0x6df   : > { %v10419_v7 = vmul.f32 0.6931472, %v12275_v30 }
 0x6e1   : > { %v10420_v18 = vsub.f32 %v10412_v33, %v10419_v7 }
 0x6e3   : > { %10421 = vst.msk [vmem:[%s323_s18] sm:$0x3] %vm327_vm3, %v10420_v18 }
 0x6e4 PF: > { %s19_s24 = sadd.s32 1, %s12344_s24  }
 0x6e5   : > { %p16_p2 = scmp.ge.s32.totalorder %s19_s24, 4  }
 0x6e7   :  { %18 = sbr.rel (!%p16_p2) target bundleno = 2 (0x2), region = 185 }
 0x6ec   :  { %10441 = vsyncpa [#allocation4], 1 }
 0x6ed   :  { %10443 = vsyncpa [#allocation4 + $0x1], 1 }
 0x6ee   :  { %10444 = vsyncpa [#allocation6], 1 }

</bundles_post_ra>
